<compile_context>
chip_gen: v7x
topology: tpu7x:2x2x1
jax: 0.10.0
libtpu: 0.0.40
codegen_flags: <defaults>
</compile_context>

<pallas_src>
import functools

import jax
import jax.numpy as jnp
import numpy as np
from jax.experimental import pallas as pl
from jax.experimental.pallas import tpu as pltpu

# Prefer 512/256 tiles (256-deep MXU on v6e/v7x), fall back to 128 (v5e 128-deep MXU).
_TM_PREFS = (512, 256, 128)
_TN_PREFS = (512, 256, 128)
_TK_PREFS = (512, 256, 128)

# Explicit VMEM budget (v7x has 64 MiB physical / 32 MiB scoped default); tiles above are
# chosen so double-buffered A + W + bias + residual + outputs + acc stay well under this.
_VMEM_LIMIT = 32 * 1024 * 1024


def _round_up(v, m):
    return ((v + m - 1) // m) * m


def _pick_tile(n, prefs):
    for t in prefs:
        if n % t == 0:
            return t
    return n


def _maybe_pad(x, shape):
    pads = tuple((0, t - s) for s, t in zip(x.shape, shape))
    if all(p == 0 for _, p in pads):
        return x
    return jnp.pad(x, pads)


# ----------------------------------------------------------------------------
# Pallas kernels
# ----------------------------------------------------------------------------
def _quick_gelu(y):
    # x * sigmoid(1.702 * x)
    return y * (1.0 / (1.0 + jnp.exp(-1.702 * y)))


def _ln_kernel(x_ref, g_ref, b_ref, o_ref, *, eps):
    x = x_ref[...].astype(jnp.float32)
    mu = jnp.mean(x, axis=-1, keepdims=True)
    xc = x - mu
    var = jnp.mean(xc * xc, axis=-1, keepdims=True)
    y = xc * jax.lax.rsqrt(var + eps) * g_ref[...] + b_ref[...]
    o_ref[...] = y.astype(o_ref.dtype)


def _mm_kernel(a_ref, w_ref, bias_ref, o_ref, acc_ref, *, act):
    # grid = (M tiles, N tiles, K tiles); K is the reduction axis ("arbitrary").
    @pl.when(pl.program_id(2) == 0)
    def _init():
        acc_ref[...] = jnp.zeros_like(acc_ref)

    acc_ref[...] += jnp.dot(a_ref[...], w_ref[...], preferred_element_type=jnp.float32)

    @pl.when(pl.program_id(2) == pl.num_programs(2) - 1)
    def _fin():
        y = acc_ref[...] + bias_ref[...]
        if act == "quick_gelu":
            y = _quick_gelu(y)
        o_ref[...] = y.astype(o_ref.dtype)


def _mm_res_kernel(a_ref, w_ref, bias_ref, res_ref, o_ref, acc_ref, *, act):
    @pl.when(pl.program_id(2) == 0)
    def _init():
        acc_ref[...] = jnp.zeros_like(acc_ref)

    acc_ref[...] += jnp.dot(a_ref[...], w_ref[...], preferred_element_type=jnp.float32)

    @pl.when(pl.program_id(2) == pl.num_programs(2) - 1)
    def _fin():
        y = acc_ref[...] + bias_ref[...]
        if act == "quick_gelu":
            y = _quick_gelu(y)
        o_ref[...] = (y + res_ref[...].astype(jnp.float32)).astype(o_ref.dtype)


def _mm_res_ln_kernel(a_ref, w_ref, bias_ref, res_ref, g_ref, b2_ref,
                      x_ref, h_ref, acc_ref, *, act, eps):
    # grid = (M tiles, K tiles); the whole output width is resident, so the row-wise
    # LayerNorm of the *next* op is fused into the epilogue (saves one f32 HBM round trip).
    @pl.when(pl.program_id(1) == 0)
    def _init():
        acc_ref[...] = jnp.zeros_like(acc_ref)

    acc_ref[...] += jnp.dot(a_ref[...], w_ref[...], preferred_element_type=jnp.float32)

    @pl.when(pl.program_id(1) == pl.num_programs(1) - 1)
    def _fin():
        y = acc_ref[...] + bias_ref[...]
        if act == "quick_gelu":
            y = _quick_gelu(y)
        x_new = y + res_ref[...].astype(jnp.float32)   # f32 residual stream
        x_ref[...] = x_new.astype(x_ref.dtype)
        mu = jnp.mean(x_new, axis=-1, keepdims=True)
        xc = x_new - mu
        var = jnp.mean(xc * xc, axis=-1, keepdims=True)
        h = xc * jax.lax.rsqrt(var + eps) * g_ref[...] + b2_ref[...]
        h_ref[...] = h.astype(h_ref.dtype)


def _attn_kernel(qkv_ref, *rest, scale, heads, dh, bn, has_mask):
    # qkv_ref: (bn, L, 3*D) bf16 for `bn` batch elements; all heads handled per grid step.
    if has_mask:
        mask_ref, o_ref = rest
        mask = mask_ref[...]
    else:
        (o_ref,) = rest
    D = heads * dh
    for b in range(bn):
        qkv = qkv_ref[b]                                   # (L, 3D) bf16
        outs = []
        for h in range(heads):
            q = qkv[:, h * dh:(h + 1) * dh]                # bf16 operands for the MXU
            k = qkv[:, D + h * dh:D + (h + 1) * dh]
            v = qkv[:, 2 * D + h * dh:2 * D + (h + 1) * dh]
            # s = q @ k^T (contract head dim), f32 accumulation.
            s = jax.lax.dot_general(q, k, (((1,), (1,)), ((), ())),
                                    preferred_element_type=jnp.float32) * scale
            if has_mask:
                s = s + mask
            s = s - jnp.max(s, axis=-1, keepdims=True)
            p = jnp.exp(s)
            p = p * pl.reciprocal(jnp.sum(p, axis=-1, keepdims=True), approx=True)
            o = jnp.dot(p.astype(jnp.bfloat16), v, preferred_element_type=jnp.float32)
            outs.append(o)
        # Lane-dense (L, D) store (no 32-wide masked stores per head).
        o_ref[b] = jnp.concatenate(outs, axis=-1).astype(o_ref.dtype)


# ----------------------------------------------------------------------------
# Pallas wrappers
# ----------------------------------------------------------------------------
def pallas_layernorm(x, gamma, beta, *, out_dtype=jnp.bfloat16, eps=1e-5):
    """x: (M, D) -> (M, D) out_dtype. Per-row LayerNorm + affine (f32 math)."""
    M, D = x.shape
    Mp = _round_up(M, 8)
    tm = _pick_tile(Mp, _TM_PREFS)
    x_p = _maybe_pad(x, (Mp, D))
    out = pl.pallas_call(
        functools.partial(_ln_kernel, eps=eps),
        out_shape=jax.ShapeDtypeStruct((Mp, D), out_dtype),
        grid=(Mp // tm,),
        in_specs=[
            pl.BlockSpec((tm, D), lambda i: (i, 0)),
            pl.BlockSpec((1, D), lambda i: (0, 0)),
            pl.BlockSpec((1, D), lambda i: (0, 0)),
        ],
        out_specs=pl.BlockSpec((tm, D), lambda i: (i, 0)),
        compiler_params=pltpu.CompilerParams(
            dimension_semantics=("parallel",), vmem_limit_bytes=_VMEM_LIMIT),
    )(x_p, gamma.reshape(1, D).astype(jnp.float32), beta.reshape(1, D).astype(jnp.float32))
    return out[:M] if Mp != M else out


def pallas_matmul(a, w, bias, *, act=None, residual=None, ln_params=None,
                  eps=1e-5, out_dtype=jnp.float32, ln_dtype=jnp.bfloat16):
    """y = act(a @ w + bias) [+ residual] [, LN(y+residual)].

    a (M,K) any float dtype (cast to bf16), w (K,N) bf16, bias (N,) f32.
    If ln_params=(gamma, beta) and residual is given, returns (x_new f32, LN(x_new) bf16),
    with both the residual add and the LayerNorm fused into the matmul epilogue.
    """
    M, K = a.shape
    Kw, N = w.shape
    assert K == Kw
    Mp, Kp, Np = _round_up(M, 8), _round_up(K, 128), _round_up(N, 128)
    tm = _pick_tile(Mp, _TM_PREFS)
    tk = _pick_tile(Kp, _TK_PREFS)

    a_p = _maybe_pad(a.astype(jnp.bfloat16), (Mp, Kp))
    w_p = _maybe_pad(w.astype(jnp.bfloat16), (Kp, Np))
    bias_p = _maybe_pad(bias.reshape(1, N).astype(jnp.float32), (1, Np))

    if ln_params is not None:
        assert residual is not None
        if Np != N:
            # Column padding would corrupt LN statistics; fall back to separate LN.
            x_new = pallas_matmul(a, w, bias, act=act, residual=residual,
                                  out_dtype=jnp.float32)
            return x_new, pallas_layernorm(x_new, *ln_params, out_dtype=ln_dtype, eps=eps)
        g, b2 = ln_params
        res_p = _maybe_pad(residual.astype(jnp.float32), (Mp, Np))
        x_new, h = pl.pallas_call(
            functools.partial(_mm_res_ln_kernel, act=act, eps=eps),
            out_shape=(jax.ShapeDtypeStruct((Mp, Np), jnp.float32),
                       jax.ShapeDtypeStruct((Mp, Np), ln_dtype)),
            grid=(Mp // tm, Kp // tk),
            in_specs=[
                pl.BlockSpec((tm, tk), lambda i, k: (i, k)),
                pl.BlockSpec((tk, Np), lambda i, k: (k, 0)),
                pl.BlockSpec((1, Np), lambda i, k: (0, 0)),
                pl.BlockSpec((tm, Np), lambda i, k: (i, 0)),
                pl.BlockSpec((1, Np), lambda i, k: (0, 0)),
                pl.BlockSpec((1, Np), lambda i, k: (0, 0)),
            ],
            out_specs=(pl.BlockSpec((tm, Np), lambda i, k: (i, 0)),
                       pl.BlockSpec((tm, Np), lambda i, k: (i, 0))),
            scratch_shapes=[pltpu.VMEM((tm, Np), jnp.float32)],
            compiler_params=pltpu.CompilerParams(
                dimension_semantics=("parallel", "arbitrary"),
                vmem_limit_bytes=_VMEM_LIMIT),
        )(a_p, w_p, bias_p, res_p,
          g.reshape(1, N).astype(jnp.float32), b2.reshape(1, N).astype(jnp.float32))
        if Mp != M:
            x_new, h = x_new[:M], h[:M]
        return x_new, h

    tn = _pick_tile(Np, _TN_PREFS)
    in_specs = [
        pl.BlockSpec((tm, tk), lambda i, j, k: (i, k)),
        pl.BlockSpec((tk, tn), lambda i, j, k: (k, j)),
        pl.BlockSpec((1, tn), lambda i, j, k: (0, j)),
    ]
    args = [a_p, w_p, bias_p]
    if residual is not None:
        res_p = _maybe_pad(residual.astype(jnp.float32), (Mp, Np))
        in_specs.append(pl.BlockSpec((tm, tn), lambda i, j, k: (i, j)))
        args.append(res_p)
        kern = functools.partial(_mm_res_kernel, act=act)
    else:
        kern = functools.partial(_mm_kernel, act=act)

    out = pl.pallas_call(
        kern,
        out_shape=jax.ShapeDtypeStruct((Mp, Np), out_dtype),
        grid=(Mp // tm, Np // tn, Kp // tk),
        in_specs=in_specs,
        out_specs=pl.BlockSpec((tm, tn), lambda i, j, k: (i, j)),
        scratch_shapes=[pltpu.VMEM((tm, tn), jnp.float32)],
        compiler_params=pltpu.CompilerParams(
            dimension_semantics=("parallel", "parallel", "arbitrary"),
            vmem_limit_bytes=_VMEM_LIMIT),
    )(*args)
    if Mp != M or Np != N:
        out = out[:M, :N]
    return out


def pallas_attention(qkv, *, heads, mask=None, out_dtype=jnp.bfloat16):
    """qkv: (B, L, 3D) bf16 in [q|k|v] column layout -> (B, L, D) out_dtype.

    Grid over batch (parallel, megacore-friendly), >= 8 heads per step, lane-dense output.
    """
    # TODO(synk): for long sequences this needs a flash-style tiled (L_q x L_k) kernel.
    B, L, D3 = qkv.shape
    D = D3 // 3
    assert D == heads * (D // heads)
    dh = D // heads
    # Pick a batch block so each grid step covers >= 8 heads (amortize MXU fill/drain).
    target = max(1, (8 + heads - 1) // heads)
    bn = 1
    for cand in range(min(target, B), 0, -1):
        if B % cand == 0:
            bn = cand
            break

    has_mask = mask is not None
    in_specs = [pl.BlockSpec((bn, L, D3), lambda b: (b, 0, 0))]
    args = [qkv.astype(jnp.bfloat16)]
    if has_mask:
        in_specs.append(pl.BlockSpec((L, L), lambda b: (0, 0)))
        args.append(mask.astype(jnp.float32))

    return pl.pallas_call(
        functools.partial(_attn_kernel, scale=dh ** -0.5, heads=heads, dh=dh,
                          bn=bn, has_mask=has_mask),
        out_shape=jax.ShapeDtypeStruct((B, L, D), out_dtype),
        grid=(B // bn,),
        in_specs=in_specs,
        out_specs=pl.BlockSpec((bn, L, D), lambda b: (b, 0, 0)),
        compiler_params=pltpu.CompilerParams(
            dimension_semantics=("parallel",), vmem_limit_bytes=_VMEM_LIMIT),
    )(*args)


# ----------------------------------------------------------------------------
# ResidualAttentionBlock / Transformer forward
# ----------------------------------------------------------------------------
def residual_attention_block(x, h, p, *, B, L, D, heads, attn_mask, next_ln):
    """x: (B*L, D) f32 residual stream (batch-major), h: (B*L, D) bf16 = ln_1(x).

    Returns (x_out, h_out) where h_out = ln_1_next(x_out) if next_ln is given else None.
    """
    M = B * L
    # qkv projection straight to bf16; rows are already (batch, seq)-ordered so the
    # per-batch / per-head split below is a free reshape + in-VMEM slice (no HBM transposes).
    qkv = pallas_matmul(h, p["w_in"], p["b_in"], out_dtype=jnp.bfloat16)       # (M, 3D)
    attn = pallas_attention(qkv.reshape(B, L, 3 * D), heads=heads, mask=attn_mask)
    attn = attn.reshape(M, D)                                                  # bf16, lane-dense
    # TODO(synk): DropPath (stochastic depth) is identity here (drop_path_rate=0 / eval mode).

    # out_proj + residual add + this block's ln_2, all fused in one kernel epilogue.
    x1, h2 = pallas_matmul(attn, p["w_out"], p["b_out"], residual=x,
                           ln_params=(p["ln2_g"], p["ln2_b"]))                 # f32, bf16

    # MLP: c_fc + QuickGELU fused; c_proj + residual (+ next block's ln_1) fused.
    f = pallas_matmul(h2, p["w_fc"], p["b_fc"], act="quick_gelu",
                      out_dtype=jnp.bfloat16)                                  # (M, 4D) bf16
    if next_ln is not None:
        x2, h_next = pallas_matmul(f, p["w_proj"], p["b_proj"], residual=x1,
                                   ln_params=next_ln)
        return x2, h_next
    x2 = pallas_matmul(f, p["w_proj"], p["b_proj"], residual=x1,
                       out_dtype=jnp.float32)
    return x2, None


def transformer_forward(params, x, heads, attn_mask=None):
    """x: (L, N, D) -- PyTorch nn.MultiheadAttention default (seq, batch, dim) layout."""
    L, N, D = x.shape
    blocks = params["resblocks"]
    # Work internally in (batch, seq, dim) order so each batch element's sequence is a
    # contiguous row block (free head split/merge); transpose once at entry and exit.
    xf = jnp.transpose(x.astype(jnp.float32), (1, 0, 2)).reshape(N * L, D)
    h = pallas_layernorm(xf, blocks[0]["ln1_g"], blocks[0]["ln1_b"])
    for i, blk in enumerate(blocks):
        next_ln = None
        if i + 1 < len(blocks):
            nxt = blocks[i + 1]
            next_ln = (nxt["ln1_g"], nxt["ln1_b"])
        xf, h = residual_attention_block(xf, h, blk, B=N, L=L, D=D, heads=heads,
                                         attn_mask=attn_mask, next_ln=next_ln)
    return jnp.transpose(xf.reshape(N, L, D), (1, 0, 2))


# ----------------------------------------------------------------------------
# Parameter init (deterministic, synthetic)
# ----------------------------------------------------------------------------
def init_params(key, *, width=128, layers=2, heads=4):
    keys = iter(jax.random.split(key, 16 * layers + 4))

    def nk():
        return next(keys)

    def linear(cin, cout):
        w = (jax.random.normal(nk(), (cin, cout), jnp.float32)
             / np.sqrt(cin)).astype(jnp.bfloat16)              # bf16 weights for the MXU
        b = 0.01 * jax.random.normal(nk(), (cout,), jnp.float32)
        return w, b

    def ln(c):
        return (1.0 + 0.1 * jax.random.normal(nk(), (c,), jnp.float32),
                0.1 * jax.random.normal(nk(), (c,), jnp.float32))

    blocks = []
    for _ in range(layers):
        ln1_g, ln1_b = ln(width)
        ln2_g, ln2_b = ln(width)
        w_in, b_in = linear(width, 3 * width)       # MultiheadAttention in_proj ([q|k|v] cols)
        w_out, b_out = linear(width, width)         # MultiheadAttention out_proj
        w_fc, b_fc = linear(width, 4 * width)       # mlp.c_fc
        w_proj, b_proj = linear(4 * width, width)   # mlp.c_proj
        blocks.append(dict(
            ln1_g=ln1_g, ln1_b=ln1_b, ln2_g=ln2_g, ln2_b=ln2_b,
            w_in=w_in, b_in=b_in, w_out=w_out, b_out=b_out,
            w_fc=w_fc, b_fc=b_fc, w_proj=w_proj, b_proj=b_proj,
        ))
    return {"resblocks": blocks}


# ----------------------------------------------------------------------------
if __name__ == "__main__":
    key = jax.random.PRNGKey(0)
    kp, kx = jax.random.split(key)

    # Small config: width=128, layers=2, heads=4 (head_dim=32), seq L=16, batch N=8.
    width, layers, heads = 128, 2, 4
    L, N = 16, 8

    params = init_params(kp, width=width, layers=layers, heads=heads)
    x = 0.02 * jax.random.normal(kx, (L, N, width), jnp.float32)

    fwd = jax.jit(transformer_forward, static_argnames=("heads",))
    out = fwd(params, x, heads=heads)            # attn_mask=None (module default)
    out = jax.block_until_ready(out)

    assert out.shape == (L, N, width), out.shape
    assert bool(jnp.all(jnp.isfinite(out)))

    print("KERNEL_OK")
</pallas_src>

<mosaic_0001>
module attributes {stable_mosaic.version = 11 : i64} {
  func.func @_ln_kernel(%arg0: i32, %arg1: memref<128x128xf32, #tpu.memory_space<vmem>>, %arg2: memref<1x128xf32, #tpu.memory_space<vmem>>, %arg3: memref<1x128xf32, #tpu.memory_space<vmem>>, %arg4: memref<128x128xbf16, #tpu.memory_space<vmem>>) attributes {dimension_semantics = [#tpu.dimension_semantics<parallel>], iteration_bounds = array<i64: 1>, scalar_prefetch = 0 : i64, scratch_operands = 0 : i64, tpu.core_type = #tpu.core_type<tc>, window_params = [{transform_indices = @transform_0, window_bounds = array<i64: 128, 128>}, {pipeline_mode = #tpu.pipeline_mode<synchronous>, transform_indices = @transform_1, window_bounds = array<i64: 1, 128>}, {pipeline_mode = #tpu.pipeline_mode<synchronous>, transform_indices = @transform_2, window_bounds = array<i64: 1, 128>}, {transform_indices = @transform_3, window_bounds = array<i64: 128, 128>}]} {
    %c0 = arith.constant 0 : index
    %c0_0 = arith.constant 0 : index
    %0 = vector.load %arg1[%c0, %c0_0] : memref<128x128xf32, #tpu.memory_space<vmem>>, vector<128x128xf32>
    %cst = arith.constant dense<0.000000e+00> : vector<128xf32>
    %1 = vector.multi_reduction <add>, %0, %cst [1] : vector<128x128xf32> to vector<128xf32>
    %2 = vector.shape_cast %1 : vector<128xf32> to vector<128x1xf32>
    %cst_1 = arith.constant 1.280000e+02 : f32
    %3 = vector.broadcast %cst_1 : f32 to vector<128x1xf32>
    %4 = arith.divf %2, %3 : vector<128x1xf32>
    %5 = vector.broadcast %4 : vector<128x1xf32> to vector<128x128xf32>
    %6 = arith.subf %0, %5 : vector<128x128xf32>
    %7 = arith.mulf %6, %6 : vector<128x128xf32>
    %cst_2 = arith.constant dense<0.000000e+00> : vector<128xf32>
    %8 = vector.multi_reduction <add>, %7, %cst_2 [1] : vector<128x128xf32> to vector<128xf32>
    %9 = vector.shape_cast %8 : vector<128xf32> to vector<128x1xf32>
    %cst_3 = arith.constant 1.280000e+02 : f32
    %10 = vector.broadcast %cst_3 : f32 to vector<128x1xf32>
    %11 = arith.divf %9, %10 : vector<128x1xf32>
    %cst_4 = arith.constant 9.99999974E-6 : f32
    %12 = vector.broadcast %cst_4 : f32 to vector<128x1xf32>
    %13 = arith.addf %11, %12 : vector<128x1xf32>
    %14 = math.rsqrt %13 : vector<128x1xf32>
    %15 = vector.broadcast %14 : vector<128x1xf32> to vector<128x128xf32>
    %16 = arith.mulf %6, %15 : vector<128x128xf32>
    %c0_5 = arith.constant 0 : index
    %c0_6 = arith.constant 0 : index
    %17 = vector.load %arg2[%c0_5, %c0_6] : memref<1x128xf32, #tpu.memory_space<vmem>>, vector<1x128xf32>
    %18 = vector.broadcast %17 : vector<1x128xf32> to vector<128x128xf32>
    %19 = arith.mulf %16, %18 : vector<128x128xf32>
    %c0_7 = arith.constant 0 : index
    %c0_8 = arith.constant 0 : index
    %20 = vector.load %arg3[%c0_7, %c0_8] : memref<1x128xf32, #tpu.memory_space<vmem>>, vector<1x128xf32>
    %21 = vector.broadcast %20 : vector<1x128xf32> to vector<128x128xf32>
    %22 = arith.addf %19, %21 : vector<128x128xf32>
    %23 = arith.truncf %22 : vector<128x128xf32> to vector<128x128xbf16>
    %c0_9 = arith.constant 0 : index
    %c0_10 = arith.constant 0 : index
    %24 = vector.load %arg4[%c0_9, %c0_10] : memref<128x128xbf16, #tpu.memory_space<vmem>>, vector<128x128xbf16>
    tpu.vector_store %arg4[%c0_9, %c0_10], %23 {strides = array<i32>} : memref<128x128xbf16, #tpu.memory_space<vmem>>, vector<128x128xbf16>,
    return
  }
  func.func @transform_0(%arg0: i32) -> (i32, i32) {
    %c0_i32 = arith.constant 0 : i32
    %c0_i32_0 = arith.constant 0 : i32
    return %arg0, %c0_i32 : i32, i32
  }
  func.func @transform_1(%arg0: i32) -> (i32, i32) {
    %c0_i32 = arith.constant 0 : i32
    %c0_i32_0 = arith.constant 0 : i32
    %c0_i32_1 = arith.constant 0 : i32
    return %c0_i32, %c0_i32_0 : i32, i32
  }
  func.func @transform_2(%arg0: i32) -> (i32, i32) {
    %c0_i32 = arith.constant 0 : i32
    %c0_i32_0 = arith.constant 0 : i32
    %c0_i32_1 = arith.constant 0 : i32
    return %c0_i32, %c0_i32_0 : i32, i32
  }
  func.func @transform_3(%arg0: i32) -> (i32, i32) {
    %c0_i32 = arith.constant 0 : i32
    %c0_i32_0 = arith.constant 0 : i32
    return %arg0, %c0_i32 : i32, i32
  }
}

module attributes {stable_mosaic.version = 11 : i64} {
  func.func @_mm_kernel(%arg0: i32, %arg1: i32, %arg2: i32, %arg3: memref<128x128xbf16, #tpu.memory_space<vmem>>, %arg4: memref<128x128xbf16, #tpu.memory_space<vmem>>, %arg5: memref<1x128xf32, #tpu.memory_space<vmem>>, %arg6: memref<128x128xbf16, #tpu.memory_space<vmem>>, %arg7: memref<128x128xf32, #tpu.memory_space<vmem>>) attributes {dimension_semantics = [#tpu.dimension_semantics<parallel>, #tpu.dimension_semantics<parallel>, #tpu.dimension_semantics<arbitrary>], iteration_bounds = array<i64: 1, 3, 1>, scalar_prefetch = 0 : i64, scratch_operands = 1 : i64, tpu.core_type = #tpu.core_type<tc>, window_params = [{transform_indices = @transform_0, window_bounds = array<i64: 128, 128>}, {transform_indices = @transform_1, window_bounds = array<i64: 128, 128>}, {transform_indices = @transform_2, window_bounds = array<i64: 1, 128>}, {transform_indices = @transform_3, window_bounds = array<i64: 128, 128>}]} {
    %c0_i32 = arith.constant 0 : i32
    %0 = arith.cmpi eq, %arg2, %c0_i32 : i32
    %1 = arith.extui %0 : i1 to i32
    %c0_i32_0 = arith.constant 0 : i32
    %2 = arith.cmpi ne, %1, %c0_i32_0 : i32
    scf.if %2 {
      %cst_10 = arith.constant 0.000000e+00 : f32
      %12 = vector.broadcast %cst_10 : f32 to vector<128x128xf32>
      %c0_11 = arith.constant 0 : index
      %c0_12 = arith.constant 0 : index
      %13 = vector.load %arg7[%c0_11, %c0_12] : memref<128x128xf32, #tpu.memory_space<vmem>>, vector<128x128xf32>
      tpu.vector_store %arg7[%c0_11, %c0_12], %12 {strides = array<i32>} : memref<128x128xf32, #tpu.memory_space<vmem>>, vector<128x128xf32>,
    } else {
    }
    %c0 = arith.constant 0 : index
    %c0_1 = arith.constant 0 : index
    %3 = vector.load %arg7[%c0, %c0_1] : memref<128x128xf32, #tpu.memory_space<vmem>>, vector<128x128xf32>
    %c0_2 = arith.constant 0 : index
    %c0_3 = arith.constant 0 : index
    %4 = vector.load %arg3[%c0_2, %c0_3] : memref<128x128xbf16, #tpu.memory_space<vmem>>, vector<128x128xbf16>
    %c0_4 = arith.constant 0 : index
    %c0_5 = arith.constant 0 : index
    %5 = vector.load %arg4[%c0_4, %c0_5] : memref<128x128xbf16, #tpu.memory_space<vmem>>, vector<128x128xbf16>
    %cst = arith.constant dense<0.000000e+00> : vector<128x128xf32>
    %6 = tpu.matmul %4, %5, %cst {dimension_numbers = #tpu.dot_dimension_numbers<[1], [0], [0], [1], [0, 0, 1, 1], [], []>} : vector<128x128xbf16>, vector<128x128xbf16>, vector<128x128xf32> -> vector<128x128xf32>
    %7 = arith.addf %3, %6 : vector<128x128xf32>
    %c0_6 = arith.constant 0 : index
    %c0_7 = arith.constant 0 : index
    %8 = vector.load %arg7[%c0_6, %c0_7] : memref<128x128xf32, #tpu.memory_space<vmem>>, vector<128x128xf32>
    tpu.vector_store %arg7[%c0_6, %c0_7], %7 {strides = array<i32>} : memref<128x128xf32, #tpu.memory_space<vmem>>, vector<128x128xf32>,
    %c0_i32_8 = arith.constant 0 : i32
    %9 = arith.cmpi eq, %arg2, %c0_i32_8 : i32
    %10 = arith.extui %9 : i1 to i32
    %c0_i32_9 = arith.constant 0 : i32
    %11 = arith.cmpi ne, %10, %c0_i32_9 : i32
    scf.if %11 {
      %c0_10 = arith.constant 0 : index
      %c0_11 = arith.constant 0 : index
      %12 = vector.load %arg7[%c0_10, %c0_11] : memref<128x128xf32, #tpu.memory_space<vmem>>, vector<128x128xf32>
      %c0_12 = arith.constant 0 : index
      %c0_13 = arith.constant 0 : index
      %13 = vector.load %arg5[%c0_12, %c0_13] : memref<1x128xf32, #tpu.memory_space<vmem>>, vector<1x128xf32>
      %14 = vector.broadcast %13 : vector<1x128xf32> to vector<128x128xf32>
      %15 = arith.addf %12, %14 : vector<128x128xf32>
      %16 = arith.truncf %15 : vector<128x128xf32> to vector<128x128xbf16>
      %c0_14 = arith.constant 0 : index
      %c0_15 = arith.constant 0 : index
      %17 = vector.load %arg6[%c0_14, %c0_15] : memref<128x128xbf16, #tpu.memory_space<vmem>>, vector<128x128xbf16>
      tpu.vector_store %arg6[%c0_14, %c0_15], %16 {strides = array<i32>} : memref<128x128xbf16, #tpu.memory_space<vmem>>, vector<128x128xbf16>,
    } else {
    }
    return
  }
  func.func @transform_0(%arg0: i32, %arg1: i32, %arg2: i32) -> (i32, i32) {
    %c0_i32 = arith.constant 0 : i32
    return %arg0, %arg2 : i32, i32
  }
  func.func @transform_1(%arg0: i32, %arg1: i32, %arg2: i32) -> (i32, i32) {
    %c0_i32 = arith.constant 0 : i32
    return %arg2, %arg1 : i32, i32
  }
  func.func @transform_2(%arg0: i32, %arg1: i32, %arg2: i32) -> (i32, i32) {
    %c0_i32 = arith.constant 0 : i32
    %c0_i32_0 = arith.constant 0 : i32
    return %c0_i32, %arg1 : i32, i32
  }
  func.func @transform_3(%arg0: i32, %arg1: i32, %arg2: i32) -> (i32, i32) {
    %c0_i32 = arith.constant 0 : i32
    return %arg0, %arg1 : i32, i32
  }
}

module attributes {stable_mosaic.version = 11 : i64} {
  func.func @_attn_kernel(%arg0: i32, %arg1: memref<2x16x384xbf16, #tpu.memory_space<vmem>>, %arg2: memref<2x16x128xbf16, #tpu.memory_space<vmem>>) attributes {dimension_semantics = [#tpu.dimension_semantics<parallel>], iteration_bounds = array<i64: 4>, scalar_prefetch = 0 : i64, scratch_operands = 0 : i64, tpu.core_type = #tpu.core_type<tc>, window_params = [{transform_indices = @transform_0, window_bounds = array<i64: 2, 16, 384>}, {transform_indices = @transform_1, window_bounds = array<i64: 2, 16, 128>}]} {
    %c0 = arith.constant 0 : index
    %c0_0 = arith.constant 0 : index
    %c0_1 = arith.constant 0 : index
    %0 = vector.load %arg1[%c0, %c0_0, %c0_1] : memref<2x16x384xbf16, #tpu.memory_space<vmem>>, vector<1x16x384xbf16>
    %1 = vector.shape_cast %0 : vector<1x16x384xbf16> to vector<16x384xbf16>
    %2 = vector.extract_strided_slice %1 {offsets = [0, 0], sizes = [16, 32], strides = [1, 1]} : vector<16x384xbf16> to vector<16x32xbf16>
    %3 = vector.extract_strided_slice %1 {offsets = [0, 128], sizes = [16, 32], strides = [1, 1]} : vector<16x384xbf16> to vector<16x32xbf16>
    %4 = vector.extract_strided_slice %1 {offsets = [0, 256], sizes = [16, 32], strides = [1, 1]} : vector<16x384xbf16> to vector<16x32xbf16>
    %cst = arith.constant dense<0.000000e+00> : vector<16x16xf32>
    %5 = tpu.matmul %2, %3, %cst {dimension_numbers = #tpu.dot_dimension_numbers<[1], [1], [0], [0], [0, 0, 1, 0], [], []>} : vector<16x32xbf16>, vector<16x32xbf16>, vector<16x16xf32> -> vector<16x16xf32>
    %cst_2 = arith.constant 0.176776692 : f32
    %6 = vector.broadcast %cst_2 : f32 to vector<16x16xf32>
    %7 = arith.mulf %5, %6 : vector<16x16xf32>
    %cst_3 = arith.constant dense<0xFF800000> : vector<16xf32>
    %8 = vector.multi_reduction <maximumf>, %7, %cst_3 [1] : vector<16x16xf32> to vector<16xf32>
    %9 = vector.shape_cast %8 : vector<16xf32> to vector<16x1xf32>
    %10 = vector.broadcast %9 : vector<16x1xf32> to vector<16x16xf32>
    %11 = arith.subf %7, %10 : vector<16x16xf32>
    %12 = math.exp %11 : vector<16x16xf32>
    %cst_4 = arith.constant dense<0.000000e+00> : vector<16xf32>
    %13 = vector.multi_reduction <add>, %12, %cst_4 [1] : vector<16x16xf32> to vector<16xf32>
    %14 = vector.shape_cast %13 : vector<16xf32> to vector<16x1xf32>
    %15 = tpu.reciprocal %14 {approx = true} : vector<16x1xf32> -> vector<16x1xf32>
    %16 = vector.broadcast %15 : vector<16x1xf32> to vector<16x16xf32>
    %17 = arith.mulf %12, %16 : vector<16x16xf32>
    %18 = arith.truncf %17 : vector<16x16xf32> to vector<16x16xbf16>
    %cst_5 = arith.constant dense<0.000000e+00> : vector<16x32xf32>
    %19 = tpu.matmul %18, %4, %cst_5 {dimension_numbers = #tpu.dot_dimension_numbers<[1], [0], [0], [1], [0, 0, 1, 1], [], []>} : vector<16x16xbf16>, vector<16x32xbf16>, vector<16x32xf32> -> vector<16x32xf32>
    %20 = vector.extract_strided_slice %1 {offsets = [0, 32], sizes = [16, 32], strides = [1, 1]} : vector<16x384xbf16> to vector<16x32xbf16>
    %21 = vector.extract_strided_slice %1 {offsets = [0, 160], sizes = [16, 32], strides = [1, 1]} : vector<16x384xbf16> to vector<16x32xbf16>
    %22 = vector.extract_strided_slice %1 {offsets = [0, 288], sizes = [16, 32], strides = [1, 1]} : vector<16x384xbf16> to vector<16x32xbf16>
    %cst_6 = arith.constant dense<0.000000e+00> : vector<16x16xf32>
    %23 = tpu.matmul %20, %21, %cst_6 {dimension_numbers = #tpu.dot_dimension_numbers<[1], [1], [0], [0], [0, 0, 1, 0], [], []>} : vector<16x32xbf16>, vector<16x32xbf16>, vector<16x16xf32> -> vector<16x16xf32>
    %cst_7 = arith.constant 0.176776692 : f32
    %24 = vector.broadcast %cst_7 : f32 to vector<16x16xf32>
    %25 = arith.mulf %23, %24 : vector<16x16xf32>
    %cst_8 = arith.constant dense<0xFF800000> : vector<16xf32>
    %26 = vector.multi_reduction <maximumf>, %25, %cst_8 [1] : vector<16x16xf32> to vector<16xf32>
    %27 = vector.shape_cast %26 : vector<16xf32> to vector<16x1xf32>
    %28 = vector.broadcast %27 : vector<16x1xf32> to vector<16x16xf32>
    %29 = arith.subf %25, %28 : vector<16x16xf32>
    %30 = math.exp %29 : vector<16x16xf32>
    %cst_9 = arith.constant dense<0.000000e+00> : vector<16xf32>
    %31 = vector.multi_reduction <add>, %30, %cst_9 [1] : vector<16x16xf32> to vector<16xf32>
    %32 = vector.shape_cast %31 : vector<16xf32> to vector<16x1xf32>
    %33 = tpu.reciprocal %32 {approx = true} : vector<16x1xf32> -> vector<16x1xf32>
    %34 = vector.broadcast %33 : vector<16x1xf32> to vector<16x16xf32>
    %35 = arith.mulf %30, %34 : vector<16x16xf32>
    %36 = arith.truncf %35 : vector<16x16xf32> to vector<16x16xbf16>
    %cst_10 = arith.constant dense<0.000000e+00> : vector<16x32xf32>
    %37 = tpu.matmul %36, %22, %cst_10 {dimension_numbers = #tpu.dot_dimension_numbers<[1], [0], [0], [1], [0, 0, 1, 1], [], []>} : vector<16x16xbf16>, vector<16x32xbf16>, vector<16x32xf32> -> vector<16x32xf32>
    %38 = vector.extract_strided_slice %1 {offsets = [0, 64], sizes = [16, 32], strides = [1, 1]} : vector<16x384xbf16> to vector<16x32xbf16>
    %39 = vector.extract_strided_slice %1 {offsets = [0, 192], sizes = [16, 32], strides = [1, 1]} : vector<16x384xbf16> to vector<16x32xbf16>
    %40 = vector.extract_strided_slice %1 {offsets = [0, 320], sizes = [16, 32], strides = [1, 1]} : vector<16x384xbf16> to vector<16x32xbf16>
    %cst_11 = arith.constant dense<0.000000e+00> : vector<16x16xf32>
    %41 = tpu.matmul %38, %39, %cst_11 {dimension_numbers = #tpu.dot_dimension_numbers<[1], [1], [0], [0], [0, 0, 1, 0], [], []>} : vector<16x32xbf16>, vector<16x32xbf16>, vector<16x16xf32> -> vector<16x16xf32>
    %cst_12 = arith.constant 0.176776692 : f32
    %42 = vector.broadcast %cst_12 : f32 to vector<16x16xf32>
    %43 = arith.mulf %41, %42 : vector<16x16xf32>
    %cst_13 = arith.constant dense<0xFF800000> : vector<16xf32>
    %44 = vector.multi_reduction <maximumf>, %43, %cst_13 [1] : vector<16x16xf32> to vector<16xf32>
    %45 = vector.shape_cast %44 : vector<16xf32> to vector<16x1xf32>
    %46 = vector.broadcast %45 : vector<16x1xf32> to vector<16x16xf32>
    %47 = arith.subf %43, %46 : vector<16x16xf32>
    %48 = math.exp %47 : vector<16x16xf32>
    %cst_14 = arith.constant dense<0.000000e+00> : vector<16xf32>
    %49 = vector.multi_reduction <add>, %48, %cst_14 [1] : vector<16x16xf32> to vector<16xf32>
    %50 = vector.shape_cast %49 : vector<16xf32> to vector<16x1xf32>
    %51 = tpu.reciprocal %50 {approx = true} : vector<16x1xf32> -> vector<16x1xf32>
    %52 = vector.broadcast %51 : vector<16x1xf32> to vector<16x16xf32>
    %53 = arith.mulf %48, %52 : vector<16x16xf32>
    %54 = arith.truncf %53 : vector<16x16xf32> to vector<16x16xbf16>
    %cst_15 = arith.constant dense<0.000000e+00> : vector<16x32xf32>
    %55 = tpu.matmul %54, %40, %cst_15 {dimension_numbers = #tpu.dot_dimension_numbers<[1], [0], [0], [1], [0, 0, 1, 1], [], []>} : vector<16x16xbf16>, vector<16x32xbf16>, vector<16x32xf32> -> vector<16x32xf32>
    %56 = vector.extract_strided_slice %1 {offsets = [0, 96], sizes = [16, 32], strides = [1, 1]} : vector<16x384xbf16> to vector<16x32xbf16>
    %57 = vector.extract_strided_slice %1 {offsets = [0, 224], sizes = [16, 32], strides = [1, 1]} : vector<16x384xbf16> to vector<16x32xbf16>
    %58 = vector.extract_strided_slice %1 {offsets = [0, 352], sizes = [16, 32], strides = [1, 1]} : vector<16x384xbf16> to vector<16x32xbf16>
    %cst_16 = arith.constant dense<0.000000e+00> : vector<16x16xf32>
    %59 = tpu.matmul %56, %57, %cst_16 {dimension_numbers = #tpu.dot_dimension_numbers<[1], [1], [0], [0], [0, 0, 1, 0], [], []>} : vector<16x32xbf16>, vector<16x32xbf16>, vector<16x16xf32> -> vector<16x16xf32>
    %cst_17 = arith.constant 0.176776692 : f32
    %60 = vector.broadcast %cst_17 : f32 to vector<16x16xf32>
    %61 = arith.mulf %59, %60 : vector<16x16xf32>
    %cst_18 = arith.constant dense<0xFF800000> : vector<16xf32>
    %62 = vector.multi_reduction <maximumf>, %61, %cst_18 [1] : vector<16x16xf32> to vector<16xf32>
    %63 = vector.shape_cast %62 : vector<16xf32> to vector<16x1xf32>
    %64 = vector.broadcast %63 : vector<16x1xf32> to vector<16x16xf32>
    %65 = arith.subf %61, %64 : vector<16x16xf32>
    %66 = math.exp %65 : vector<16x16xf32>
    %cst_19 = arith.constant dense<0.000000e+00> : vector<16xf32>
    %67 = vector.multi_reduction <add>, %66, %cst_19 [1] : vector<16x16xf32> to vector<16xf32>
    %68 = vector.shape_cast %67 : vector<16xf32> to vector<16x1xf32>
    %69 = tpu.reciprocal %68 {approx = true} : vector<16x1xf32> -> vector<16x1xf32>
    %70 = vector.broadcast %69 : vector<16x1xf32> to vector<16x16xf32>
    %71 = arith.mulf %66, %70 : vector<16x16xf32>
    %72 = arith.truncf %71 : vector<16x16xf32> to vector<16x16xbf16>
    %cst_20 = arith.constant dense<0.000000e+00> : vector<16x32xf32>
    %73 = tpu.matmul %72, %58, %cst_20 {dimension_numbers = #tpu.dot_dimension_numbers<[1], [0], [0], [1], [0, 0, 1, 1], [], []>} : vector<16x16xbf16>, vector<16x32xbf16>, vector<16x32xf32> -> vector<16x32xf32>
    %74 = tpu.concatenate %19, %37, %55, %73 in 1 : vector<16x32xf32>, vector<16x32xf32>, vector<16x32xf32>, vector<16x32xf32> -> vector<16x128xf32>
    %75 = arith.truncf %74 : vector<16x128xf32> to vector<16x128xbf16>
    %c0_21 = arith.constant 0 : index
    %c0_22 = arith.constant 0 : index
    %c0_23 = arith.constant 0 : index
    %76 = vector.load %arg2[%c0_21, %c0_22, %c0_23] : memref<2x16x128xbf16, #tpu.memory_space<vmem>>, vector<1x16x128xbf16>
    %77 = vector.shape_cast %76 : vector<1x16x128xbf16> to vector<16x128xbf16>
    %78 = vector.shape_cast %75 : vector<16x128xbf16> to vector<1x16x128xbf16>
    tpu.vector_store %arg2[%c0_21, %c0_22, %c0_23], %78 {strides = array<i32>} : memref<2x16x128xbf16, #tpu.memory_space<vmem>>, vector<1x16x128xbf16>,
    %c1 = arith.constant 1 : index
    %c0_24 = arith.constant 0 : index
    %c0_25 = arith.constant 0 : index
    %79 = vector.load %arg1[%c1, %c0_24, %c0_25] : memref<2x16x384xbf16, #tpu.memory_space<vmem>>, vector<1x16x384xbf16>
    %80 = vector.shape_cast %79 : vector<1x16x384xbf16> to vector<16x384xbf16>
    %81 = vector.extract_strided_slice %80 {offsets = [0, 0], sizes = [16, 32], strides = [1, 1]} : vector<16x384xbf16> to vector<16x32xbf16>
    %82 = vector.extract_strided_slice %80 {offsets = [0, 128], sizes = [16, 32], strides = [1, 1]} : vector<16x384xbf16> to vector<16x32xbf16>
    %83 = vector.extract_strided_slice %80 {offsets = [0, 256], sizes = [16, 32], strides = [1, 1]} : vector<16x384xbf16> to vector<16x32xbf16>
    %cst_26 = arith.constant dense<0.000000e+00> : vector<16x16xf32>
    %84 = tpu.matmul %81, %82, %cst_26 {dimension_numbers = #tpu.dot_dimension_numbers<[1], [1], [0], [0], [0, 0, 1, 0], [], []>} : vector<16x32xbf16>, vector<16x32xbf16>, vector<16x16xf32> -> vector<16x16xf32>
    %cst_27 = arith.constant 0.176776692 : f32
    %85 = vector.broadcast %cst_27 : f32 to vector<16x16xf32>
    %86 = arith.mulf %84, %85 : vector<16x16xf32>
    %cst_28 = arith.constant dense<0xFF800000> : vector<16xf32>
    %87 = vector.multi_reduction <maximumf>, %86, %cst_28 [1] : vector<16x16xf32> to vector<16xf32>
    %88 = vector.shape_cast %87 : vector<16xf32> to vector<16x1xf32>
    %89 = vector.broadcast %88 : vector<16x1xf32> to vector<16x16xf32>
    %90 = arith.subf %86, %89 : vector<16x16xf32>
    %91 = math.exp %90 : vector<16x16xf32>
    %cst_29 = arith.constant dense<0.000000e+00> : vector<16xf32>
    %92 = vector.multi_reduction <add>, %91, %cst_29 [1] : vector<16x16xf32> to vector<16xf32>
    %93 = vector.shape_cast %92 : vector<16xf32> to vector<16x1xf32>
    %94 = tpu.reciprocal %93 {approx = true} : vector<16x1xf32> -> vector<16x1xf32>
    %95 = vector.broadcast %94 : vector<16x1xf32> to vector<16x16xf32>
    %96 = arith.mulf %91, %95 : vector<16x16xf32>
    %97 = arith.truncf %96 : vector<16x16xf32> to vector<16x16xbf16>
    %cst_30 = arith.constant dense<0.000000e+00> : vector<16x32xf32>
    %98 = tpu.matmul %97, %83, %cst_30 {dimension_numbers = #tpu.dot_dimension_numbers<[1], [0], [0], [1], [0, 0, 1, 1], [], []>} : vector<16x16xbf16>, vector<16x32xbf16>, vector<16x32xf32> -> vector<16x32xf32>
    %99 = vector.extract_strided_slice %80 {offsets = [0, 32], sizes = [16, 32], strides = [1, 1]} : vector<16x384xbf16> to vector<16x32xbf16>
    %100 = vector.extract_strided_slice %80 {offsets = [0, 160], sizes = [16, 32], strides = [1, 1]} : vector<16x384xbf16> to vector<16x32xbf16>
    %101 = vector.extract_strided_slice %80 {offsets = [0, 288], sizes = [16, 32], strides = [1, 1]} : vector<16x384xbf16> to vector<16x32xbf16>
    %cst_31 = arith.constant dense<0.000000e+00> : vector<16x16xf32>
    %102 = tpu.matmul %99, %100, %cst_31 {dimension_numbers = #tpu.dot_dimension_numbers<[1], [1], [0], [0], [0, 0, 1, 0], [], []>} : vector<16x32xbf16>, vector<16x32xbf16>, vector<16x16xf32> -> vector<16x16xf32>
    %cst_32 = arith.constant 0.176776692 : f32
    %103 = vector.broadcast %cst_32 : f32 to vector<16x16xf32>
    %104 = arith.mulf %102, %103 : vector<16x16xf32>
    %cst_33 = arith.constant dense<0xFF800000> : vector<16xf32>
    %105 = vector.multi_reduction <maximumf>, %104, %cst_33 [1] : vector<16x16xf32> to vector<16xf32>
    %106 = vector.shape_cast %105 : vector<16xf32> to vector<16x1xf32>
    %107 = vector.broadcast %106 : vector<16x1xf32> to vector<16x16xf32>
    %108 = arith.subf %104, %107 : vector<16x16xf32>
    %109 = math.exp %108 : vector<16x16xf32>
    %cst_34 = arith.constant dense<0.000000e+00> : vector<16xf32>
    %110 = vector.multi_reduction <add>, %109, %cst_34 [1] : vector<16x16xf32> to vector<16xf32>
    %111 = vector.shape_cast %110 : vector<16xf32> to vector<16x1xf32>
    %112 = tpu.reciprocal %111 {approx = true} : vector<16x1xf32> -> vector<16x1xf32>
    %113 = vector.broadcast %112 : vector<16x1xf32> to vector<16x16xf32>
    %114 = arith.mulf %109, %113 : vector<16x16xf32>
    %115 = arith.truncf %114 : vector<16x16xf32> to vector<16x16xbf16>
    %cst_35 = arith.constant dense<0.000000e+00> : vector<16x32xf32>
    %116 = tpu.matmul %115, %101, %cst_35 {dimension_numbers = #tpu.dot_dimension_numbers<[1], [0], [0], [1], [0, 0, 1, 1], [], []>} : vector<16x16xbf16>, vector<16x32xbf16>, vector<16x32xf32> -> vector<16x32xf32>
    %117 = vector.extract_strided_slice %80 {offsets = [0, 64], sizes = [16, 32], strides = [1, 1]} : vector<16x384xbf16> to vector<16x32xbf16>
    %118 = vector.extract_strided_slice %80 {offsets = [0, 192], sizes = [16, 32], strides = [1, 1]} : vector<16x384xbf16> to vector<16x32xbf16>
    %119 = vector.extract_strided_slice %80 {offsets = [0, 320], sizes = [16, 32], strides = [1, 1]} : vector<16x384xbf16> to vector<16x32xbf16>
    %cst_36 = arith.constant dense<0.000000e+00> : vector<16x16xf32>
    %120 = tpu.matmul %117, %118, %cst_36 {dimension_numbers = #tpu.dot_dimension_numbers<[1], [1], [0], [0], [0, 0, 1, 0], [], []>} : vector<16x32xbf16>, vector<16x32xbf16>, vector<16x16xf32> -> vector<16x16xf32>
    %cst_37 = arith.constant 0.176776692 : f32
    %121 = vector.broadcast %cst_37 : f32 to vector<16x16xf32>
    %122 = arith.mulf %120, %121 : vector<16x16xf32>
    %cst_38 = arith.constant dense<0xFF800000> : vector<16xf32>
    %123 = vector.multi_reduction <maximumf>, %122, %cst_38 [1] : vector<16x16xf32> to vector<16xf32>
    %124 = vector.shape_cast %123 : vector<16xf32> to vector<16x1xf32>
    %125 = vector.broadcast %124 : vector<16x1xf32> to vector<16x16xf32>
    %126 = arith.subf %122, %125 : vector<16x16xf32>
    %127 = math.exp %126 : vector<16x16xf32>
    %cst_39 = arith.constant dense<0.000000e+00> : vector<16xf32>
    %128 = vector.multi_reduction <add>, %127, %cst_39 [1] : vector<16x16xf32> to vector<16xf32>
    %129 = vector.shape_cast %128 : vector<16xf32> to vector<16x1xf32>
    %130 = tpu.reciprocal %129 {approx = true} : vector<16x1xf32> -> vector<16x1xf32>
    %131 = vector.broadcast %130 : vector<16x1xf32> to vector<16x16xf32>
    %132 = arith.mulf %127, %131 : vector<16x16xf32>
    %133 = arith.truncf %132 : vector<16x16xf32> to vector<16x16xbf16>
    %cst_40 = arith.constant dense<0.000000e+00> : vector<16x32xf32>
    %134 = tpu.matmul %133, %119, %cst_40 {dimension_numbers = #tpu.dot_dimension_numbers<[1], [0], [0], [1], [0, 0, 1, 1], [], []>} : vector<16x16xbf16>, vector<16x32xbf16>, vector<16x32xf32> -> vector<16x32xf32>
    %135 = vector.extract_strided_slice %80 {offsets = [0, 96], sizes = [16, 32], strides = [1, 1]} : vector<16x384xbf16> to vector<16x32xbf16>
    %136 = vector.extract_strided_slice %80 {offsets = [0, 224], sizes = [16, 32], strides = [1, 1]} : vector<16x384xbf16> to vector<16x32xbf16>
    %137 = vector.extract_strided_slice %80 {offsets = [0, 352], sizes = [16, 32], strides = [1, 1]} : vector<16x384xbf16> to vector<16x32xbf16>
    %cst_41 = arith.constant dense<0.000000e+00> : vector<16x16xf32>
    %138 = tpu.matmul %135, %136, %cst_41 {dimension_numbers = #tpu.dot_dimension_numbers<[1], [1], [0], [0], [0, 0, 1, 0], [], []>} : vector<16x32xbf16>, vector<16x32xbf16>, vector<16x16xf32> -> vector<16x16xf32>
    %cst_42 = arith.constant 0.176776692 : f32
    %139 = vector.broadcast %cst_42 : f32 to vector<16x16xf32>
    %140 = arith.mulf %138, %139 : vector<16x16xf32>
    %cst_43 = arith.constant dense<0xFF800000> : vector<16xf32>
    %141 = vector.multi_reduction <maximumf>, %140, %cst_43 [1] : vector<16x16xf32> to vector<16xf32>
    %142 = vector.shape_cast %141 : vector<16xf32> to vector<16x1xf32>
    %143 = vector.broadcast %142 : vector<16x1xf32> to vector<16x16xf32>
    %144 = arith.subf %140, %143 : vector<16x16xf32>
    %145 = math.exp %144 : vector<16x16xf32>
    %cst_44 = arith.constant dense<0.000000e+00> : vector<16xf32>
    %146 = vector.multi_reduction <add>, %145, %cst_44 [1] : vector<16x16xf32> to vector<16xf32>
    %147 = vector.shape_cast %146 : vector<16xf32> to vector<16x1xf32>
    %148 = tpu.reciprocal %147 {approx = true} : vector<16x1xf32> -> vector<16x1xf32>
    %149 = vector.broadcast %148 : vector<16x1xf32> to vector<16x16xf32>
    %150 = arith.mulf %145, %149 : vector<16x16xf32>
    %151 = arith.truncf %150 : vector<16x16xf32> to vector<16x16xbf16>
    %cst_45 = arith.constant dense<0.000000e+00> : vector<16x32xf32>
    %152 = tpu.matmul %151, %137, %cst_45 {dimension_numbers = #tpu.dot_dimension_numbers<[1], [0], [0], [1], [0, 0, 1, 1], [], []>} : vector<16x16xbf16>, vector<16x32xbf16>, vector<16x32xf32> -> vector<16x32xf32>
    %153 = tpu.concatenate %98, %116, %134, %152 in 1 : vector<16x32xf32>, vector<16x32xf32>, vector<16x32xf32>, vector<16x32xf32> -> vector<16x128xf32>
    %154 = arith.truncf %153 : vector<16x128xf32> to vector<16x128xbf16>
    %c1_46 = arith.constant 1 : index
    %c0_47 = arith.constant 0 : index
    %c0_48 = arith.constant 0 : index
    %155 = vector.load %arg2[%c1_46, %c0_47, %c0_48] : memref<2x16x128xbf16, #tpu.memory_space<vmem>>, vector<1x16x128xbf16>
    %156 = vector.shape_cast %155 : vector<1x16x128xbf16> to vector<16x128xbf16>
    %157 = vector.shape_cast %154 : vector<16x128xbf16> to vector<1x16x128xbf16>
    tpu.vector_store %arg2[%c1_46, %c0_47, %c0_48], %157 {strides = array<i32>} : memref<2x16x128xbf16, #tpu.memory_space<vmem>>, vector<1x16x128xbf16>,
    return
  }
  func.func @transform_0(%arg0: i32) -> (i32, i32, i32) {
    %c0_i32 = arith.constant 0 : i32
    %c0_i32_0 = arith.constant 0 : i32
    %c0_i32_1 = arith.constant 0 : i32
    return %arg0, %c0_i32, %c0_i32_0 : i32, i32, i32
  }
  func.func @transform_1(%arg0: i32) -> (i32, i32, i32) {
    %c0_i32 = arith.constant 0 : i32
    %c0_i32_0 = arith.constant 0 : i32
    %c0_i32_1 = arith.constant 0 : i32
    return %arg0, %c0_i32, %c0_i32_0 : i32, i32, i32
  }
}

module attributes {stable_mosaic.version = 11 : i64} {
  func.func @_mm_res_ln_kernel(%arg0: i32, %arg1: i32, %arg2: memref<128x128xbf16, #tpu.memory_space<vmem>>, %arg3: memref<128x128xbf16, #tpu.memory_space<vmem>>, %arg4: memref<1x128xf32, #tpu.memory_space<vmem>>, %arg5: memref<128x128xf32, #tpu.memory_space<vmem>>, %arg6: memref<1x128xf32, #tpu.memory_space<vmem>>, %arg7: memref<1x128xf32, #tpu.memory_space<vmem>>, %arg8: memref<128x128xf32, #tpu.memory_space<vmem>>, %arg9: memref<128x128xbf16, #tpu.memory_space<vmem>>, %arg10: memref<128x128xf32, #tpu.memory_space<vmem>>) attributes {dimension_semantics = [#tpu.dimension_semantics<parallel>, #tpu.dimension_semantics<arbitrary>], iteration_bounds = array<i64: 1, 1>, scalar_prefetch = 0 : i64, scratch_operands = 1 : i64, tpu.core_type = #tpu.core_type<tc>, window_params = [{transform_indices = @transform_0, window_bounds = array<i64: 128, 128>}, {transform_indices = @transform_1, window_bounds = array<i64: 128, 128>}, {pipeline_mode = #tpu.pipeline_mode<synchronous>, transform_indices = @transform_2, window_bounds = array<i64: 1, 128>}, {transform_indices = @transform_3, window_bounds = array<i64: 128, 128>}, {pipeline_mode = #tpu.pipeline_mode<synchronous>, transform_indices = @transform_4, window_bounds = array<i64: 1, 128>}, {pipeline_mode = #tpu.pipeline_mode<synchronous>, transform_indices = @transform_5, window_bounds = array<i64: 1, 128>}, {transform_indices = @transform_6, window_bounds = array<i64: 128, 128>}, {transform_indices = @transform_7, window_bounds = array<i64: 128, 128>}]} {
    %c0_i32 = arith.constant 0 : i32
    %0 = arith.cmpi eq, %arg1, %c0_i32 : i32
    %1 = arith.extui %0 : i1 to i32
    %c0_i32_0 = arith.constant 0 : i32
    %2 = arith.cmpi ne, %1, %c0_i32_0 : i32
    scf.if %2 {
      %cst_10 = arith.constant 0.000000e+00 : f32
      %12 = vector.broadcast %cst_10 : f32 to vector<128x128xf32>
      %c0_11 = arith.constant 0 : index
      %c0_12 = arith.constant 0 : index
      %13 = vector.load %arg10[%c0_11, %c0_12] : memref<128x128xf32, #tpu.memory_space<vmem>>, vector<128x128xf32>
      tpu.vector_store %arg10[%c0_11, %c0_12], %12 {strides = array<i32>} : memref<128x128xf32, #tpu.memory_space<vmem>>, vector<128x128xf32>,
    } else {
    }
    %c0 = arith.constant 0 : index
    %c0_1 = arith.constant 0 : index
    %3 = vector.load %arg10[%c0, %c0_1] : memref<128x128xf32, #tpu.memory_space<vmem>>, vector<128x128xf32>
    %c0_2 = arith.constant 0 : index
    %c0_3 = arith.constant 0 : index
    %4 = vector.load %arg2[%c0_2, %c0_3] : memref<128x128xbf16, #tpu.memory_space<vmem>>, vector<128x128xbf16>
    %c0_4 = arith.constant 0 : index
    %c0_5 = arith.constant 0 : index
    %5 = vector.load %arg3[%c0_4, %c0_5] : memref<128x128xbf16, #tpu.memory_space<vmem>>, vector<128x128xbf16>
    %cst = arith.constant dense<0.000000e+00> : vector<128x128xf32>
    %6 = tpu.matmul %4, %5, %cst {dimension_numbers = #tpu.dot_dimension_numbers<[1], [0], [0], [1], [0, 0, 1, 1], [], []>} : vector<128x128xbf16>, vector<128x128xbf16>, vector<128x128xf32> -> vector<128x128xf32>
    %7 = arith.addf %3, %6 : vector<128x128xf32>
    %c0_6 = arith.constant 0 : index
    %c0_7 = arith.constant 0 : index
    %8 = vector.load %arg10[%c0_6, %c0_7] : memref<128x128xf32, #tpu.memory_space<vmem>>, vector<128x128xf32>
    tpu.vector_store %arg10[%c0_6, %c0_7], %7 {strides = array<i32>} : memref<128x128xf32, #tpu.memory_space<vmem>>, vector<128x128xf32>,
    %c0_i32_8 = arith.constant 0 : i32
    %9 = arith.cmpi eq, %arg1, %c0_i32_8 : i32
    %10 = arith.extui %9 : i1 to i32
    %c0_i32_9 = arith.constant 0 : i32
    %11 = arith.cmpi ne, %10, %c0_i32_9 : i32
    scf.if %11 {
      %c0_10 = arith.constant 0 : index
      %c0_11 = arith.constant 0 : index
      %12 = vector.load %arg10[%c0_10, %c0_11] : memref<128x128xf32, #tpu.memory_space<vmem>>, vector<128x128xf32>
      %c0_12 = arith.constant 0 : index
      %c0_13 = arith.constant 0 : index
      %13 = vector.load %arg4[%c0_12, %c0_13] : memref<1x128xf32, #tpu.memory_space<vmem>>, vector<1x128xf32>
      %14 = vector.broadcast %13 : vector<1x128xf32> to vector<128x128xf32>
      %15 = arith.addf %12, %14 : vector<128x128xf32>
      %c0_14 = arith.constant 0 : index
      %c0_15 = arith.constant 0 : index
      %16 = vector.load %arg5[%c0_14, %c0_15] : memref<128x128xf32, #tpu.memory_space<vmem>>, vector<128x128xf32>
      %17 = arith.addf %15, %16 : vector<128x128xf32>
      %c0_16 = arith.constant 0 : index
      %c0_17 = arith.constant 0 : index
      %18 = vector.load %arg8[%c0_16, %c0_17] : memref<128x128xf32, #tpu.memory_space<vmem>>, vector<128x128xf32>
      tpu.vector_store %arg8[%c0_16, %c0_17], %17 {strides = array<i32>} : memref<128x128xf32, #tpu.memory_space<vmem>>, vector<128x128xf32>,
      %cst_18 = arith.constant dense<0.000000e+00> : vector<128xf32>
      %19 = vector.multi_reduction <add>, %17, %cst_18 [1] : vector<128x128xf32> to vector<128xf32>
      %20 = vector.shape_cast %19 : vector<128xf32> to vector<128x1xf32>
      %cst_19 = arith.constant 1.280000e+02 : f32
      %21 = vector.broadcast %cst_19 : f32 to vector<128x1xf32>
      %22 = arith.divf %20, %21 : vector<128x1xf32>
      %23 = vector.broadcast %22 : vector<128x1xf32> to vector<128x128xf32>
      %24 = arith.subf %17, %23 : vector<128x128xf32>
      %25 = arith.mulf %24, %24 : vector<128x128xf32>
      %cst_20 = arith.constant dense<0.000000e+00> : vector<128xf32>
      %26 = vector.multi_reduction <add>, %25, %cst_20 [1] : vector<128x128xf32> to vector<128xf32>
      %27 = vector.shape_cast %26 : vector<128xf32> to vector<128x1xf32>
      %cst_21 = arith.constant 1.280000e+02 : f32
      %28 = vector.broadcast %cst_21 : f32 to vector<128x1xf32>
      %29 = arith.divf %27, %28 : vector<128x1xf32>
      %cst_22 = arith.constant 9.99999974E-6 : f32
      %30 = vector.broadcast %cst_22 : f32 to vector<128x1xf32>
      %31 = arith.addf %29, %30 : vector<128x1xf32>
      %32 = math.rsqrt %31 : vector<128x1xf32>
      %33 = vector.broadcast %32 : vector<128x1xf32> to vector<128x128xf32>
      %34 = arith.mulf %24, %33 : vector<128x128xf32>
      %c0_23 = arith.constant 0 : index
      %c0_24 = arith.constant 0 : index
      %35 = vector.load %arg6[%c0_23, %c0_24] : memref<1x128xf32, #tpu.memory_space<vmem>>, vector<1x128xf32>
      %36 = vector.broadcast %35 : vector<1x128xf32> to vector<128x128xf32>
      %37 = arith.mulf %34, %36 : vector<128x128xf32>
      %c0_25 = arith.constant 0 : index
      %c0_26 = arith.constant 0 : index
      %38 = vector.load %arg7[%c0_25, %c0_26] : memref<1x128xf32, #tpu.memory_space<vmem>>, vector<1x128xf32>
      %39 = vector.broadcast %38 : vector<1x128xf32> to vector<128x128xf32>
      %40 = arith.addf %37, %39 : vector<128x128xf32>
      %41 = arith.truncf %40 : vector<128x128xf32> to vector<128x128xbf16>
      %c0_27 = arith.constant 0 : index
      %c0_28 = arith.constant 0 : index
      %42 = vector.load %arg9[%c0_27, %c0_28] : memref<128x128xbf16, #tpu.memory_space<vmem>>, vector<128x128xbf16>
      tpu.vector_store %arg9[%c0_27, %c0_28], %41 {strides = array<i32>} : memref<128x128xbf16, #tpu.memory_space<vmem>>, vector<128x128xbf16>,
    } else {
    }
    return
  }
  func.func @transform_0(%arg0: i32, %arg1: i32) -> (i32, i32) {
    %c0_i32 = arith.constant 0 : i32
    return %arg0, %arg1 : i32, i32
  }
  func.func @transform_1(%arg0: i32, %arg1: i32) -> (i32, i32) {
    %c0_i32 = arith.constant 0 : i32
    %c0_i32_0 = arith.constant 0 : i32
    return %arg1, %c0_i32 : i32, i32
  }
  func.func @transform_2(%arg0: i32, %arg1: i32) -> (i32, i32) {
    %c0_i32 = arith.constant 0 : i32
    %c0_i32_0 = arith.constant 0 : i32
    %c0_i32_1 = arith.constant 0 : i32
    return %c0_i32, %c0_i32_0 : i32, i32
  }
  func.func @transform_3(%arg0: i32, %arg1: i32) -> (i32, i32) {
    %c0_i32 = arith.constant 0 : i32
    %c0_i32_0 = arith.constant 0 : i32
    return %arg0, %c0_i32 : i32, i32
  }
  func.func @transform_4(%arg0: i32, %arg1: i32) -> (i32, i32) {
    %c0_i32 = arith.constant 0 : i32
    %c0_i32_0 = arith.constant 0 : i32
    %c0_i32_1 = arith.constant 0 : i32
    return %c0_i32, %c0_i32_0 : i32, i32
  }
  func.func @transform_5(%arg0: i32, %arg1: i32) -> (i32, i32) {
    %c0_i32 = arith.constant 0 : i32
    %c0_i32_0 = arith.constant 0 : i32
    %c0_i32_1 = arith.constant 0 : i32
    return %c0_i32, %c0_i32_0 : i32, i32
  }
  func.func @transform_6(%arg0: i32, %arg1: i32) -> (i32, i32) {
    %c0_i32 = arith.constant 0 : i32
    %c0_i32_0 = arith.constant 0 : i32
    return %arg0, %c0_i32 : i32, i32
  }
  func.func @transform_7(%arg0: i32, %arg1: i32) -> (i32, i32) {
    %c0_i32 = arith.constant 0 : i32
    %c0_i32_0 = arith.constant 0 : i32
    return %arg0, %c0_i32 : i32, i32
  }
}

module attributes {stable_mosaic.version = 11 : i64} {
  func.func @_mm_kernel(%arg0: i32, %arg1: i32, %arg2: i32, %arg3: memref<128x128xbf16, #tpu.memory_space<vmem>>, %arg4: memref<128x512xbf16, #tpu.memory_space<vmem>>, %arg5: memref<1x512xf32, #tpu.memory_space<vmem>>, %arg6: memref<128x512xbf16, #tpu.memory_space<vmem>>, %arg7: memref<128x512xf32, #tpu.memory_space<vmem>>) attributes {dimension_semantics = [#tpu.dimension_semantics<parallel>, #tpu.dimension_semantics<parallel>, #tpu.dimension_semantics<arbitrary>], iteration_bounds = array<i64: 1, 1, 1>, scalar_prefetch = 0 : i64, scratch_operands = 1 : i64, tpu.core_type = #tpu.core_type<tc>, window_params = [{transform_indices = @transform_0, window_bounds = array<i64: 128, 128>}, {transform_indices = @transform_1, window_bounds = array<i64: 128, 512>}, {transform_indices = @transform_2, window_bounds = array<i64: 1, 512>}, {transform_indices = @transform_3, window_bounds = array<i64: 128, 512>}]} {
    %c0_i32 = arith.constant 0 : i32
    %0 = arith.cmpi eq, %arg2, %c0_i32 : i32
    %1 = arith.extui %0 : i1 to i32
    %c0_i32_0 = arith.constant 0 : i32
    %2 = arith.cmpi ne, %1, %c0_i32_0 : i32
    scf.if %2 {
      %cst_10 = arith.constant 0.000000e+00 : f32
      %12 = vector.broadcast %cst_10 : f32 to vector<128x512xf32>
      %c0_11 = arith.constant 0 : index
      %c0_12 = arith.constant 0 : index
      %13 = vector.load %arg7[%c0_11, %c0_12] : memref<128x512xf32, #tpu.memory_space<vmem>>, vector<128x512xf32>
      tpu.vector_store %arg7[%c0_11, %c0_12], %12 {strides = array<i32>} : memref<128x512xf32, #tpu.memory_space<vmem>>, vector<128x512xf32>,
    } else {
    }
    %c0 = arith.constant 0 : index
    %c0_1 = arith.constant 0 : index
    %3 = vector.load %arg7[%c0, %c0_1] : memref<128x512xf32, #tpu.memory_space<vmem>>, vector<128x512xf32>
    %c0_2 = arith.constant 0 : index
    %c0_3 = arith.constant 0 : index
    %4 = vector.load %arg3[%c0_2, %c0_3] : memref<128x128xbf16, #tpu.memory_space<vmem>>, vector<128x128xbf16>
    %c0_4 = arith.constant 0 : index
    %c0_5 = arith.constant 0 : index
    %5 = vector.load %arg4[%c0_4, %c0_5] : memref<128x512xbf16, #tpu.memory_space<vmem>>, vector<128x512xbf16>
    %cst = arith.constant dense<0.000000e+00> : vector<128x512xf32>
    %6 = tpu.matmul %4, %5, %cst {dimension_numbers = #tpu.dot_dimension_numbers<[1], [0], [0], [1], [0, 0, 1, 1], [], []>} : vector<128x128xbf16>, vector<128x512xbf16>, vector<128x512xf32> -> vector<128x512xf32>
    %7 = arith.addf %3, %6 : vector<128x512xf32>
    %c0_6 = arith.constant 0 : index
    %c0_7 = arith.constant 0 : index
    %8 = vector.load %arg7[%c0_6, %c0_7] : memref<128x512xf32, #tpu.memory_space<vmem>>, vector<128x512xf32>
    tpu.vector_store %arg7[%c0_6, %c0_7], %7 {strides = array<i32>} : memref<128x512xf32, #tpu.memory_space<vmem>>, vector<128x512xf32>,
    %c0_i32_8 = arith.constant 0 : i32
    %9 = arith.cmpi eq, %arg2, %c0_i32_8 : i32
    %10 = arith.extui %9 : i1 to i32
    %c0_i32_9 = arith.constant 0 : i32
    %11 = arith.cmpi ne, %10, %c0_i32_9 : i32
    scf.if %11 {
      %c0_10 = arith.constant 0 : index
      %c0_11 = arith.constant 0 : index
      %12 = vector.load %arg7[%c0_10, %c0_11] : memref<128x512xf32, #tpu.memory_space<vmem>>, vector<128x512xf32>
      %c0_12 = arith.constant 0 : index
      %c0_13 = arith.constant 0 : index
      %13 = vector.load %arg5[%c0_12, %c0_13] : memref<1x512xf32, #tpu.memory_space<vmem>>, vector<1x512xf32>
      %14 = vector.broadcast %13 : vector<1x512xf32> to vector<128x512xf32>
      %15 = arith.addf %12, %14 : vector<128x512xf32>
      %cst_14 = arith.constant -1.702000e+00 : f32
      %16 = vector.broadcast %cst_14 : f32 to vector<128x512xf32>
      %17 = arith.mulf %16, %15 : vector<128x512xf32>
      %18 = math.exp %17 : vector<128x512xf32>
      %cst_15 = arith.constant 1.000000e+00 : f32
      %19 = vector.broadcast %cst_15 : f32 to vector<128x512xf32>
      %20 = arith.addf %19, %18 : vector<128x512xf32>
      %cst_16 = arith.constant 1.000000e+00 : f32
      %21 = vector.broadcast %cst_16 : f32 to vector<128x512xf32>
      %22 = arith.divf %21, %20 : vector<128x512xf32>
      %23 = arith.mulf %15, %22 : vector<128x512xf32>
      %24 = arith.truncf %23 : vector<128x512xf32> to vector<128x512xbf16>
      %c0_17 = arith.constant 0 : index
      %c0_18 = arith.constant 0 : index
      %25 = vector.load %arg6[%c0_17, %c0_18] : memref<128x512xbf16, #tpu.memory_space<vmem>>, vector<128x512xbf16>
      tpu.vector_store %arg6[%c0_17, %c0_18], %24 {strides = array<i32>} : memref<128x512xbf16, #tpu.memory_space<vmem>>, vector<128x512xbf16>,
    } else {
    }
    return
  }
  func.func @transform_0(%arg0: i32, %arg1: i32, %arg2: i32) -> (i32, i32) {
    %c0_i32 = arith.constant 0 : i32
    return %arg0, %arg2 : i32, i32
  }
  func.func @transform_1(%arg0: i32, %arg1: i32, %arg2: i32) -> (i32, i32) {
    %c0_i32 = arith.constant 0 : i32
    return %arg2, %arg1 : i32, i32
  }
  func.func @transform_2(%arg0: i32, %arg1: i32, %arg2: i32) -> (i32, i32) {
    %c0_i32 = arith.constant 0 : i32
    %c0_i32_0 = arith.constant 0 : i32
    return %c0_i32, %arg1 : i32, i32
  }
  func.func @transform_3(%arg0: i32, %arg1: i32, %arg2: i32) -> (i32, i32) {
    %c0_i32 = arith.constant 0 : i32
    return %arg0, %arg1 : i32, i32
  }
}

module attributes {stable_mosaic.version = 11 : i64} {
  func.func @_mm_res_ln_kernel(%arg0: i32, %arg1: i32, %arg2: memref<128x512xbf16, #tpu.memory_space<vmem>>, %arg3: memref<512x128xbf16, #tpu.memory_space<vmem>>, %arg4: memref<1x128xf32, #tpu.memory_space<vmem>>, %arg5: memref<128x128xf32, #tpu.memory_space<vmem>>, %arg6: memref<1x128xf32, #tpu.memory_space<vmem>>, %arg7: memref<1x128xf32, #tpu.memory_space<vmem>>, %arg8: memref<128x128xf32, #tpu.memory_space<vmem>>, %arg9: memref<128x128xbf16, #tpu.memory_space<vmem>>, %arg10: memref<128x128xf32, #tpu.memory_space<vmem>>) attributes {dimension_semantics = [#tpu.dimension_semantics<parallel>, #tpu.dimension_semantics<arbitrary>], iteration_bounds = array<i64: 1, 1>, scalar_prefetch = 0 : i64, scratch_operands = 1 : i64, tpu.core_type = #tpu.core_type<tc>, window_params = [{transform_indices = @transform_0, window_bounds = array<i64: 128, 512>}, {transform_indices = @transform_1, window_bounds = array<i64: 512, 128>}, {pipeline_mode = #tpu.pipeline_mode<synchronous>, transform_indices = @transform_2, window_bounds = array<i64: 1, 128>}, {transform_indices = @transform_3, window_bounds = array<i64: 128, 128>}, {pipeline_mode = #tpu.pipeline_mode<synchronous>, transform_indices = @transform_4, window_bounds = array<i64: 1, 128>}, {pipeline_mode = #tpu.pipeline_mode<synchronous>, transform_indices = @transform_5, window_bounds = array<i64: 1, 128>}, {transform_indices = @transform_6, window_bounds = array<i64: 128, 128>}, {transform_indices = @transform_7, window_bounds = array<i64: 128, 128>}]} {
    %c0_i32 = arith.constant 0 : i32
    %0 = arith.cmpi eq, %arg1, %c0_i32 : i32
    %1 = arith.extui %0 : i1 to i32
    %c0_i32_0 = arith.constant 0 : i32
    %2 = arith.cmpi ne, %1, %c0_i32_0 : i32
    scf.if %2 {
      %cst_10 = arith.constant 0.000000e+00 : f32
      %12 = vector.broadcast %cst_10 : f32 to vector<128x128xf32>
      %c0_11 = arith.constant 0 : index
      %c0_12 = arith.constant 0 : index
      %13 = vector.load %arg10[%c0_11, %c0_12] : memref<128x128xf32, #tpu.memory_space<vmem>>, vector<128x128xf32>
      tpu.vector_store %arg10[%c0_11, %c0_12], %12 {strides = array<i32>} : memref<128x128xf32, #tpu.memory_space<vmem>>, vector<128x128xf32>,
    } else {
    }
    %c0 = arith.constant 0 : index
    %c0_1 = arith.constant 0 : index
    %3 = vector.load %arg10[%c0, %c0_1] : memref<128x128xf32, #tpu.memory_space<vmem>>, vector<128x128xf32>
    %c0_2 = arith.constant 0 : index
    %c0_3 = arith.constant 0 : index
    %4 = vector.load %arg2[%c0_2, %c0_3] : memref<128x512xbf16, #tpu.memory_space<vmem>>, vector<128x512xbf16>
    %c0_4 = arith.constant 0 : index
    %c0_5 = arith.constant 0 : index
    %5 = vector.load %arg3[%c0_4, %c0_5] : memref<512x128xbf16, #tpu.memory_space<vmem>>, vector<512x128xbf16>
    %cst = arith.constant dense<0.000000e+00> : vector<128x128xf32>
    %6 = tpu.matmul %4, %5, %cst {dimension_numbers = #tpu.dot_dimension_numbers<[1], [0], [0], [1], [0, 0, 1, 1], [], []>} : vector<128x512xbf16>, vector<512x128xbf16>, vector<128x128xf32> -> vector<128x128xf32>
    %7 = arith.addf %3, %6 : vector<128x128xf32>
    %c0_6 = arith.constant 0 : index
    %c0_7 = arith.constant 0 : index
    %8 = vector.load %arg10[%c0_6, %c0_7] : memref<128x128xf32, #tpu.memory_space<vmem>>, vector<128x128xf32>
    tpu.vector_store %arg10[%c0_6, %c0_7], %7 {strides = array<i32>} : memref<128x128xf32, #tpu.memory_space<vmem>>, vector<128x128xf32>,
    %c0_i32_8 = arith.constant 0 : i32
    %9 = arith.cmpi eq, %arg1, %c0_i32_8 : i32
    %10 = arith.extui %9 : i1 to i32
    %c0_i32_9 = arith.constant 0 : i32
    %11 = arith.cmpi ne, %10, %c0_i32_9 : i32
    scf.if %11 {
      %c0_10 = arith.constant 0 : index
      %c0_11 = arith.constant 0 : index
      %12 = vector.load %arg10[%c0_10, %c0_11] : memref<128x128xf32, #tpu.memory_space<vmem>>, vector<128x128xf32>
      %c0_12 = arith.constant 0 : index
      %c0_13 = arith.constant 0 : index
      %13 = vector.load %arg4[%c0_12, %c0_13] : memref<1x128xf32, #tpu.memory_space<vmem>>, vector<1x128xf32>
      %14 = vector.broadcast %13 : vector<1x128xf32> to vector<128x128xf32>
      %15 = arith.addf %12, %14 : vector<128x128xf32>
      %c0_14 = arith.constant 0 : index
      %c0_15 = arith.constant 0 : index
      %16 = vector.load %arg5[%c0_14, %c0_15] : memref<128x128xf32, #tpu.memory_space<vmem>>, vector<128x128xf32>
      %17 = arith.addf %15, %16 : vector<128x128xf32>
      %c0_16 = arith.constant 0 : index
      %c0_17 = arith.constant 0 : index
      %18 = vector.load %arg8[%c0_16, %c0_17] : memref<128x128xf32, #tpu.memory_space<vmem>>, vector<128x128xf32>
      tpu.vector_store %arg8[%c0_16, %c0_17], %17 {strides = array<i32>} : memref<128x128xf32, #tpu.memory_space<vmem>>, vector<128x128xf32>,
      %cst_18 = arith.constant dense<0.000000e+00> : vector<128xf32>
      %19 = vector.multi_reduction <add>, %17, %cst_18 [1] : vector<128x128xf32> to vector<128xf32>
      %20 = vector.shape_cast %19 : vector<128xf32> to vector<128x1xf32>
      %cst_19 = arith.constant 1.280000e+02 : f32
      %21 = vector.broadcast %cst_19 : f32 to vector<128x1xf32>
      %22 = arith.divf %20, %21 : vector<128x1xf32>
      %23 = vector.broadcast %22 : vector<128x1xf32> to vector<128x128xf32>
      %24 = arith.subf %17, %23 : vector<128x128xf32>
      %25 = arith.mulf %24, %24 : vector<128x128xf32>
      %cst_20 = arith.constant dense<0.000000e+00> : vector<128xf32>
      %26 = vector.multi_reduction <add>, %25, %cst_20 [1] : vector<128x128xf32> to vector<128xf32>
      %27 = vector.shape_cast %26 : vector<128xf32> to vector<128x1xf32>
      %cst_21 = arith.constant 1.280000e+02 : f32
      %28 = vector.broadcast %cst_21 : f32 to vector<128x1xf32>
      %29 = arith.divf %27, %28 : vector<128x1xf32>
      %cst_22 = arith.constant 9.99999974E-6 : f32
      %30 = vector.broadcast %cst_22 : f32 to vector<128x1xf32>
      %31 = arith.addf %29, %30 : vector<128x1xf32>
      %32 = math.rsqrt %31 : vector<128x1xf32>
      %33 = vector.broadcast %32 : vector<128x1xf32> to vector<128x128xf32>
      %34 = arith.mulf %24, %33 : vector<128x128xf32>
      %c0_23 = arith.constant 0 : index
      %c0_24 = arith.constant 0 : index
      %35 = vector.load %arg6[%c0_23, %c0_24] : memref<1x128xf32, #tpu.memory_space<vmem>>, vector<1x128xf32>
      %36 = vector.broadcast %35 : vector<1x128xf32> to vector<128x128xf32>
      %37 = arith.mulf %34, %36 : vector<128x128xf32>
      %c0_25 = arith.constant 0 : index
      %c0_26 = arith.constant 0 : index
      %38 = vector.load %arg7[%c0_25, %c0_26] : memref<1x128xf32, #tpu.memory_space<vmem>>, vector<1x128xf32>
      %39 = vector.broadcast %38 : vector<1x128xf32> to vector<128x128xf32>
      %40 = arith.addf %37, %39 : vector<128x128xf32>
      %41 = arith.truncf %40 : vector<128x128xf32> to vector<128x128xbf16>
      %c0_27 = arith.constant 0 : index
      %c0_28 = arith.constant 0 : index
      %42 = vector.load %arg9[%c0_27, %c0_28] : memref<128x128xbf16, #tpu.memory_space<vmem>>, vector<128x128xbf16>
      tpu.vector_store %arg9[%c0_27, %c0_28], %41 {strides = array<i32>} : memref<128x128xbf16, #tpu.memory_space<vmem>>, vector<128x128xbf16>,
    } else {
    }
    return
  }
  func.func @transform_0(%arg0: i32, %arg1: i32) -> (i32, i32) {
    %c0_i32 = arith.constant 0 : i32
    return %arg0, %arg1 : i32, i32
  }
  func.func @transform_1(%arg0: i32, %arg1: i32) -> (i32, i32) {
    %c0_i32 = arith.constant 0 : i32
    %c0_i32_0 = arith.constant 0 : i32
    return %arg1, %c0_i32 : i32, i32
  }
  func.func @transform_2(%arg0: i32, %arg1: i32) -> (i32, i32) {
    %c0_i32 = arith.constant 0 : i32
    %c0_i32_0 = arith.constant 0 : i32
    %c0_i32_1 = arith.constant 0 : i32
    return %c0_i32, %c0_i32_0 : i32, i32
  }
  func.func @transform_3(%arg0: i32, %arg1: i32) -> (i32, i32) {
    %c0_i32 = arith.constant 0 : i32
    %c0_i32_0 = arith.constant 0 : i32
    return %arg0, %c0_i32 : i32, i32
  }
  func.func @transform_4(%arg0: i32, %arg1: i32) -> (i32, i32) {
    %c0_i32 = arith.constant 0 : i32
    %c0_i32_0 = arith.constant 0 : i32
    %c0_i32_1 = arith.constant 0 : i32
    return %c0_i32, %c0_i32_0 : i32, i32
  }
  func.func @transform_5(%arg0: i32, %arg1: i32) -> (i32, i32) {
    %c0_i32 = arith.constant 0 : i32
    %c0_i32_0 = arith.constant 0 : i32
    %c0_i32_1 = arith.constant 0 : i32
    return %c0_i32, %c0_i32_0 : i32, i32
  }
  func.func @transform_6(%arg0: i32, %arg1: i32) -> (i32, i32) {
    %c0_i32 = arith.constant 0 : i32
    %c0_i32_0 = arith.constant 0 : i32
    return %arg0, %c0_i32 : i32, i32
  }
  func.func @transform_7(%arg0: i32, %arg1: i32) -> (i32, i32) {
    %c0_i32 = arith.constant 0 : i32
    %c0_i32_0 = arith.constant 0 : i32
    return %arg0, %c0_i32 : i32, i32
  }
}

module attributes {stable_mosaic.version = 11 : i64} {
  func.func @_mm_res_kernel(%arg0: i32, %arg1: i32, %arg2: i32, %arg3: memref<128x512xbf16, #tpu.memory_space<vmem>>, %arg4: memref<512x128xbf16, #tpu.memory_space<vmem>>, %arg5: memref<1x128xf32, #tpu.memory_space<vmem>>, %arg6: memref<128x128xf32, #tpu.memory_space<vmem>>, %arg7: memref<128x128xf32, #tpu.memory_space<vmem>>, %arg8: memref<128x128xf32, #tpu.memory_space<vmem>>) attributes {dimension_semantics = [#tpu.dimension_semantics<parallel>, #tpu.dimension_semantics<parallel>, #tpu.dimension_semantics<arbitrary>], iteration_bounds = array<i64: 1, 1, 1>, scalar_prefetch = 0 : i64, scratch_operands = 1 : i64, tpu.core_type = #tpu.core_type<tc>, window_params = [{transform_indices = @transform_0, window_bounds = array<i64: 128, 512>}, {transform_indices = @transform_1, window_bounds = array<i64: 512, 128>}, {transform_indices = @transform_2, window_bounds = array<i64: 1, 128>}, {transform_indices = @transform_3, window_bounds = array<i64: 128, 128>}, {transform_indices = @transform_4, window_bounds = array<i64: 128, 128>}]} {
    %c0_i32 = arith.constant 0 : i32
    %0 = arith.cmpi eq, %arg2, %c0_i32 : i32
    %1 = arith.extui %0 : i1 to i32
    %c0_i32_0 = arith.constant 0 : i32
    %2 = arith.cmpi ne, %1, %c0_i32_0 : i32
    scf.if %2 {
      %cst_10 = arith.constant 0.000000e+00 : f32
      %12 = vector.broadcast %cst_10 : f32 to vector<128x128xf32>
      %c0_11 = arith.constant 0 : index
      %c0_12 = arith.constant 0 : index
      %13 = vector.load %arg8[%c0_11, %c0_12] : memref<128x128xf32, #tpu.memory_space<vmem>>, vector<128x128xf32>
      tpu.vector_store %arg8[%c0_11, %c0_12], %12 {strides = array<i32>} : memref<128x128xf32, #tpu.memory_space<vmem>>, vector<128x128xf32>,
    } else {
    }
    %c0 = arith.constant 0 : index
    %c0_1 = arith.constant 0 : index
    %3 = vector.load %arg8[%c0, %c0_1] : memref<128x128xf32, #tpu.memory_space<vmem>>, vector<128x128xf32>
    %c0_2 = arith.constant 0 : index
    %c0_3 = arith.constant 0 : index
    %4 = vector.load %arg3[%c0_2, %c0_3] : memref<128x512xbf16, #tpu.memory_space<vmem>>, vector<128x512xbf16>
    %c0_4 = arith.constant 0 : index
    %c0_5 = arith.constant 0 : index
    %5 = vector.load %arg4[%c0_4, %c0_5] : memref<512x128xbf16, #tpu.memory_space<vmem>>, vector<512x128xbf16>
    %cst = arith.constant dense<0.000000e+00> : vector<128x128xf32>
    %6 = tpu.matmul %4, %5, %cst {dimension_numbers = #tpu.dot_dimension_numbers<[1], [0], [0], [1], [0, 0, 1, 1], [], []>} : vector<128x512xbf16>, vector<512x128xbf16>, vector<128x128xf32> -> vector<128x128xf32>
    %7 = arith.addf %3, %6 : vector<128x128xf32>
    %c0_6 = arith.constant 0 : index
    %c0_7 = arith.constant 0 : index
    %8 = vector.load %arg8[%c0_6, %c0_7] : memref<128x128xf32, #tpu.memory_space<vmem>>, vector<128x128xf32>
    tpu.vector_store %arg8[%c0_6, %c0_7], %7 {strides = array<i32>} : memref<128x128xf32, #tpu.memory_space<vmem>>, vector<128x128xf32>,
    %c0_i32_8 = arith.constant 0 : i32
    %9 = arith.cmpi eq, %arg2, %c0_i32_8 : i32
    %10 = arith.extui %9 : i1 to i32
    %c0_i32_9 = arith.constant 0 : i32
    %11 = arith.cmpi ne, %10, %c0_i32_9 : i32
    scf.if %11 {
      %c0_10 = arith.constant 0 : index
      %c0_11 = arith.constant 0 : index
      %12 = vector.load %arg8[%c0_10, %c0_11] : memref<128x128xf32, #tpu.memory_space<vmem>>, vector<128x128xf32>
      %c0_12 = arith.constant 0 : index
      %c0_13 = arith.constant 0 : index
      %13 = vector.load %arg5[%c0_12, %c0_13] : memref<1x128xf32, #tpu.memory_space<vmem>>, vector<1x128xf32>
      %14 = vector.broadcast %13 : vector<1x128xf32> to vector<128x128xf32>
      %15 = arith.addf %12, %14 : vector<128x128xf32>
      %c0_14 = arith.constant 0 : index
      %c0_15 = arith.constant 0 : index
      %16 = vector.load %arg6[%c0_14, %c0_15] : memref<128x128xf32, #tpu.memory_space<vmem>>, vector<128x128xf32>
      %17 = arith.addf %15, %16 : vector<128x128xf32>
      %c0_16 = arith.constant 0 : index
      %c0_17 = arith.constant 0 : index
      %18 = vector.load %arg7[%c0_16, %c0_17] : memref<128x128xf32, #tpu.memory_space<vmem>>, vector<128x128xf32>
      tpu.vector_store %arg7[%c0_16, %c0_17], %17 {strides = array<i32>} : memref<128x128xf32, #tpu.memory_space<vmem>>, vector<128x128xf32>,
    } else {
    }
    return
  }
  func.func @transform_0(%arg0: i32, %arg1: i32, %arg2: i32) -> (i32, i32) {
    %c0_i32 = arith.constant 0 : i32
    return %arg0, %arg2 : i32, i32
  }
  func.func @transform_1(%arg0: i32, %arg1: i32, %arg2: i32) -> (i32, i32) {
    %c0_i32 = arith.constant 0 : i32
    return %arg2, %arg1 : i32, i32
  }
  func.func @transform_2(%arg0: i32, %arg1: i32, %arg2: i32) -> (i32, i32) {
    %c0_i32 = arith.constant 0 : i32
    %c0_i32_0 = arith.constant 0 : i32
    return %c0_i32, %arg1 : i32, i32
  }
  func.func @transform_3(%arg0: i32, %arg1: i32, %arg2: i32) -> (i32, i32) {
    %c0_i32 = arith.constant 0 : i32
    return %arg0, %arg1 : i32, i32
  }
  func.func @transform_4(%arg0: i32, %arg1: i32, %arg2: i32) -> (i32, i32) {
    %c0_i32 = arith.constant 0 : i32
    return %arg0, %arg1 : i32, i32
  }
}

</mosaic_0001>

<bundles_post_ra>
// kernel: transformer_forward.11
= control target key start
LH: loop header
LB: loop body
LE: loop exit
PB: predicated region body
PF: predicated region fallthrough
CT: control target
= control target key end

     0   :  { %s684_s0 = inlined_call_operand.vmem [shape: f32[128,128], index: 0, kind: input, shape index: {}]   ;;  %s685_s1 = inlined_call_operand.vmem [shape: f32[1,128], index: 1, kind: input, shape index: {}]   ;;  %s686_s2 = inlined_call_operand.vmem [shape: f32[1,128], index: 2, kind: input, shape index: {}]   ;;  %s687_s3 = inlined_call_operand.vmem [shape: bf16[128,128], index: 3, kind: output, shape index: {}]  }
   0x1   :  { %v14_v0 = vld [vmem:[%s684_s0] sm:$0xff]  ;;  %v16_v1 = vld [vmem:[%s684_s0 + $0x10] sm:$0xff]  ;;  %v15_v2 = vld [vmem:[%s684_s0 + $0x8] sm:$0xff] }
   0x2   :  { %30 = vadd.xlane.f32.xlu0 %v14_v0  ;;  %34 = vadd.xlane.f32.xlu1 %v16_v1  ;;  %v17_v3 = vld [vmem:[%s684_s0 + $0x18] sm:$0xff]  ;;  %v18_v4 = vld [vmem:[%s684_s0 + $0x20] sm:$0xff]  ;;  %v19_v5 = vld [vmem:[%s684_s0 + $0x28] sm:$0xff] }
   0x3   :  { %v20_v6 = vld [vmem:[%s684_s0 + $0x30] sm:$0xff]  ;;  %v21_v7 = vld [vmem:[%s684_s0 + $0x38] sm:$0xff]  ;;  %v22_v8 = vld [vmem:[%s684_s0 + $0x40] sm:$0xff] }
   0x4   :  { %v23_v9 = vld [vmem:[%s684_s0 + $0x48] sm:$0xff]  ;;  %v24_v10 = vld [vmem:[%s684_s0 + $0x50] sm:$0xff]  ;;  %v506_v11 = vld [vmem:[%s684_s0 + $0x58] sm:$0xff] }
   0x5   :  { %v512_v12 = vld [vmem:[%s684_s0 + $0x60] sm:$0xff]  ;;  %v517_v13 = vld [vmem:[%s684_s0 + $0x68] sm:$0xff]  ;;  %v524_v14 = vld [vmem:[%s684_s0 + $0x70] sm:$0xff] }
   0x6   :  { %32 = vadd.xlane.f32.xlu0 %v15_v2  ;;  %36 = vadd.xlane.f32.xlu1 %v17_v3  ;;  %v529_v15 = vld [vmem:[%s684_s0 + $0x78] sm:$0xff] }
   0xa   :  { %38 = vadd.xlane.f32.xlu0 %v18_v4  ;;  %40 = vadd.xlane.f32.xlu1 %v19_v5 }
   0xe   :  { %42 = vadd.xlane.f32.xlu0 %v20_v6  ;;  %44 = vadd.xlane.f32.xlu1 %v21_v7 }
  0x12   :  { %46 = vadd.xlane.f32.xlu0 %v22_v8  ;;  %48 = vadd.xlane.f32.xlu1 %v23_v9 }
  0x16   :  { %50 = vadd.xlane.f32.xlu0 %v24_v10  ;;  %52 = vadd.xlane.f32.xlu1 %v506_v11 }
  0x1a   :  { %54 = vadd.xlane.f32.xlu0 %v512_v12  ;;  %56 = vadd.xlane.f32.xlu1 %v517_v13 }
  0x1e   :  { %58 = vadd.xlane.f32.xlu0 %v524_v14  ;;  %60 = vadd.xlane.f32.xlu1 %v529_v15 }
  0x8f   :  { %v31_v16 = vpop.xlane.xlu0 %30  ;;  %v35_v17 = vpop.xlane.xlu1 %34 }
  0x90   :  { %v63_v18 = vmul.f32 0.0078125, %v31_v16  ;;  %v65_v19 = vmul.f32 0.0078125, %v35_v17 }
  0x92   :  { %v533_v20 = vsub.f32 %v14_v0, %v63_v18  ;;  %v535_v21 = vsub.f32 %v16_v1, %v65_v19 }
  0x93   :  { %v33_v22 = vpop.xlane.xlu0 %32  ;;  %v37_v23 = vpop.xlane.xlu1 %36 }
  0x94   :  { %v64_v24 = vmul.f32 0.0078125, %v33_v22  ;;  %v95_v25 = vmul.f32 %v533_v20, %v533_v20  ;;  %v66_v26 = vmul.f32 0.0078125, %v37_v23  ;;  %v97_v29 = vmul.f32 %v535_v21, %v535_v21 }
  0x96   :  { %v539_v27 = vsub.f32 %v15_v2, %v64_v24  ;;  %111 = vadd.xlane.f32.xlu0 %v95_v25  ;;  %v541_v28 = vsub.f32 %v17_v3, %v66_v26 }
  0x97   :  { %v39_v30 = vpop.xlane.xlu0 %38  ;;  %v41_v31 = vpop.xlane.xlu1 %40 }
  0x98   :  { %v67_v32 = vmul.f32 0.0078125, %v39_v30  ;;  %v96_v33 = vmul.f32 %v539_v27, %v539_v27  ;;  %v68_v34 = vmul.f32 0.0078125, %v41_v31  ;;  %v98_v37 = vmul.f32 %v541_v28, %v541_v28 }
  0x9a   :  { %v547_v35 = vsub.f32 %v18_v4, %v67_v32  ;;  %115 = vadd.xlane.f32.xlu0 %v97_v29  ;;  %113 = vadd.xlane.f32.xlu1 %v96_v33  ;;  %v549_v36 = vsub.f32 %v19_v5, %v68_v34 }
  0x9b   :  { %v43_v38 = vpop.xlane.xlu0 %42  ;;  %v45_v39 = vpop.xlane.xlu1 %44 }
  0x9c   :  { %v69_v40 = vmul.f32 0.0078125, %v43_v38  ;;  %v99_v41 = vmul.f32 %v547_v35, %v547_v35  ;;  %v70_v42 = vmul.f32 0.0078125, %v45_v39  ;;  %v100_v45 = vmul.f32 %v549_v36, %v549_v36 }
  0x9e   :  { %v555_v43 = vsub.f32 %v20_v6, %v69_v40  ;;  %117 = vadd.xlane.f32.xlu1 %v98_v37  ;;  %119 = vadd.xlane.f32.xlu0 %v99_v41  ;;  %v557_v44 = vsub.f32 %v21_v7, %v70_v42 }
  0x9f   :  { %v47_v46 = vpop.xlane.xlu0 %46  ;;  %v49_v47 = vpop.xlane.xlu1 %48 }
  0xa0   :  { %v71_v48 = vmul.f32 0.0078125, %v47_v46  ;;  %v101_v49 = vmul.f32 %v555_v43, %v555_v43  ;;  %v72_v50 = vmul.f32 0.0078125, %v49_v47  ;;  %v102_v53 = vmul.f32 %v557_v44, %v557_v44 }
  0xa2   :  { %v563_v51 = vsub.f32 %v22_v8, %v71_v48  ;;  %121 = vadd.xlane.f32.xlu1 %v100_v45  ;;  %123 = vadd.xlane.f32.xlu0 %v101_v49  ;;  %v565_v52 = vsub.f32 %v23_v9, %v72_v50  ;;  %v606_v49 = vld [vmem:[%s685_s1] ss:$0 sm:$0xff] }
  0xa3   :  { %v51_v54 = vpop.xlane.xlu0 %50  ;;  %v53_v55 = vpop.xlane.xlu1 %52 }
  0xa4   :  { %v73_v56 = vmul.f32 0.0078125, %v51_v54  ;;  %v103_v57 = vmul.f32 %v563_v51, %v563_v51  ;;  %v74_v58 = vmul.f32 0.0078125, %v53_v55  ;;  %v104_v61 = vmul.f32 %v565_v52, %v565_v52 }
  0xa6   :  { %v571_v59 = vsub.f32 %v24_v10, %v73_v56  ;;  %125 = vadd.xlane.f32.xlu1 %v102_v53  ;;  %127 = vadd.xlane.f32.xlu0 %v103_v57  ;;  %v574_v60 = vsub.f32 %v506_v11, %v74_v58 }
  0xa7   :  { %v55_v62 = vpop.xlane.xlu0 %54  ;;  %v57_v63 = vpop.xlane.xlu1 %56 }
  0xa8   :  { %v75_v0 = vmul.f32 0.0078125, %v55_v62  ;;  %v105_v1 = vmul.f32 %v571_v59, %v571_v59  ;;  %v76_v2 = vmul.f32 0.0078125, %v57_v63  ;;  %v106_v5 = vmul.f32 %v574_v60, %v574_v60  ;;  %v613_v63 = vld [vmem:[%s686_s2] ss:$0 sm:$0xff] }
  0xaa   :  { %v581_v3 = vsub.f32 %v512_v12, %v75_v0  ;;  %129 = vadd.xlane.f32.xlu1 %v104_v61  ;;  %131 = vadd.xlane.f32.xlu0 %v105_v1  ;;  %v584_v4 = vsub.f32 %v517_v13, %v76_v2 }
  0xab   :  { %v59_v6 = vpop.xlane.xlu0 %58  ;;  %v61_v7 = vpop.xlane.xlu1 %60 }
  0xac   :  { %v77_v8 = vmul.f32 0.0078125, %v59_v6  ;;  %v107_v9 = vmul.f32 %v581_v3, %v581_v3  ;;  %v78_v10 = vmul.f32 0.0078125, %v61_v7  ;;  %v108_v13 = vmul.f32 %v584_v4, %v584_v4 }
  0xae   :  { %v591_v11 = vsub.f32 %v524_v14, %v77_v8  ;;  %133 = vadd.xlane.f32.xlu1 %v106_v5  ;;  %135 = vadd.xlane.f32.xlu0 %v107_v9  ;;  %v594_v12 = vsub.f32 %v529_v15, %v78_v10 }
  0xb0   :  { %v109_v16 = vmul.f32 %v591_v11, %v591_v11  ;;  %v110_v17 = vmul.f32 %v594_v12, %v594_v12 }
  0xb2   :  { %137 = vadd.xlane.f32.xlu1 %v108_v13  ;;  %139 = vadd.xlane.f32.xlu0 %v109_v16 }
  0xb6   :  { %141 = vadd.xlane.f32.xlu1 %v110_v17 }
 0x123   :  { %v112_v18 = vpop.xlane.xlu0 %111 }
 0x124   :  { %v143_v14 = vmul.f32 0.0078125, %v112_v18 }
 0x126   :  { %v159_v19 = vadd.f32 1e-05, %v143_v14 }
 0x127   :  { %v114_v22 = vpop.xlane.xlu1 %113  ;;  %v116_v23 = vpop.xlane.xlu0 %115 }
 0x128   :  { %418 = vrsqrt.f32 %v159_v19  ;;  %v144_v15 = vmul.f32 0.0078125, %v114_v22  ;;  %v145_v24 = vmul.f32 0.0078125, %v116_v23 }
 0x12a   :  { %v160_v25 = vadd.f32 1e-05, %v144_v15  ;;  %v161_v26 = vadd.f32 1e-05, %v145_v24 }
 0x12b   :  { %v118_v29 = vpop.xlane.xlu1 %117  ;;  %v120_v30 = vpop.xlane.xlu0 %119 }
 0x12c   :  { %420 = vrsqrt.f32 %v160_v25  ;;  %v146_v31 = vmul.f32 0.0078125, %v118_v29  ;;  %v147_v32 = vmul.f32 0.0078125, %v120_v30 }
 0x12d   :  { %422 = vrsqrt.f32 %v161_v26 }
 0x12e   :  { %v162_v33 = vadd.f32 1e-05, %v146_v31  ;;  %v163_v34 = vadd.f32 1e-05, %v147_v32 }
 0x12f   :  { %v122_v37 = vpop.xlane.xlu1 %121  ;;  %v124_v38 = vpop.xlane.xlu0 %123 }
 0x130   :  { %424 = vrsqrt.f32 %v162_v33  ;;  %v148_v39 = vmul.f32 0.0078125, %v122_v37  ;;  %v149_v40 = vmul.f32 0.0078125, %v124_v38 }
 0x131   :  { %426 = vrsqrt.f32 %v163_v34 }
 0x132   :  { %v419_v41 = vpop.eup %418  ;;  %v164_v42 = vadd.f32 1e-05, %v148_v39  ;;  %v165_v45 = vadd.f32 1e-05, %v149_v40 }
 0x133   :  { %v191_v46 = vmul.f32 %v419_v41, %v533_v20  ;;  %v126_v47 = vpop.xlane.xlu1 %125  ;;  %v128_v48 = vpop.xlane.xlu0 %127 }
 0x134   :  { %428 = vrsqrt.f32 %v164_v42  ;;  %v150_v50 = vmul.f32 0.0078125, %v126_v47  ;;  %v151_v53 = vmul.f32 0.0078125, %v128_v48 }
 0x135   :  { %430 = vrsqrt.f32 %v165_v45  ;;  %v214_v58 = vmul.f32 %v606_v49, %v191_v46 }
 0x136   :  { %v421_v54 = vpop.eup %420  ;;  %v166_v55 = vadd.f32 1e-05, %v150_v50  ;;  %v167_v56 = vadd.f32 1e-05, %v151_v53 }
 0x137   :  { %v423_v57 = vpop.eup %422  ;;  %v192_v61 = vmul.f32 %v421_v54, %v539_v27  ;;  %v130_v20 = vpop.xlane.xlu1 %129  ;;  %v237_v27 = vadd.f32 %v613_v63, %v214_v58 }
 0x138   :  { %v132_v62 = vpop.xlane.xlu0 %131  ;;  %v193_v0 = vmul.f32 %v423_v57, %v535_v21  ;;  %432 = vrsqrt.f32 %v166_v55  ;;  %v152_v1 = vmul.f32 0.0078125, %v130_v20 }
 0x139   :  { %v153_v2 = vmul.f32 0.0078125, %v132_v62  ;;  %v215_v5 = vmul.f32 %v606_v49, %v192_v61  ;;  %434 = vrsqrt.f32 %v167_v56 }
 0x13a   :  { %v425_v6 = vpop.eup %424  ;;  %v168_v7 = vadd.f32 1e-05, %v152_v1  ;;  %v216_v13 = vmul.f32 %v606_v49, %v193_v0 }
 0x13b   :  { %v169_v8 = vadd.f32 1e-05, %v153_v2  ;;  %v427_v9 = vpop.eup %426  ;;  %v238_v10 = vadd.f32 %v613_v63, %v215_v5  ;;  %v194_v16 = vmul.f32 %v425_v6, %v541_v28  ;;  %v134_v17 = vpop.xlane.xlu1 %133 }
 0x13c   :  { %v136_v21 = vpop.xlane.xlu0 %135  ;;  %v195_v18 = vmul.f32 %v427_v9, %v547_v35  ;;  %436 = vrsqrt.f32 %v168_v7  ;;  %v154_v14 = vmul.f32 0.0078125, %v134_v17  ;;  %v239_v28 = vadd.f32 %v613_v63, %v216_v13 }
 0x13d   :  { %v374_v19 = vpack.c.bf16 %v238_v10, %v237_v27  ;;  %v217_v22 = vmul.f32 %v606_v49, %v194_v16  ;;  %438 = vrsqrt.f32 %v169_v8  ;;  %v155_v23 = vmul.f32 0.0078125, %v136_v21 }
 0x13e   :  { %v429_v15 = vpop.eup %428  ;;  %v218_v24 = vmul.f32 %v606_v49, %v195_v18  ;;  %v170_v25 = vadd.f32 1e-05, %v154_v14 }
 0x13f   :  { %v431_v26 = vpop.eup %430  ;;  %375 = vst [vmem:[%s687_s3] sm:$0xff] %v374_v19   ;;  %v240_v35 = vadd.f32 %v613_v63, %v217_v22  ;;  %v196_v29 = vmul.f32 %v429_v15, %v549_v36  ;;  %v171_v30 = vadd.f32 1e-05, %v155_v23  ;;  %v138_v31 = vpop.xlane.xlu1 %137 }
 0x140   :  { %v140_v32 = vpop.xlane.xlu0 %139  ;;  %v197_v33 = vmul.f32 %v431_v26, %v555_v43  ;;  %440 = vrsqrt.f32 %v170_v25  ;;  %v156_v34 = vmul.f32 0.0078125, %v138_v31  ;;  %v241_v41 = vadd.f32 %v613_v63, %v218_v24 }
 0x141   :  { %v379_v37 = vpack.c.bf16 %v240_v35, %v239_v28  ;;  %v219_v38 = vmul.f32 %v606_v49, %v196_v29  ;;  %442 = vrsqrt.f32 %v171_v30  ;;  %v157_v39 = vmul.f32 0.0078125, %v140_v32 }
 0x142   :  { %v433_v40 = vpop.eup %432  ;;  %v172_v42 = vadd.f32 1e-05, %v156_v34  ;;  %v220_v43 = vmul.f32 %v606_v49, %v197_v33 }
 0x143   :  { %v435_v45 = vpop.eup %434  ;;  %411 = vst [vmem:[%s687_s3 + $0x8] sm:$0xff] %v379_v37   ;;  %v242_v36 = vadd.f32 %v613_v63, %v219_v38  ;;  %v198_v46 = vmul.f32 %v433_v40, %v557_v44  ;;  %v173_v47 = vadd.f32 1e-05, %v157_v39  ;;  %v142_v48 = vpop.xlane.xlu1 %141 }
 0x144   :  { %v199_v50 = vmul.f32 %v435_v45, %v563_v51  ;;  %444 = vrsqrt.f32 %v172_v42  ;;  %v158_v53 = vmul.f32 0.0078125, %v142_v48  ;;  %v243_v61 = vadd.f32 %v613_v63, %v220_v43 }
 0x145   :  { %v384_v54 = vpack.c.bf16 %v242_v36, %v241_v41  ;;  %v221_v55 = vmul.f32 %v606_v49, %v198_v46  ;;  %446 = vrsqrt.f32 %v173_v47 }
 0x146   :  { %v437_v56 = vpop.eup %436  ;;  %v174_v57 = vadd.f32 1e-05, %v158_v53  ;;  %v222_v20 = vmul.f32 %v606_v49, %v199_v50 }
 0x147   :  { %v439_v58 = vpop.eup %438  ;;  %412 = vst [vmem:[%s687_s3 + $0x10] sm:$0xff] %v384_v54   ;;  %v244_v44 = vadd.f32 %v613_v63, %v221_v55  ;;  %v200_v51 = vmul.f32 %v437_v56, %v565_v52 }
 0x148   :  { %v201_v62 = vmul.f32 %v439_v58, %v571_v59  ;;  %448 = vrsqrt.f32 %v174_v57  ;;  %v245_v6 = vadd.f32 %v613_v63, %v222_v20 }
 0x149   :  { %v389_v0 = vpack.c.bf16 %v244_v44, %v243_v61  ;;  %v223_v1 = vmul.f32 %v606_v49, %v200_v51 }
 0x14a   :  { %v441_v2 = vpop.eup %440  ;;  %v224_v8 = vmul.f32 %v606_v49, %v201_v62 }
 0x14b   :  { %v443_v5 = vpop.eup %442  ;;  %413 = vst [vmem:[%s687_s3 + $0x18] sm:$0xff] %v389_v0   ;;  %v246_v7 = vadd.f32 %v613_v63, %v223_v1  ;;  %v202_v52 = vmul.f32 %v441_v2, %v574_v60 }
 0x14c   :  { %v203_v59 = vmul.f32 %v443_v5, %v581_v3  ;;  %v247_v16 = vadd.f32 %v613_v63, %v224_v8 }
 0x14d   :  { %v394_v9 = vpack.c.bf16 %v246_v7, %v245_v6  ;;  %v225_v27 = vmul.f32 %v606_v49, %v202_v52 }
 0x14e   :  { %v445_v10 = vpop.eup %444  ;;  %v226_v21 = vmul.f32 %v606_v49, %v203_v59 }
 0x14f   :  { %v447_v13 = vpop.eup %446  ;;  %414 = vst [vmem:[%s687_s3 + $0x20] sm:$0xff] %v394_v9   ;;  %v248_v17 = vadd.f32 %v613_v63, %v225_v27  ;;  %v204_v18 = vmul.f32 %v445_v10, %v584_v4 }
 0x150   :  { %v205_v60 = vmul.f32 %v447_v13, %v591_v11  ;;  %v249_v22 = vadd.f32 %v613_v63, %v226_v21 }
 0x151   :  { %v399_v3 = vpack.c.bf16 %v248_v17, %v247_v16  ;;  %v227_v14 = vmul.f32 %v606_v49, %v204_v18 }
 0x152   :  { %v449_v19 = vpop.eup %448  ;;  %v228_v15 = vmul.f32 %v606_v49, %v205_v60 }
 0x153   :  { %415 = vst [vmem:[%s687_s3 + $0x28] sm:$0xff] %v399_v3   ;;  %v250_v23 = vadd.f32 %v613_v63, %v227_v14  ;;  %v206_v24 = vmul.f32 %v449_v19, %v594_v12 }
 0x154   :  { %v251_v11 = vadd.f32 %v613_v63, %v228_v15 }
 0x155   :  { %v404_v25 = vpack.c.bf16 %v250_v23, %v249_v22  ;;  %v229_v4 = vmul.f32 %v606_v49, %v206_v24 }
 0x157   :  { %416 = vst [vmem:[%s687_s3 + $0x30] sm:$0xff] %v404_v25   ;;  %v252_v26 = vadd.f32 %v613_v63, %v229_v4 }
 0x159   :  { %v409_v28 = vpack.c.bf16 %v252_v26, %v251_v11 }
 0x15b   :  { %417 = vst [vmem:[%s687_s3 + $0x38] sm:$0xff] %v409_v28  }

// kernel: transformer_forward.12
= control target key start
LH: loop header
LB: loop body
LE: loop exit
PB: predicated region body
PF: predicated region fallthrough
CT: control target
= control target key end

     0   :  { %s1257_s12 = smov 0   ;;  %s1259_s13 = smov 0   ;;  %s1416_s0 = inlined_call_operand.vmem [shape: bf16[128,128], index: 0, kind: input, shape index: {}]   ;;  %s1417_s1 = inlined_call_operand.vmem [shape: bf16[128,384], index: 1, kind: input, shape index: {}]   ;;  %s1418_s2 = inlined_call_operand.vmem [shape: f32[1,384], index: 2, kind: input, shape index: {}]   ;;  %s1419_s3 = inlined_call_operand.vmem [shape: bf16[128,384], index: 3, kind: output, shape index: {}]  }
   0x1   :  { %s1261_s14 = smov 0   ;;  %s1263_s15 = smov 0  }
   0x2   :  { %s1265_s16 = smov 0  }
   0x3 LB: > { %s28_s17 = sadd.s32 1, %s1231_s15  ;;  %s967_s18 = sadd.s32 4294967295, %s1235_s16   ;;  %s1235_s16 = sphi %s1265_s16, %s13_s16   ;;  %s1231_s15 = sphi %s1263_s15, %s1424_s15   ;;  %s1227_s14 = sphi %s1261_s14, %s1423_s14   ;;  %s1223_s13 = sphi %s1259_s13, %s1422_s13   ;;  %s1219_s12 = sphi %s1257_s12, %s1421_s12  }
   0x4   : > { %p30_p0 = scmp.ge.s32.totalorder %s28_s17, 3  ;;  %p76_p1 = scmp.ne.s32.totalorder %s1223_s13, %s1219_s12 }
   0x5   : > { %p77_p2 = scmp.eq.s32.totalorder %s1235_s16, 0  ;;  %p134_p4 = scmp.eq.s32.totalorder %s967_s18, 2 }
   0x6   : > { %s1426_s17 = smov (%p30_p0, %s28_s17), 0  ;;  %s69_s20 = sadd.s32 1, %s1223_s13 }
   0x7   : > { %p78_p3 = por %p77_p2, %p76_p1  ;;  %s65_s19 = ssub.s32 %s1231_s15, %s1426_s17 }
   0x8   : > { %p67_p5 = scmp.eq.s32.totalorder %s65_s19, 0  ;;  %p1292_p6 = por %p134_p4, %p76_p1 }
   0x9   : > { %p971_p7 = scmp.ge.s32.totalorder %s1235_s16, 3 }
   0xa   : > { %s1297_s22 = scalar_select %p67_p5, %s1223_s13, %s69_s20  }
   0xb   : > { %168 = sbr.rel (%p971_p7) target bundleno = 32 (0x20), region = 20 }
  0x12   : > { %171 = sbr.rel (!%p78_p3) target bundleno = 32 (0x20), region = 24  ;;  %s173_s23 = sand.u32 (%p78_p3), 1, %s1223_s13  }
  0x13   : > { %s973_s24 = sshll.u32 (%p78_p3), %s1231_s15, 2  ;;  %s972_s25 = sshll.u32 (%p78_p3), %s173_s23, 6 }
  0x14   : > { %s1305_s28 = scalar_lea.vmem (%p78_p3), %s1417_s1, %s973_s24  ;;  %s175_s29 = scalar_lea.vmem (%p78_p3), [#allocation3], %s972_s25 }
  0x15   : > { %v196_v0 = vld [vmem:[%s1305_s28] sm:$0xf] (%p78_p3)  ;;  %v198_v1 = vld [vmem:[%s1305_s28 + $0xc] sm:$0xf] (%p78_p3)  ;;  %v200_v2 = vld [vmem:[%s1305_s28 + $0x18] sm:$0xf] (%p78_p3) }
  0x16   : > { %197 = vst [vmem:[%s175_s29] sm:$0xf] (%p78_p3), %v196_v0  ;;  %199 = vst [vmem:[%s175_s29 + $0x4] sm:$0xf] (%p78_p3), %v198_v1  ;;  %v202_v3 = vld [vmem:[%s1305_s28 + $0x24] sm:$0xf] (%p78_p3) }
  0x17   : > { %v204_v4 = vld [vmem:[%s1305_s28 + $0x30] sm:$0xf] (%p78_p3)  ;;  %201 = vst [vmem:[%s175_s29 + $0x8] sm:$0xf] (%p78_p3), %v200_v2  ;;  %203 = vst [vmem:[%s175_s29 + $0xc] sm:$0xf] (%p78_p3), %v202_v3 }
  0x18   : > { %205 = vst [vmem:[%s175_s29 + $0x10] sm:$0xf] (%p78_p3), %v204_v4  ;;  %v206_v5 = vld [vmem:[%s1305_s28 + $0x3c] sm:$0xf] (%p78_p3)  ;;  %v208_v6 = vld [vmem:[%s1305_s28 + $0x48] sm:$0xf] (%p78_p3) }
  0x19   : > { %v210_v7 = vld [vmem:[%s1305_s28 + $0x54] sm:$0xf]  ;;  %207 = vst [vmem:[%s175_s29 + $0x14] sm:$0xf] %v206_v5  ;;  %209 = vst [vmem:[%s175_s29 + $0x18] sm:$0xf] %v208_v6 }
  0x1a   : > { %211 = vst [vmem:[%s175_s29 + $0x1c] sm:$0xf] %v210_v7  ;;  %v212_v8 = vld [vmem:[%s1305_s28 + $0x60] sm:$0xf]  ;;  %v214_v9 = vld [vmem:[%s1305_s28 + $0x6c] sm:$0xf] }
  0x1b   : > { %v216_v10 = vld [vmem:[%s1305_s28 + $0x78] sm:$0xf]  ;;  %213 = vst [vmem:[%s175_s29 + $0x20] sm:$0xf] %v212_v8  ;;  %215 = vst [vmem:[%s175_s29 + $0x24] sm:$0xf] %v214_v9 }
  0x1c   : > { %217 = vst [vmem:[%s175_s29 + $0x28] sm:$0xf] %v216_v10  ;;  %v218_v11 = vld [vmem:[%s1305_s28 + $0x84] sm:$0xf]  ;;  %v220_v12 = vld [vmem:[%s1305_s28 + $0x90] sm:$0xf] }
  0x1d   : > { %v222_v13 = vld [vmem:[%s1305_s28 + $0x9c] sm:$0xf]  ;;  %219 = vst [vmem:[%s175_s29 + $0x2c] sm:$0xf] %v218_v11  ;;  %221 = vst [vmem:[%s175_s29 + $0x30] sm:$0xf] %v220_v12 }
  0x1e   : > { %223 = vst [vmem:[%s175_s29 + $0x34] sm:$0xf] %v222_v13  ;;  %v224_v14 = vld [vmem:[%s1305_s28 + $0xa8] sm:$0xf]  ;;  %v226_v15 = vld [vmem:[%s1305_s28 + $0xb4] sm:$0xf] }
  0x1f   : > { %225 = vst [vmem:[%s175_s29 + $0x38] sm:$0xf] %v224_v14  ;;  %227 = vst [vmem:[%s175_s29 + $0x3c] sm:$0xf] %v226_v15 }
  0x20 PF: > { %p974_p8 = scmp.ge.s32.totalorder %s1235_s16, 1  ;;  %p287_p9 = scmp.lt.s32.totalorder %s1235_s16, 4 }
  0x22   : > { %p288_p10 = pnand %p974_p8, %p287_p9 }
  0x23   : > { %s294_s30 = sand.u32 (!%p288_p10), 1, %s1219_s12   ;;  %v1189_v16 = vld [vmem:[%s1416_s0] sm:$0xff] (!%p288_p10)   ;;  %v1191_v26 = vld [vmem:[%s1416_s0 + $0x8] sm:$0xff] (!%p288_p10)   ;;  %v1193_v28 = vld [vmem:[%s1416_s0 + $0x10] sm:$0xff] (!%p288_p10)   ;;  %p337_p11 = scmp.lt.s32.totalorder (!%p288_p10), %s1227_s14, 2 }
  0x24   : > { %291 = sbr.rel (%p288_p10) target bundleno = 310 (0x136), region = 69  ;;  %s1329_s6 = sshll.u32 (!%p288_p10), %s294_s30, 6  ;;  %v1190_v17 = vld [vmem:[%s1416_s0 + $0x20] sm:$0xff] (!%p288_p10)   ;;  %1109 = vmatprep.mubr.bf16.mxu0 (!%p288_p10), %v1189_v16  ;;  %v1192_v27 = vld [vmem:[%s1416_s0 + $0x28] sm:$0xff] (!%p288_p10)   ;;  %v1194_v29 = vld [vmem:[%s1416_s0 + $0x30] sm:$0xff] (!%p288_p10)  }
  0x25   : > { %s1335_s9 = scalar_lea.vmem (!%p288_p10), [#allocation3], %s1329_s6  ;;  %1117 = vmatprep.mubr.bf16.mxu1 (!%p288_p10), %v1190_v17  ;;  %v1195_v30 = vld [vmem:[%s1416_s0 + $0x18] sm:$0xff] (!%p288_p10)   ;;  %s1369_s7 = scalar_lea.vmem (!%p288_p10), [#allocation4], %s1329_s6 }
  0x26   : > { %v1181_v18 = vld [vmem:[%s1335_s9] sm:$0xff] (!%p288_p10)   ;;  %v1182_v19 = vld [vmem:[%s1335_s9 + $0x8] sm:$0xff] (!%p288_p10)   ;;  %v1183_v20 = vld [vmem:[%s1335_s9 + $0x10] sm:$0xff] (!%p288_p10)  }
  0x27   : > { %1093 = vmatprep.subr.bf16.mxu0 (!%p288_p10), %v1181_v18  ;;  %1125 = vmatprep.subr.bf16.mxu1 (!%p288_p10), %v1181_v18  ;;  %v1184_v21 = vld [vmem:[%s1335_s9 + $0x18] sm:$0xff] (!%p288_p10)   ;;  %v1185_v22 = vld [vmem:[%s1335_s9 + $0x20] sm:$0xff] (!%p288_p10)   ;;  %v1186_v23 = vld [vmem:[%s1335_s9 + $0x28] sm:$0xff] (!%p288_p10)  }
  0x28   : > { %1094 = vmatpush3.bf16.msra.mxu0 (!%p288_p10), %v1181_v18  ;;  %1133 = vmatpush3.bf16.msra.mxu1 (!%p288_p10), %v1181_v18  ;;  %v1187_v24 = vld [vmem:[%s1335_s9 + $0x30] sm:$0xff] (!%p288_p10)   ;;  %v1188_v25 = vld [vmem:[%s1335_s9 + $0x38] sm:$0xff] (!%p288_p10)  }
  0x29   : > { %1095 = vmatprep.subr.bf16.mxu0 (!%p288_p10), %v1182_v19  ;;  %1126 = vmatprep.subr.bf16.mxu1 (!%p288_p10), %v1182_v19  ;;  %v1196_v31 = vld [vmem:[%s1416_s0 + $0x38] sm:$0xff] (!%p288_p10)  }
  0x2b   : > { %s338_s29 = scalar_select %p337_p11, %s1227_s14, 2 }
  0x2c   : > { %1096 = vmatpush3.bf16.msra.mxu0 %v1182_v19  ;;  %1134 = vmatpush3.bf16.msra.mxu1 %v1182_v19  ;;  %s1011_s6 = sshll.u32 (%p1292_p6), %s1227_s14, 2 }
  0x2d   : > { %1097 = vmatprep.subr.bf16.mxu0 %v1183_v20  ;;  %1127 = vmatprep.subr.bf16.mxu1 %v1183_v20  ;;  %s339_s5 = scalar_lea.vmem %s1418_s2, %s338_s29  ;;  %s768_s10 = scalar_lea.vmem (%p1292_p6), %s1419_s3, %s1011_s6 }
  0x2e   : > { %v993_v33 = vld [vmem:[%s339_s5] ss:$0 sm:$0xff] }
  0x30   : > { %1098 = vmatpush3.bf16.msra.mxu0 %v1183_v20  ;;  %1135 = vmatpush3.bf16.msra.mxu1 %v1183_v20 }
  0x31   : > { %1099 = vmatprep.subr.bf16.mxu0 %v1184_v21  ;;  %1128 = vmatprep.subr.bf16.mxu1 %v1184_v21 }
  0x34   : > { %1100 = vmatpush3.bf16.msra.mxu0 %v1184_v21  ;;  %1136 = vmatpush3.bf16.msra.mxu1 %v1184_v21 }
  0x35   : > { %1101 = vmatprep.subr.bf16.mxu0 %v1185_v22  ;;  %1129 = vmatprep.subr.bf16.mxu1 %v1185_v22 }
  0x38   : > { %1102 = vmatpush3.bf16.msra.mxu0 %v1185_v22  ;;  %1137 = vmatpush3.bf16.msra.mxu1 %v1185_v22 }
  0x39   : > { %1103 = vmatprep.subr.bf16.mxu0 %v1186_v23  ;;  %1130 = vmatprep.subr.bf16.mxu1 %v1186_v23 }
  0x3c   : > { %1104 = vmatpush3.bf16.msra.mxu0 %v1186_v23  ;;  %1138 = vmatpush3.bf16.msra.mxu1 %v1186_v23 }
  0x3d   : > { %1105 = vmatprep.subr.bf16.mxu0 %v1187_v24  ;;  %1131 = vmatprep.subr.bf16.mxu1 %v1187_v24 }
  0x40   : > { %1106 = vmatpush3.bf16.msra.mxu0 %v1187_v24  ;;  %1139 = vmatpush3.bf16.msra.mxu1 %v1187_v24 }
  0x41   : > { %1107 = vmatprep.subr.bf16.mxu0 %v1188_v25  ;;  %1132 = vmatprep.subr.bf16.mxu1 %v1188_v25 }
  0x44   : > { %1108 = vmatpush3.bf16.msra.mxu0 %v1188_v25  ;;  %1140 = vmatpush3.bf16.msra.mxu1 %v1188_v25 }
  0x47   : > { %1110 = vmatmul.mubr.bf16.vlgmr.msra.gmra.mrb[0].mxu0 %v1191_v26  ;;  %1118 = vmatmul.mubr.bf16.vlgmr.msra.gmra.mrb[0].mxu1 %v1192_v27 }
  0x48   : > { %1113 = vmatprep.mubr.bf16.mxu0 %v1193_v28  ;;  %1121 = vmatprep.mubr.bf16.mxu1 %v1194_v29 }
  0x4f   : > { %1114 = vmatmul.mubr.bf16.gmra.mrb[4].mxu0 %v1195_v30  ;;  %1122 = vmatmul.mubr.bf16.gmra.mrb[4].mxu1 %v1196_v31 }
 0x11a   : > { %v1111_v32 = vpop.f32.mrb[0].mxu0  ;;  %v1119_v34 = vpop.f32.mrb[0].mxu1 }
 0x11b   : > { %v540_v35 = vpop.f32.mrb[1].mxu0  ;;  %v572_v36 = vpop.f32.mrb[1].mxu1  ;;  %v663_v39 = vadd.f32 %v1111_v32, %v993_v33  ;;  %v671_v40 = vadd.f32 %v1119_v34, %v993_v33 }
 0x11c   : > { %v1112_v37 = vpop.f32.mrb[2].mxu0  ;;  %v1120_v38 = vpop.f32.mrb[2].mxu1  ;;  %v661_v45 = vadd.f32 %v993_v33, %v540_v35  ;;  %v669_v46 = vadd.f32 %v993_v33, %v572_v36 }
 0x11d   : > { %v664_v41 = vadd.f32 %v1112_v37, %v993_v33  ;;  %v672_v42 = vadd.f32 %v1120_v38, %v993_v33  ;;  %v543_v43 = vpop.f32.mrb[3].mxu0  ;;  %v575_v44 = vpop.f32.mrb[3].mxu1 }
 0x11e   : > { %v662_v47 = vadd.f32 %v993_v33, %v543_v43  ;;  %v670_v48 = vadd.f32 %v993_v33, %v575_v44 }
 0x11f   : > { %v1038_v49 = vpack.c.bf16 %v664_v41, %v663_v39  ;;  %v1058_v50 = vpack.c.bf16 %v672_v42, %v671_v40 }
 0x120   : > { %v1033_v51 = vpack.c.bf16 %v662_v47, %v661_v45  ;;  %v1053_v52 = vpack.c.bf16 %v670_v48, %v669_v46 }
 0x121   : > { %1070 = vst [vmem:[%s1369_s7 + $0x8] sm:$0xff] %v1038_v49   ;;  %1074 = vst [vmem:[%s1369_s7 + $0x28] sm:$0xff] %v1058_v50  }
 0x122   : > { %1034 = vst [vmem:[%s1369_s7] sm:$0xff] %v1033_v51   ;;  %1073 = vst [vmem:[%s1369_s7 + $0x20] sm:$0xff] %v1053_v52   ;;  %v1115_v53 = vpop.f32.mrb[4].mxu0  ;;  %v1123_v54 = vpop.f32.mrb[4].mxu1 }
 0x123   : > { %v556_v55 = vpop.f32.mrb[5].mxu0  ;;  %v588_v56 = vpop.f32.mrb[5].mxu1  ;;  %v667_v59 = vadd.f32 %v1115_v53, %v993_v33  ;;  %v675_v60 = vadd.f32 %v1123_v54, %v993_v33 }
 0x124   : > { %v1116_v57 = vpop.f32.mrb[6].mxu0  ;;  %v1124_v58 = vpop.f32.mrb[6].mxu1  ;;  %v665_v1 = vadd.f32 %v993_v33, %v556_v55  ;;  %v673_v2 = vadd.f32 %v993_v33, %v588_v56  ;;  %763 = sbr.rel (!%p1292_p6) target bundleno = 310 (0x136), region = 85 }
 0x125   : > { %v668_v61 = vadd.f32 %v1116_v57, %v993_v33  ;;  %v676_v62 = vadd.f32 %v1124_v58, %v993_v33  ;;  %v559_v63 = vpop.f32.mrb[7].mxu0  ;;  %v591_v0 = vpop.f32.mrb[7].mxu1 }
 0x126   : > { %v666_v3 = vadd.f32 %v993_v33, %v559_v63  ;;  %v674_v4 = vadd.f32 %v993_v33, %v591_v0 }
 0x127   : > { %v1048_v5 = vpack.c.bf16 %v668_v61, %v667_v59  ;;  %v1068_v6 = vpack.c.bf16 %v676_v62, %v675_v60 }
 0x128   : > { %v1043_v7 = vpack.c.bf16 %v666_v3, %v665_v1  ;;  %v1063_v8 = vpack.c.bf16 %v674_v4, %v673_v2  ;;  %v788_v11 = vld [vmem:[%s1369_s7 + $0x8] sm:$0xf] (%p1292_p6)  ;;  %v790_v12 = vld [vmem:[%s1369_s7 + $0xc] sm:$0xf] (%p1292_p6) }
 0x129   : > { %1072 = vst [vmem:[%s1369_s7 + $0x18] sm:$0xff] %v1048_v5   ;;  %1076 = vst [vmem:[%s1369_s7 + $0x38] sm:$0xff] %v1068_v6   ;;  %v784_v9 = vld [vmem:[%s1369_s7] sm:$0xf] (%p1292_p6)  ;;  %v786_v10 = vld [vmem:[%s1369_s7 + $0x4] sm:$0xf] (%p1292_p6) }
 0x12a   : > { %1071 = vst [vmem:[%s1369_s7 + $0x10] sm:$0xff] %v1043_v7   ;;  %1075 = vst [vmem:[%s1369_s7 + $0x30] sm:$0xff] %v1063_v8   ;;  %v800_v17 = vld [vmem:[%s1369_s7 + $0x20] sm:$0xf] (%p1292_p6)  ;;  %v802_v18 = vld [vmem:[%s1369_s7 + $0x24] sm:$0xf] (%p1292_p6) }
 0x12b   : > { %785 = vst [vmem:[%s768_s10] sm:$0xf] %v784_v9  ;;  %787 = vst [vmem:[%s768_s10 + $0xc] sm:$0xf] %v786_v10  ;;  %v804_v19 = vld [vmem:[%s1369_s7 + $0x28] sm:$0xf] }
 0x12c   : > { %789 = vst [vmem:[%s768_s10 + $0x18] sm:$0xf] %v788_v11  ;;  %791 = vst [vmem:[%s768_s10 + $0x24] sm:$0xf] %v790_v12  ;;  %v806_v20 = vld [vmem:[%s1369_s7 + $0x2c] sm:$0xf] }
 0x12d   : > { %801 = vst [vmem:[%s768_s10 + $0x60] sm:$0xf] %v800_v17  ;;  %803 = vst [vmem:[%s768_s10 + $0x6c] sm:$0xf] %v802_v18 }
 0x12e   : > { %805 = vst [vmem:[%s768_s10 + $0x78] sm:$0xf] %v804_v19  ;;  %807 = vst [vmem:[%s768_s10 + $0x84] sm:$0xf] %v806_v20 }
 0x130   : > { %v796_v15 = vld [vmem:[%s1369_s7 + $0x18] sm:$0xf]  ;;  %v798_v16 = vld [vmem:[%s1369_s7 + $0x1c] sm:$0xf] }
 0x131   : > { %v792_v13 = vld [vmem:[%s1369_s7 + $0x10] sm:$0xf]  ;;  %v794_v14 = vld [vmem:[%s1369_s7 + $0x14] sm:$0xf]  ;;  %797 = vst [vmem:[%s768_s10 + $0x48] sm:$0xf] %v796_v15 }
 0x132   : > { %793 = vst [vmem:[%s768_s10 + $0x30] sm:$0xf] %v792_v13  ;;  %795 = vst [vmem:[%s768_s10 + $0x3c] sm:$0xf] %v794_v14  ;;  %v808_v21 = vld [vmem:[%s1369_s7 + $0x30] sm:$0xf] }
 0x133   : > { %799 = vst [vmem:[%s768_s10 + $0x54] sm:$0xf] %v798_v16  ;;  %v810_v22 = vld [vmem:[%s1369_s7 + $0x34] sm:$0xf]  ;;  %809 = vst [vmem:[%s768_s10 + $0x90] sm:$0xf] %v808_v21 }
 0x134   : > { %811 = vst [vmem:[%s768_s10 + $0x9c] sm:$0xf] %v810_v22  ;;  %v812_v23 = vld [vmem:[%s1369_s7 + $0x38] sm:$0xf]  ;;  %v814_v24 = vld [vmem:[%s1369_s7 + $0x3c] sm:$0xf] }
 0x135   : > { %813 = vst [vmem:[%s768_s10 + $0xa8] sm:$0xf] %v812_v23  ;;  %815 = vst [vmem:[%s768_s10 + $0xb4] sm:$0xf] %v814_v24 }
 0x136 PF: > { %s13_s16 = sadd.s32 1, %s1235_s16   ;;  %s1421_s12 = smov %s1223_s13 }
 0x137   : > { %p10_p12 = scmp.ge.s32.totalorder %s13_s16, 5   ;;  %s1422_s13 = smov %s1297_s22 }
 0x138   : > { %s1423_s14 = smov %s1231_s15  ;;  %s1424_s15 = smov %s1426_s17 }
 0x139   :  { %12 = sbr.rel (!%p10_p12) target bundleno = 3 (0x3), region = 163 }

// kernel: transformer_forward.13
= control target key start
LH: loop header
LB: loop body
LE: loop exit
PB: predicated region body
PF: predicated region fallthrough
CT: control target
= control target key end

     0   :  { %s1603_s6 = smov 0   ;;  %s1896_s0 = inlined_call_operand.vmem [shape: bf16[8,16,384], index: 0, kind: input, shape index: {}]   ;;  %s1897_s1 = inlined_call_operand.vmem [shape: bf16[8,16,128], index: 1, kind: output, shape index: {}]  }
   0x1 LB: > { %s1276_s7 = sadd.s32 4294967295, %s1586_s6   ;;  %p1280_p0 = scmp.ge.s32.totalorder %s1586_s6, 1  ;;  %s1586_s6 = sphi %s1603_s6, %s11_s6  }
   0x2   : > { %p89_p1 = scmp.lt.s32.totalorder %s1586_s6, 5 }
   0x4   : > { %p90_p2 = pnand %p1280_p0, %p89_p1 }
   0x5   : > { %s1281_s8 = sshll.u32 (!%p90_p2), %s1276_s7, 1  ;;  %v1588_v0 = vmov (!%p90_p2), 0.0   ;;  %vm1589_vm0 = vmmov (!%p90_p2), 0   ;;  %vm138_vm1 = vcmask (!%p90_p2), 261120   ;;  %vm188_vm2 = vcmask (!%p90_p2), 130048   ;;  %s1590_s13 = smov (!%p90_p2), 96  }
   0x6   : > { %93 = sbr.rel (%p90_p2) target bundleno = 1520 (0x5f0), region = 24  ;;  %1368 = vmatprep.subr.bf16.mxu0 (!%p90_p2), %v1588_v0  ;;  %p112_p3 = scmp.lt.s32.totalorder (!%p90_p2), %s1281_s8, 7  ;;  %1370 = vmatprep.mubr.msk.bf16.mxu0 (!%p90_p2), %vm1589_vm0, %v1588_v0  ;;  %vm657_vm3 = vcmask (!%p90_p2), 523264   ;;  %vm660_vm4 = vcmask (!%p90_p2), 785408  }
   0x7   : > { %1374 = vmatprep.subr.bf16.mxu1 (!%p90_p2), %v1588_v0  ;;  %1376 = vmatprep.mubr.msk.bf16.mxu1 (!%p90_p2), %vm1589_vm0, %v1588_v0  ;;  %s1591_s14 = smov (!%p90_p2), 32   ;;  %s1592_s15 = smov (!%p90_p2), 64  }
   0xd   : > { %s1899_s8 = smov (!%p112_p3, %s1281_s8), 7 }
   0xe   : > { %s1464_s9 = smul.u32 24, %s1899_s8  ;;  %s1320_s16 = sshll.u32 %s1899_s8, 3 }
   0xf   : > { %s123_s19 = scalar_lea.vmem %s1897_s1, %s1320_s16 }
  0x10   : > { %s1623_s12 = scalar_lea.vmem %s1896_s0, %s1464_s9 }
  0x11   : > { %v1508_v1 = vld [vmem:[%s1623_s12 + $0x4] ss:$12 sps:$4 sm:$0xff]   ;;  %v1510_v3 = vld [vmem:[%s1623_s12] ss:$12 sps:$4 sm:$0xff]   ;;  %v1511_v12 = vld [vmem:[%s1623_s12 + $0x1c] ss:$12 sps:$4 sm:$0xff]  }
  0x12   : > { %v143_v2 = vsel %vm138_vm1, %v1508_v1, 0  ;;  %v1643_v23 = vld [vmem:[%s1623_s12 + $0x8] ss:$12 sps:$4 sm:$0xff]   ;;  %v1513_v24 = vld [vmem:[%s1623_s12 + $0x18] ss:$12 sps:$4 sm:$0xff]   ;;  %v690_v41 = vsel %vm138_vm1, %v1511_v12, 0 }
  0x13   : > { %1369 = vmatpush3.bf16.xpose.msra.mxu0 %v143_v2  ;;  %1375 = vmatpush3.bf16.msra.mxu1 %v1643_v23 }
  0x14   : > { %1386 = vmatprep.subr.bf16.mxu0 %v1588_v0  ;;  %1380 = vmatprep.subr.bf16.mxu1 %v1588_v0 }
  0x1a   : > { %1371 = vmatmul.mubr.msk.bf16.vlgmr.msra.gmra.mrb[0].mxu0 %vm138_vm1, %v1510_v3 }
  0x1b   : > { %1388 = vmatprep.mubr.msk.bf16.mxu0 %vm1589_vm0, %v1588_v0 }
  0xed   : > { %v179_v4 = vpop.f32.mrb[0].mxu0 }
  0xee   : > { %v186_v5 = vmul.f32 0.17677669, %v179_v4  ;;  %v1372_v6 = vpop.f32.mrb[1].mxu0 }
  0xef   : > { %v182_v7 = vpop.f32.mrb[2].mxu0 }
  0xf0   : > { %v187_v8 = vmul.f32 0.17677669, %v182_v7  ;;  %v1373_v9 = vpop.f32.mrb[3].mxu0  ;;  %v189_v10 = vsel %vm188_vm2, %v186_v5, -inf }
  0xf1   : > { %190 = vmax.xlane.f32.xlu0 %v189_v10 }
  0xf2   : > { %v192_v11 = vsel %vm188_vm2, %v187_v8, -inf }
  0xf5   : > { %193 = vmax.xlane.f32.xlu0 %v192_v11 }
 0x10b   : > { %264 = vrot.lane.b32.xlu0 %v1508_v1, %s1590_s13 }
 0x10f   : > { %510 = vrot.lane.b32.xlu0 %v1508_v1, %s1591_s14 }
 0x113   : > { %810 = vrot.lane.b32.xlu0 %v1511_v12, %s1590_s13 }
 0x117   : > { %933 = vrot.lane.b32.xlu0 %v1511_v12, %s1592_s15 }
 0x11b   : > { %1056 = vrot.lane.b32.xlu0 %v1511_v12, %s1591_s14 }
 0x17e   : > { %v191_v13 = vpop.xlane.xlu0 %190 }
 0x17f   : > { %v195_v14 = vsub.f32 %v186_v5, %v191_v13 }
 0x181   : > { %v197_v15 = vmul.f32 1.442695, %v195_v14 }
 0x182   : > { %v194_v16 = vpop.xlane.xlu0 %193 }
 0x183   : > { %1516 = vpow2.f32 %v197_v15  ;;  %v196_v17 = vsub.f32 %v187_v8, %v194_v16 }
 0x185   : > { %v199_v18 = vmul.f32 1.442695, %v196_v17 }
 0x186   : > { %v265_v29 = vpop.permute.xlu0 %264 }
 0x187   : > { %1518 = vpow2.f32 %v199_v18  ;;  %v270_v33 = vsel %vm138_vm1, %v265_v29, 0 }
 0x18a   : > { %v511_v37 = vpop.permute.xlu0 %510 }
 0x18b   : > { %v516_v39 = vsel %vm138_vm1, %v511_v37, 0 }
 0x18d   : > { %v1517_v19 = vpop.eup %1516 }
 0x18e   : > { %v201_v20 = vsel %vm188_vm2, %v1517_v19, 0.0  ;;  %v811_v42 = vpop.permute.xlu0 %810 }
 0x18f   : > { %202 = vadd.xlane.f32.xlu1 %v201_v20  ;;  %v816_v43 = vsel %vm138_vm1, %v811_v42, 0 }
 0x191   : > { %v1519_v21 = vpop.eup %1518 }
 0x192   : > { %v204_v22 = vsel %vm188_vm2, %v1519_v21, 0.0  ;;  %v934_v44 = vpop.permute.xlu0 %933 }
 0x193   : > { %205 = vadd.xlane.f32.xlu1 %v204_v22  ;;  %v939_v46 = vsel %vm138_vm1, %v934_v44, 0 }
 0x196   : > { %v1057_v47 = vpop.permute.xlu0 %1056 }
 0x197   : > { %v1062_v49 = vsel %vm138_vm1, %v1057_v47, 0 }
 0x1a4   : > { %262 = vrot.lane.b32.xlu1 %v1510_v3, %s1590_s13 }
 0x1a8   : > { %387 = vrot.lane.b32.xlu1 %v1508_v1, %s1592_s15 }
 0x1ac   : > { %385 = vrot.lane.b32.xlu1 %v1510_v3, %s1592_s15 }
 0x1b0   : > { %508 = vrot.lane.b32.xlu1 %v1510_v3, %s1591_s14 }
 0x1b4   : > { %808 = vrot.lane.b32.xlu1 %v1513_v24, %s1590_s13 }
 0x1b8   : > { %931 = vrot.lane.b32.xlu1 %v1513_v24, %s1592_s15 }
 0x1bc   : > { %1054 = vrot.lane.b32.xlu1 %v1513_v24, %s1591_s14 }
 0x21c   : > { %v203_v25 = vpop.xlane.xlu1 %202 }
 0x21d   : > { %1520 = vrcp.f32 %v203_v25 }
 0x220   : > { %v206_v26 = vpop.xlane.xlu1 %205 }
 0x221   : > { %1522 = vrcp.f32 %v206_v26 }
 0x224   : > { %v263_v32 = vpop.permute.xlu1 %262 }
 0x227   : > { %v1521_v27 = vpop.eup %1520 }
 0x228   : > { %v209_v30 = vmul.f32 %v1521_v27, %v1517_v19  ;;  %v388_v35 = vpop.permute.xlu1 %387 }
 0x229   : > { %v393_v36 = vsel %vm138_vm1, %v388_v35, 0 }
 0x22b   : > { %v1523_v28 = vpop.eup %1522 }
 0x22c   : > { %v210_v31 = vmul.f32 %v1523_v28, %v1519_v21  ;;  %v386_v38 = vpop.permute.xlu1 %385 }
 0x22e   : > { %v211_v34 = vpack.c.bf16 %v210_v31, %v209_v30 }
 0x230   : > { %1377 = vmatmul.mubr.msk.bf16.vlgmr.msra.gmra.mrb[0].mxu1 %vm188_vm2, %v211_v34  ;;  %v509_v40 = vpop.permute.xlu1 %508 }
 0x231   : > { %1381 = vmatpush3.bf16.xpose.msra.mxu1 %v270_v33  ;;  %1382 = vmatprep.mubr.msk.bf16.mxu1 %vm1589_vm0, %v1588_v0 }
 0x232   : > { %1392 = vmatprep.subr.bf16.mxu1 %v1588_v0 }
 0x234   : > { %v809_v45 = vpop.permute.xlu1 %808 }
 0x238   : > { %1383 = vmatmul.mubr.msk.bf16.vlgmr.msra.gmra.mrb[4].mxu1 %vm138_vm1, %v263_v32  ;;  %v932_v48 = vpop.permute.xlu1 %931 }
 0x239   : > { %1393 = vmatpush3.bf16.xpose.msra.mxu1 %v393_v36  ;;  %1394 = vmatprep.mubr.msk.bf16.mxu1 %vm1589_vm0, %v1588_v0 }
 0x23a   : > { %1404 = vmatprep.subr.bf16.mxu1 %v1588_v0 }
 0x23c   : > { %v1055_v50 = vpop.permute.xlu1 %1054 }
 0x240   : > { %1395 = vmatmul.mubr.msk.bf16.vlgmr.msra.gmra.mrb[8].mxu1 %vm138_vm1, %v386_v38 }
 0x241   : > { %1405 = vmatpush3.bf16.xpose.msra.mxu1 %v516_v39  ;;  %1406 = vmatprep.mubr.msk.bf16.mxu1 %vm1589_vm0, %v1588_v0 }
 0x242   : > { %1416 = vmatprep.subr.bf16.mxu1 %v1588_v0 }
 0x248   : > { %1407 = vmatmul.mubr.msk.bf16.vlgmr.msra.gmra.mrb[12].mxu1 %vm138_vm1, %v509_v40 }
 0x249   : > { %1417 = vmatpush3.bf16.xpose.msra.mxu1 %v690_v41  ;;  %1418 = vmatprep.mubr.msk.bf16.mxu1 %vm1589_vm0, %v1588_v0 }
 0x24a   : > { %1428 = vmatprep.subr.bf16.mxu1 %v1588_v0 }
 0x250   : > { %1419 = vmatmul.mubr.msk.bf16.vlgmr.msra.gmra.mrb[16].mxu1 %vm138_vm1, %v1513_v24 }
 0x251   : > { %1429 = vmatpush3.bf16.xpose.msra.mxu1 %v816_v43  ;;  %1430 = vmatprep.mubr.msk.bf16.mxu1 %vm1589_vm0, %v1588_v0 }
 0x252   : > { %1440 = vmatprep.subr.bf16.mxu1 %v1588_v0 }
 0x258   : > { %1431 = vmatmul.mubr.msk.bf16.vlgmr.msra.gmra.mrb[20].mxu1 %vm138_vm1, %v809_v45 }
 0x259   : > { %1441 = vmatpush3.bf16.xpose.msra.mxu1 %v939_v46  ;;  %1442 = vmatprep.mubr.msk.bf16.mxu1 %vm1589_vm0, %v1588_v0 }
 0x25a   : > { %1452 = vmatprep.subr.bf16.mxu1 %v1588_v0 }
 0x260   : > { %1443 = vmatmul.mubr.msk.bf16.vlgmr.msra.gmra.mrb[24].mxu1 %vm138_vm1, %v932_v48 }
 0x261   : > { %1453 = vmatpush3.bf16.xpose.msra.mxu1 %v1062_v49  ;;  %1454 = vmatprep.mubr.msk.bf16.mxu1 %vm1589_vm0, %v1588_v0 }
 0x268   : > { %1455 = vmatmul.mubr.msk.bf16.vlgmr.msra.gmra.mrb[28].mxu1 %vm138_vm1, %v1055_v50 }
 0x303   : > { %v1690_v51 = vpop.f32.mrb[0].mxu1 }
 0x304   : > { %v1378_v52 = vpop.f32.mrb[1].mxu1 }
 0x305   : > { %v1692_v53 = vpop.f32.mrb[2].mxu1 }
 0x306   : > { %v1379_v54 = vpop.f32.mrb[3].mxu1 }
 0x30b   : > { %v306_v55 = vpop.f32.mrb[4].mxu1 }
 0x30c   : > { %v1694_v56 = vmul.f32 0.17677669, %v306_v55  ;;  %v1384_v57 = vpop.f32.mrb[5].mxu1 }
 0x30d   : > { %v309_v58 = vpop.f32.mrb[6].mxu1 }
 0x30e   : > { %v1696_v59 = vmul.f32 0.17677669, %v309_v58  ;;  %v1385_v60 = vpop.f32.mrb[7].mxu1  ;;  %v315_v61 = vsel %vm188_vm2, %v1694_v56, -inf }
 0x30f   : > { %316 = vmax.xlane.f32.xlu0 %v315_v61 }
 0x310   : > { %v318_v62 = vsel %vm188_vm2, %v1696_v59, -inf }
 0x311   : > { %319 = vmax.xlane.f32.xlu1 %v318_v62 }
 0x313   : > { %v429_v63 = vpop.f32.mrb[8].mxu1 }
 0x314   : > { %v1702_v1 = vmul.f32 0.17677669, %v429_v63  ;;  %v1396_v2 = vpop.f32.mrb[9].mxu1 }
 0x315   : > { %v432_v3 = vpop.f32.mrb[10].mxu1 }
 0x316   : > { %v1704_v4 = vmul.f32 0.17677669, %v432_v3  ;;  %v1397_v5 = vpop.f32.mrb[11].mxu1  ;;  %v438_v6 = vsel %vm188_vm2, %v1702_v1, -inf }
 0x317   : > { %439 = vmax.xlane.f32.xlu0 %v438_v6 }
 0x318   : > { %v441_v7 = vsel %vm188_vm2, %v1704_v4, -inf }
 0x31b   : > { %442 = vmax.xlane.f32.xlu0 %v441_v7  ;;  %v552_v8 = vpop.f32.mrb[12].mxu1 }
 0x31c   : > { %v1710_v9 = vmul.f32 0.17677669, %v552_v8  ;;  %v1408_v10 = vpop.f32.mrb[13].mxu1 }
 0x31d   : > { %v555_v11 = vpop.f32.mrb[14].mxu1 }
 0x31e   : > { %v1712_v12 = vmul.f32 0.17677669, %v555_v11  ;;  %v1409_v13 = vpop.f32.mrb[15].mxu1  ;;  %v561_v14 = vsel %vm188_vm2, %v1710_v9, -inf }
 0x31f   : > { %562 = vmax.xlane.f32.xlu0 %v561_v14 }
 0x320   : > { %v564_v15 = vsel %vm188_vm2, %v1712_v12, -inf }
 0x321   : > { %565 = vmax.xlane.f32.xlu1 %v564_v15 }
 0x323   : > { %v726_v16 = vpop.f32.mrb[16].mxu1 }
 0x324   : > { %v1718_v17 = vmul.f32 0.17677669, %v726_v16  ;;  %v1420_v18 = vpop.f32.mrb[17].mxu1 }
 0x325   : > { %v729_v19 = vpop.f32.mrb[18].mxu1 }
 0x326   : > { %v1720_v20 = vmul.f32 0.17677669, %v729_v19  ;;  %v1421_v21 = vpop.f32.mrb[19].mxu1  ;;  %v735_v22 = vsel %vm188_vm2, %v1718_v17, -inf }
 0x327   : > { %736 = vmax.xlane.f32.xlu0 %v735_v22 }
 0x328   : > { %v738_v24 = vsel %vm188_vm2, %v1720_v20, -inf }
 0x329   : > { %739 = vmax.xlane.f32.xlu1 %v738_v24 }
 0x32b   : > { %v852_v25 = vpop.f32.mrb[20].mxu1 }
 0x32c   : > { %v1726_v26 = vmul.f32 0.17677669, %v852_v25  ;;  %v1432_v27 = vpop.f32.mrb[21].mxu1 }
 0x32d   : > { %v855_v28 = vpop.f32.mrb[22].mxu1 }
 0x32e   : > { %v1728_v29 = vmul.f32 0.17677669, %v855_v28  ;;  %v861_v30 = vsel %vm188_vm2, %v1726_v26, -inf  ;;  %v1433_v31 = vpop.f32.mrb[23].mxu1 }
 0x32f   : > { %862 = vmax.xlane.f32.xlu0 %v861_v30 }
 0x330   : > { %v864_v32 = vsel %vm188_vm2, %v1728_v29, -inf }
 0x331   : > { %865 = vmax.xlane.f32.xlu1 %v864_v32 }
 0x333   : > { %v975_v33 = vpop.f32.mrb[24].mxu1 }
 0x334   : > { %v1734_v34 = vmul.f32 0.17677669, %v975_v33  ;;  %v1444_v35 = vpop.f32.mrb[25].mxu1 }
 0x335   : > { %v978_v36 = vpop.f32.mrb[26].mxu1 }
 0x336   : > { %v1736_v37 = vmul.f32 0.17677669, %v978_v36  ;;  %v984_v38 = vsel %vm188_vm2, %v1734_v34, -inf  ;;  %v1445_v39 = vpop.f32.mrb[27].mxu1 }
 0x337   : > { %985 = vmax.xlane.f32.xlu0 %v984_v38 }
 0x338   : > { %v987_v40 = vsel %vm188_vm2, %v1736_v37, -inf }
 0x339   : > { %988 = vmax.xlane.f32.xlu1 %v987_v40 }
 0x33b   : > { %v1098_v41 = vpop.f32.mrb[28].mxu1 }
 0x33c   : > { %v1742_v42 = vmul.f32 0.17677669, %v1098_v41  ;;  %v1456_v43 = vpop.f32.mrb[29].mxu1 }
 0x33d   : > { %v1101_v44 = vpop.f32.mrb[30].mxu1 }
 0x33e   : > { %v1744_v45 = vmul.f32 0.17677669, %v1101_v44  ;;  %v1107_v46 = vsel %vm188_vm2, %v1742_v42, -inf  ;;  %v1457_v47 = vpop.f32.mrb[31].mxu1 }
 0x33f   : > { %1108 = vmax.xlane.f32.xlu0 %v1107_v46 }
 0x340   : > { %v1110_v48 = vsel %vm188_vm2, %v1744_v45, -inf }
 0x341   : > { %1111 = vmax.xlane.f32.xlu1 %v1110_v48 }
 0x352   : > { %461 = vrot.lane.b32.xlu1 %v1643_v23, %s1592_s15 }
 0x355   : > { %338 = vrot.lane.b32.xlu0 %v1643_v23, %s1590_s13 }
 0x39c   : > { %v317_v49 = vpop.xlane.xlu0 %316 }
 0x39d   : > { %v321_v50 = vsub.f32 %v1694_v56, %v317_v49 }
 0x39e   : > { %v320_v52 = vpop.xlane.xlu1 %319 }
 0x39f   : > { %v323_v54 = vmul.f32 1.442695, %v321_v50  ;;  %v322_v55 = vsub.f32 %v1696_v59, %v320_v52 }
 0x3a1   : > { %1524 = vpow2.f32 %v323_v54  ;;  %v325_v57 = vmul.f32 1.442695, %v322_v55 }
 0x3a3   : > { %1526 = vpow2.f32 %v325_v57 }
 0x3a4   : > { %v440_v58 = vpop.xlane.xlu0 %439 }
 0x3a5   : > { %v444_v60 = vsub.f32 %v1702_v1, %v440_v58 }
 0x3a7   : > { %v446_v61 = vmul.f32 1.442695, %v444_v60 }
 0x3a8   : > { %v443_v62 = vpop.xlane.xlu0 %442 }
 0x3a9   : > { %1528 = vpow2.f32 %v446_v61  ;;  %v445_v63 = vsub.f32 %v1704_v4, %v443_v62 }
 0x3ab   : > { %v1758_v2 = vpop.eup %1524  ;;  %v448_v3 = vmul.f32 1.442695, %v445_v63  ;;  %v1515_v63 = vld [vmem:[%s1623_s12 + $0x20] ss:$12 sps:$4 sm:$0xff]  }
 0x3ac   : > { %v563_v5 = vpop.xlane.xlu0 %562  ;;  %v327_v56 = vsel %vm188_vm2, %v1758_v2, 0.0 }
 0x3ad   : > { %v1762_v6 = vpop.eup %1526  ;;  %1530 = vpow2.f32 %v448_v3  ;;  %v567_v59 = vsub.f32 %v1710_v9, %v563_v5  ;;  %328 = vadd.xlane.f32.xlu0 %v327_v56 }
 0x3ae   : > { %v566_v7 = vpop.xlane.xlu1 %565  ;;  %v330_v1 = vsel %vm188_vm2, %v1762_v6, 0.0 }
 0x3af   : > { %v569_v8 = vmul.f32 1.442695, %v567_v59  ;;  %v568_v4 = vsub.f32 %v1712_v12, %v566_v7  ;;  %331 = vadd.xlane.f32.xlu1 %v330_v1 }
 0x3b1   : > { %1532 = vpow2.f32 %v569_v8  ;;  %v571_v10 = vmul.f32 1.442695, %v568_v4 }
 0x3b3   : > { %v1768_v11 = vpop.eup %1528  ;;  %1534 = vpow2.f32 %v571_v10 }
 0x3b4   : > { %v737_v13 = vpop.xlane.xlu0 %736  ;;  %v450_v14 = vsel %vm188_vm2, %v1768_v11, 0.0 }
 0x3b5   : > { %v741_v9 = vsub.f32 %v1718_v17, %v737_v13  ;;  %451 = vadd.xlane.f32.xlu0 %v450_v14 }
 0x3b6   : > { %v740_v15 = vpop.xlane.xlu1 %739 }
 0x3b7   : > { %v1773_v16 = vpop.eup %1530  ;;  %v743_v18 = vmul.f32 1.442695, %v741_v9  ;;  %v742_v19 = vsub.f32 %v1720_v20, %v740_v15 }
 0x3b8   : > { %v453_v12 = vsel %vm188_vm2, %v1773_v16, 0.0 }
 0x3b9   : > { %1536 = vpow2.f32 %v743_v18  ;;  %v745_v21 = vmul.f32 1.442695, %v742_v19  ;;  %454 = vadd.xlane.f32.xlu1 %v453_v12 }
 0x3bb   : > { %v1778_v22 = vpop.eup %1532  ;;  %1538 = vpow2.f32 %v745_v21 }
 0x3bc   : > { %v863_v24 = vpop.xlane.xlu0 %862  ;;  %v573_v17 = vsel %vm188_vm2, %v1778_v22, 0.0 }
 0x3bd   : > { %v1782_v25 = vpop.eup %1534  ;;  %v867_v27 = vsub.f32 %v1726_v26, %v863_v24  ;;  %574 = vadd.xlane.f32.xlu0 %v573_v17 }
 0x3be   : > { %v866_v28 = vpop.xlane.xlu1 %865  ;;  %v576_v20 = vsel %vm188_vm2, %v1782_v25, 0.0 }
 0x3bf   : > { %v869_v30 = vmul.f32 1.442695, %v867_v27  ;;  %v868_v31 = vsub.f32 %v1728_v29, %v866_v28  ;;  %577 = vadd.xlane.f32.xlu1 %v576_v20 }
 0x3c1   : > { %1540 = vpow2.f32 %v869_v30  ;;  %v871_v32 = vmul.f32 1.442695, %v868_v31 }
 0x3c3   : > { %v1788_v33 = vpop.eup %1536  ;;  %1542 = vpow2.f32 %v871_v32 }
 0x3c4   : > { %v747_v35 = vsel %vm188_vm2, %v1788_v33, 0.0  ;;  %v986_v29 = vpop.xlane.xlu0 %985 }
 0x3c5   : > { %v1792_v36 = vpop.eup %1538  ;;  %748 = vadd.xlane.f32.xlu0 %v747_v35  ;;  %v990_v61 = vsub.f32 %v1734_v34, %v986_v29 }
 0x3c6   : > { %v989_v26 = vpop.xlane.xlu1 %988  ;;  %v750_v38 = vsel %vm188_vm2, %v1792_v36, 0.0 }
 0x3c7   : > { %v991_v39 = vsub.f32 %v1736_v37, %v989_v26  ;;  %751 = vadd.xlane.f32.xlu1 %v750_v38  ;;  %v992_v62 = vmul.f32 1.442695, %v990_v61 }
 0x3c9   : > { %v994_v40 = vmul.f32 1.442695, %v991_v39 }
 0x3cb   : > { %v1797_v41 = vpop.eup %1540  ;;  %1544 = vpow2.f32 %v994_v40 }
 0x3cc   : > { %v1109_v43 = vpop.xlane.xlu0 %1108  ;;  %v873_v44 = vsel %vm188_vm2, %v1797_v41, 0.0 }
 0x3cd   : > { %v1801_v46 = vpop.eup %1542  ;;  %v1113_v47 = vsub.f32 %v1742_v42, %v1109_v43  ;;  %874 = vadd.xlane.f32.xlu1 %v873_v44 }
 0x3ce   : > { %v1112_v48 = vpop.xlane.xlu1 %1111  ;;  %v876_v37 = vsel %vm188_vm2, %v1801_v46, 0.0 }
 0x3cf   : > { %v1115_v49 = vmul.f32 1.442695, %v1113_v47  ;;  %v1114_v50 = vsub.f32 %v1744_v45, %v1112_v48 }
 0x3d0   : > { %v339_v52 = vpop.permute.xlu0 %338 }
 0x3d1   : > { %1546 = vpow2.f32 %v1115_v49  ;;  %v1117_v54 = vmul.f32 1.442695, %v1114_v50  ;;  %877 = vadd.xlane.f32.xlu1 %v876_v37  ;;  %1387 = vmatpush3.bf16.msra.mxu0 %v339_v52 }
 0x3d2   : > { %1398 = vmatprep.subr.bf16.mxu0 %v1588_v0  ;;  %v462_v5 = vpop.permute.xlu1 %461 }
 0x3d3   : > { %1548 = vpow2.f32 %v1117_v54 }
 0x3d4   : > { %1550 = vpow2.f32 %v992_v62 }
 0x3d5   : > { %v1808_v55 = vpop.eup %1544 }
 0x3d6   : > { %v999_v42 = vsel %vm188_vm2, %v1808_v55, 0.0 }
 0x3d7   : > { %1000 = vadd.xlane.f32.xlu1 %v999_v42 }
 0x3db   : > { %v1812_v57 = vpop.eup %1546  ;;  %584 = vrot.lane.b32.xlu0 %v1643_v23, %s1591_s14 }
 0x3dc   : > { %v1119_v45 = vsel %vm188_vm2, %v1812_v57, 0.0 }
 0x3dd   : > { %v1818_v58 = vpop.eup %1548  ;;  %1120 = vadd.xlane.f32.xlu1 %v1119_v45 }
 0x3de   : > { %v1122_v60 = vsel %vm188_vm2, %v1818_v58, 0.0  ;;  %v1825_v3 = vpop.eup %1550 }
 0x3df   : > { %v996_v23 = vsel %vm188_vm2, %v1825_v3, 0.0 }
 0x3e1   : > { %1123 = vadd.xlane.f32.xlu1 %v1122_v60 }
 0x3f2   : > { %884 = vrot.lane.b32.xlu1 %v1515_v63, %s1590_s13 }
 0x3fa   : > { %997 = vadd.xlane.f32.xlu0 %v996_v23 }
 0x410   : > { %1007 = vrot.lane.b32.xlu0 %v1515_v63, %s1592_s15 }
 0x414   : > { %1130 = vrot.lane.b32.xlu0 %v1515_v63, %s1591_s14 }
 0x43a   : > { %v329_v56 = vpop.xlane.xlu0 %328 }
 0x43b   : > { %1552 = vrcp.f32 %v329_v56 }
 0x43c   : > { %v332_v59 = vpop.xlane.xlu1 %331 }
 0x43d   : > { %1554 = vrcp.f32 %v332_v59 }
 0x442   : > { %v452_v34 = vpop.xlane.xlu0 %451 }
 0x443   : > { %1556 = vrcp.f32 %v452_v34 }
 0x445   : > { %v1553_v7 = vpop.eup %1552 }
 0x446   : > { %v455_v1 = vpop.xlane.xlu1 %454  ;;  %v335_v4 = vmul.f32 %v1553_v7, %v1758_v2 }
 0x447   : > { %v1555_v8 = vpop.eup %1554  ;;  %1558 = vrcp.f32 %v455_v1 }
 0x448   : > { %v336_v10 = vmul.f32 %v1555_v8, %v1762_v6 }
 0x44a   : > { %v575_v13 = vpop.xlane.xlu0 %574  ;;  %v337_v14 = vpack.c.bf16 %v336_v10, %v335_v4 }
 0x44b   : > { %1560 = vrcp.f32 %v575_v13 }
 0x44c   : > { %v578_v9 = vpop.xlane.xlu1 %577  ;;  %1389 = vmatmul.mubr.msk.bf16.vlgmr.msra.gmra.mrb[4].mxu0 %vm188_vm2, %v337_v14 }
 0x44d   : > { %1562 = vrcp.f32 %v578_v9  ;;  %1399 = vmatpush3.bf16.msra.mxu0 %v462_v5  ;;  %1400 = vmatprep.mubr.msk.bf16.mxu0 %vm1589_vm0, %v1588_v0  ;;  %v1557_v15 = vpop.eup %1556 }
 0x44e   : > { %1410 = vmatprep.subr.bf16.mxu0 %v1588_v0  ;;  %v458_v19 = vmul.f32 %v1557_v15, %v1768_v11 }
 0x451   : > { %v1559_v18 = vpop.eup %1558 }
 0x452   : > { %v459_v2 = vmul.f32 %v1559_v18, %v1773_v16  ;;  %v749_v6 = vpop.xlane.xlu0 %748 }
 0x453   : > { %1564 = vrcp.f32 %v749_v6 }
 0x454   : > { %v752_v12 = vpop.xlane.xlu1 %751  ;;  %v460_v21 = vpack.c.bf16 %v459_v2, %v458_v19 }
 0x455   : > { %1566 = vrcp.f32 %v752_v12  ;;  %v1561_v24 = vpop.eup %1560 }
 0x456   : > { %1401 = vmatmul.mubr.msk.bf16.vlgmr.msra.gmra.mrb[8].mxu0 %vm188_vm2, %v460_v21  ;;  %v585_v17 = vpop.permute.xlu0 %584  ;;  %v581_v11 = vmul.f32 %v1561_v24, %v1778_v22 }
 0x457   : > { %v1563_v27 = vpop.eup %1562  ;;  %1411 = vmatpush3.bf16.msra.mxu0 %v585_v17  ;;  %1412 = vmatprep.mubr.msk.bf16.mxu0 %vm1589_vm0, %v1588_v0 }
 0x458   : > { %v582_v28 = vmul.f32 %v1563_v27, %v1782_v25  ;;  %1422 = vmatprep.subr.bf16.mxu0 %v1588_v0 }
 0x45a   : > { %v875_v16 = vpop.xlane.xlu1 %874  ;;  %v583_v20 = vpack.c.bf16 %v582_v28, %v581_v11 }
 0x45d   : > { %v1565_v30 = vpop.eup %1564 }
 0x45e   : > { %1413 = vmatmul.mubr.msk.bf16.vlgmr.msra.gmra.mrb[12].mxu0 %vm188_vm2, %v583_v20  ;;  %v878_v35 = vpop.xlane.xlu1 %877  ;;  %v755_v25 = vmul.f32 %v1565_v30, %v1788_v33 }
 0x45f   : > { %v1567_v31 = vpop.eup %1566  ;;  %1423 = vmatpush3.bf16.msra.mxu0 %v1515_v63  ;;  %1424 = vmatprep.mubr.msk.bf16.mxu0 %vm1589_vm0, %v1588_v0  ;;  %1568 = vrcp.f32 %v878_v35 }
 0x460   : > { %v756_v32 = vmul.f32 %v1567_v31, %v1792_v36  ;;  %1434 = vmatprep.subr.bf16.mxu0 %v1588_v0  ;;  %1570 = vrcp.f32 %v875_v16 }
 0x462   : > { %v757_v26 = vpack.c.bf16 %v756_v32, %v755_v25 }
 0x464   : > { %v1001_v22 = vpop.xlane.xlu1 %1000 }
 0x465   : > { %1572 = vrcp.f32 %v1001_v22 }
 0x466   : > { %1425 = vmatmul.mubr.msk.bf16.vlgmr.msra.gmra.mrb[16].mxu0 %vm188_vm2, %v757_v26 }
 0x467   : > { %1436 = vmatprep.mubr.msk.bf16.mxu0 %vm1589_vm0, %v1588_v0 }
 0x469   : > { %v1569_v39 = vpop.eup %1568 }
 0x46a   : > { %v1121_v38 = vpop.xlane.xlu1 %1120  ;;  %v1571_v40 = vpop.eup %1570  ;;  %v882_v36 = vmul.f32 %v1569_v39, %v1801_v46 }
 0x46b   : > { %v881_v43 = vmul.f32 %v1571_v40, %v1797_v41 }
 0x46d   : > { %v883_v33 = vpack.c.bf16 %v882_v36, %v881_v43 }
 0x46e   : > { %v1124_v29 = vpop.xlane.xlu1 %1123 }
 0x46f   : > { %v1573_v41 = vpop.eup %1572 }
 0x470   : > { %v1005_v49 = vmul.f32 %v1573_v41, %v1808_v55 }
 0x472   : > { %v885_v44 = vpop.permute.xlu1 %884 }
 0x473   : > { %1435 = vmatpush3.bf16.msra.mxu0 %v885_v44 }
 0x474   : > { %1446 = vmatprep.subr.bf16.mxu0 %v1588_v0 }
 0x476   : > { %1437 = vmatmul.mubr.msk.bf16.vlgmr.msra.gmra.mrb[20].mxu0 %vm188_vm2, %v883_v33 }
 0x477   : > { %1448 = vmatprep.mubr.msk.bf16.mxu0 %vm1589_vm0, %v1588_v0 }
 0x487   : > { %v998_v47 = vpop.xlane.xlu0 %997 }
 0x488   : > { %1574 = vrcp.f32 %v998_v47 }
 0x489   : > { %1576 = vrcp.f32 %v1124_v29 }
 0x48a   : > { %1578 = vrcp.f32 %v1121_v38 }
 0x48b   : > { %v1008_v48 = vpop.permute.xlu0 %1007 }
 0x48c   : > { %1447 = vmatpush3.bf16.msra.mxu0 %v1008_v48 }
 0x48d   : > { %1458 = vmatprep.subr.bf16.mxu0 %v1588_v0 }
 0x48f   : > { %v1131_v37 = vpop.permute.xlu0 %1130 }
 0x492   : > { %v1575_v46 = vpop.eup %1574 }
 0x493   : > { %v1004_v50 = vmul.f32 %v1575_v46, %v1825_v3  ;;  %v1577_v54 = vpop.eup %1576 }
 0x494   : > { %v1579_v42 = vpop.eup %1578  ;;  %v1128_v45 = vmul.f32 %v1577_v54, %v1818_v58 }
 0x495   : > { %v1006_v52 = vpack.c.bf16 %v1005_v49, %v1004_v50  ;;  %v1127_v60 = vmul.f32 %v1579_v42, %v1812_v57 }
 0x497   : > { %1449 = vmatmul.mubr.msk.bf16.vlgmr.msra.gmra.mrb[24].mxu0 %vm188_vm2, %v1006_v52  ;;  %v1129_v61 = vpack.c.bf16 %v1128_v45, %v1127_v60 }
 0x498   : > { %1459 = vmatpush3.bf16.msra.mxu0 %v1131_v37  ;;  %1460 = vmatprep.mubr.msk.bf16.mxu0 %vm1589_vm0, %v1588_v0 }
 0x49f   : > { %1461 = vmatmul.mubr.msk.bf16.vlgmr.msra.gmra.mrb[28].mxu0 %vm188_vm2, %v1129_v61 }
 0x51f   : > { %v378_v55 = vpop.f32.mrb[4].mxu0 }
 0x520   : > { %v1390_v62 = vpop.f32.mrb[5].mxu0 }
 0x521   : > { %v381_v63 = vpop.f32.mrb[6].mxu0 }
 0x522   : > { %v1478_v3 = vpack.i.bf16 %v381_v63, %v378_v55  ;;  %v1391_v23 = vpop.f32.mrb[7].mxu0 }
 0x524   : > { %1479 = vrot.lane.b32.xlu0 %v1478_v3, %s1591_s14 }
 0x529   : > { %v501_v5 = vpop.f32.mrb[8].mxu0 }
 0x52a   : > { %v1402_v56 = vpop.f32.mrb[9].mxu0 }
 0x52b   : > { %v504_v59 = vpop.f32.mrb[10].mxu0 }
 0x52c   : > { %v1483_v34 = vpack.i.bf16 %v504_v59, %v501_v5  ;;  %v1403_v7 = vpop.f32.mrb[11].mxu0 }
 0x52e   : > { %1484 = vrot.lane.b32.xlu1 %v1483_v34, %s1592_s15 }
 0x531   : > { %v624_v0 = vpop.f32.mrb[12].mxu0 }
 0x532   : > { %v1414_v58 = vpop.f32.mrb[13].mxu0 }
 0x533   : > { %v627_v57 = vpop.f32.mrb[14].mxu0 }
 0x534   : > { %v1488_v1 = vpack.i.bf16 %v627_v57, %v624_v0  ;;  %v1415_v8 = vpop.f32.mrb[15].mxu0 }
 0x536   : > { %1489 = vrot.lane.b32.xlu0 %v1488_v1, %s1590_s13 }
 0x539   : > { %v801_v4 = vpop.f32.mrb[16].mxu0 }
 0x53a   : > { %v1426_v10 = vpop.f32.mrb[17].mxu0 }
 0x53b   : > { %v804_v13 = vpop.f32.mrb[18].mxu0 }
 0x53c   : > { %v1427_v14 = vpop.f32.mrb[19].mxu0 }
 0x549   : > { %v924_v9 = vpop.f32.mrb[20].mxu0 }
 0x54a   : > { %v1438_v15 = vpop.f32.mrb[21].mxu0 }
 0x54b   : > { %v927_v18 = vpop.f32.mrb[22].mxu0 }
 0x54c   : > { %v1493_v19 = vpack.i.bf16 %v927_v18, %v924_v9  ;;  %v1439_v2 = vpop.f32.mrb[23].mxu0 }
 0x54e   : > { %1494 = vrot.lane.b32.xlu1 %v1493_v19, %s1591_s14 }
 0x56a   : > { %v1047_v6 = vpop.f32.mrb[24].mxu0 }
 0x56b   : > { %v1450_v12 = vpop.f32.mrb[25].mxu0 }
 0x56c   : > { %v1050_v21 = vpop.f32.mrb[26].mxu0 }
 0x56d   : > { %v1498_v24 = vpack.i.bf16 %v1050_v21, %v1047_v6  ;;  %v1451_v17 = vpop.f32.mrb[27].mxu0 }
 0x56f   : > { %1499 = vrot.lane.b32.xlu0 %v1498_v24, %s1592_s15 }
 0x572   : > { %v1170_v27 = vpop.f32.mrb[28].mxu0 }
 0x573   : > { %v1462_v28 = vpop.f32.mrb[29].mxu0 }
 0x574   : > { %v1173_v11 = vpop.f32.mrb[30].mxu0 }
 0x575   : > { %v1503_v16 = vpack.i.bf16 %v1173_v11, %v1170_v27  ;;  %v1463_v20 = vpop.f32.mrb[31].mxu0 }
 0x577   : > { %1504 = vrot.lane.b32.xlu1 %v1503_v16, %s1590_s13 }
 0x596   : > { %v1480_v30 = vpop.permute.xlu0 %1479 }
 0x597   : > { %v1482_v32 = vunpack.i.h.bf16 %v1480_v30  ;;  %v1481_v35 = vunpack.i.l.bf16 %v1480_v30 }
 0x599   : > { %v656_v38 = vsel %vm138_vm1, %v1692_v53, %v1482_v32  ;;  %v655_v39 = vsel %vm138_vm1, %v1690_v51, %v1481_v35 }
 0x5a0   : > { %v1485_v31 = vpop.permute.xlu1 %1484 }
 0x5a1   : > { %v1487_v25 = vunpack.i.h.bf16 %v1485_v31  ;;  %v1486_v26 = vunpack.i.l.bf16 %v1485_v31 }
 0x5a3   : > { %v659_v36 = vsel %vm657_vm3, %v656_v38, %v1487_v25  ;;  %v658_v43 = vsel %vm657_vm3, %v655_v39, %v1486_v26 }
 0x5a8   : > { %v1490_v22 = vpop.permute.xlu0 %1489 }
 0x5a9   : > { %v1492_v29 = vunpack.i.h.bf16 %v1490_v22  ;;  %v1491_v40 = vunpack.i.l.bf16 %v1490_v22 }
 0x5ab   : > { %v662_v44 = vsel %vm660_vm4, %v659_v36, %v1492_v29  ;;  %v661_v33 = vsel %vm660_vm4, %v658_v43, %v1491_v40 }
 0x5ac   : > { %v1328_v47 = vpack.c.bf16 %v662_v44, %v661_v33 }
 0x5ae   : > { %1329 = vst [vmem:[%s123_s19] sm:$0xff] %v1328_v47  }
 0x5c0   : > { %v1495_v53 = vpop.permute.xlu1 %1494 }
 0x5c1   : > { %v1497_v41 = vunpack.i.h.bf16 %v1495_v53  ;;  %v1496_v51 = vunpack.i.l.bf16 %v1495_v53 }
 0x5c3   : > { %v1202_v37 = vsel %vm138_vm1, %v804_v13, %v1497_v41  ;;  %v1201_v52 = vsel %vm138_vm1, %v801_v4, %v1496_v51 }
 0x5e1   : > { %v1500_v48 = vpop.permute.xlu0 %1499 }
 0x5e2   : > { %v1502_v46 = vunpack.i.h.bf16 %v1500_v48  ;;  %v1501_v49 = vunpack.i.l.bf16 %v1500_v48 }
 0x5e4   : > { %v1204_v45 = vsel %vm657_vm3, %v1202_v37, %v1502_v46  ;;  %v1203_v60 = vsel %vm657_vm3, %v1201_v52, %v1501_v49 }
 0x5e9   : > { %v1505_v50 = vpop.permute.xlu1 %1504 }
 0x5ea   : > { %v1507_v54 = vunpack.i.h.bf16 %v1505_v50  ;;  %v1506_v42 = vunpack.i.l.bf16 %v1505_v50 }
 0x5ec   : > { %v1206_v61 = vsel %vm660_vm4, %v1204_v45, %v1507_v54  ;;  %v1205_v55 = vsel %vm660_vm4, %v1203_v60, %v1506_v42 }
 0x5ed   : > { %v1333_v62 = vpack.c.bf16 %v1206_v61, %v1205_v55 }
 0x5ef   : > { %1335 = vst [vmem:[%s123_s19 + $0x8] sm:$0xff] %v1333_v62  }
 0x5f0 PF: > { %s11_s6 = sadd.s32 1, %s1586_s6  }
 0x5f1   : > { %p8_p4 = scmp.ge.s32.totalorder %s11_s6, 6  }
 0x5f3   :  { %10 = sbr.rel (!%p8_p4) target bundleno = 1 (0x1), region = 56 }

// kernel: transformer_forward.14
= control target key start
LH: loop header
LB: loop body
LE: loop exit
PB: predicated region body
PF: predicated region fallthrough
CT: control target
= control target key end

     0   :  { %s1361_s1 = inlined_call_operand.vmem [shape: bf16[128,128], index: 1, kind: input, shape index: {}]   ;;  %s1362_s0 = inlined_call_operand.vmem [shape: bf16[128,128], index: 0, kind: input, shape index: {}]   ;;  %s1363_s2 = inlined_call_operand.vmem [shape: f32[1,128], index: 2, kind: input, shape index: {}]   ;;  %s1364_s3 = inlined_call_operand.vmem [shape: f32[128,128], index: 3, kind: input, shape index: {}]   ;;  %s1365_s6 = inlined_call_operand.vmem [shape: f32[128,128], index: 6, kind: output, shape index: {0}]   ;;  %s1366_s4 = inlined_call_operand.vmem [shape: f32[1,128], index: 4, kind: input, shape index: {}]   ;;  %s1367_s5 = inlined_call_operand.vmem [shape: f32[1,128], index: 5, kind: input, shape index: {}]   ;;  %s1368_s7 = inlined_call_operand.vmem [shape: bf16[128,128], index: 7, kind: output, shape index: {1}]  }
   0x1   :  { %v882_v0 = vld [vmem:[%s1361_s1] sm:$0xff]   ;;  %v883_v1 = vld [vmem:[%s1361_s1 + $0x8] sm:$0xff]   ;;  %v884_v2 = vld [vmem:[%s1361_s1 + $0x10] sm:$0xff]  }
   0x2   :  { %834 = vmatprep.subr.bf16.mxu0 %v882_v0  ;;  %866 = vmatprep.subr.bf16.mxu1 %v882_v0  ;;  %v885_v3 = vld [vmem:[%s1361_s1 + $0x18] sm:$0xff]   ;;  %v890_v4 = vld [vmem:[%s1362_s0] sm:$0xff]   ;;  %v887_v7 = vld [vmem:[%s1361_s1 + $0x28] sm:$0xff]  }
   0x3   :  { %835 = vmatpush3.bf16.msra.mxu0 %v882_v0  ;;  %874 = vmatpush3.bf16.msra.mxu1 %v882_v0  ;;  %v891_v5 = vld [vmem:[%s1362_s0 + $0x20] sm:$0xff]   ;;  %v888_v8 = vld [vmem:[%s1361_s1 + $0x30] sm:$0xff]   ;;  %v889_v9 = vld [vmem:[%s1361_s1 + $0x38] sm:$0xff]  }
   0x4   :  { %836 = vmatprep.subr.bf16.mxu0 %v883_v1  ;;  %867 = vmatprep.subr.bf16.mxu1 %v883_v1  ;;  %v886_v6 = vld [vmem:[%s1361_s1 + $0x20] sm:$0xff]   ;;  %v892_v10 = vld [vmem:[%s1362_s0 + $0x8] sm:$0xff]   ;;  %v894_v12 = vld [vmem:[%s1362_s0 + $0x10] sm:$0xff]  }
   0x5   :  { %850 = vmatprep.mubr.bf16.mxu0 %v890_v4  ;;  %858 = vmatprep.mubr.bf16.mxu1 %v891_v5  ;;  %v893_v11 = vld [vmem:[%s1362_s0 + $0x28] sm:$0xff]   ;;  %v896_v13 = vld [vmem:[%s1362_s0 + $0x30] sm:$0xff]   ;;  %v895_v14 = vld [vmem:[%s1362_s0 + $0x18] sm:$0xff]  }
   0x6   :  { %v897_v15 = vld [vmem:[%s1362_s0 + $0x38] sm:$0xff]   ;;  %v1021_v16 = vld [vmem:[%s1363_s2] ss:$0 sm:$0xff]  ;;  %v363_v18 = vld [vmem:[%s1364_s3 + $0x10] sm:$0xff] }
   0x7   :  { %837 = vmatpush3.bf16.msra.mxu0 %v883_v1  ;;  %875 = vmatpush3.bf16.msra.mxu1 %v883_v1  ;;  %v371_v20 = vld [vmem:[%s1364_s3 + $0x50] sm:$0xff]  ;;  %v361_v24 = vld [vmem:[%s1364_s3] sm:$0xff]  ;;  %v364_v30 = vld [vmem:[%s1364_s3 + $0x18] sm:$0xff] }
   0x8   :  { %838 = vmatprep.subr.bf16.mxu0 %v884_v2  ;;  %868 = vmatprep.subr.bf16.mxu1 %v884_v2  ;;  %v369_v26 = vld [vmem:[%s1364_s3 + $0x40] sm:$0xff]  ;;  %v372_v32 = vld [vmem:[%s1364_s3 + $0x58] sm:$0xff]  ;;  %v362_v38 = vld [vmem:[%s1364_s3 + $0x8] sm:$0xff] }
   0x9   :  { %v370_v40 = vld [vmem:[%s1364_s3 + $0x48] sm:$0xff]  ;;  %v367_v50 = vld [vmem:[%s1364_s3 + $0x30] sm:$0xff]  ;;  %v365_v55 = vld [vmem:[%s1364_s3 + $0x20] sm:$0xff] }
   0xa   :  { %v375_v52 = vld [vmem:[%s1364_s3 + $0x70] sm:$0xff]  ;;  %v373_v58 = vld [vmem:[%s1364_s3 + $0x60] sm:$0xff]  ;;  %v368_v61 = vld [vmem:[%s1364_s3 + $0x38] sm:$0xff] }
   0xb   :  { %839 = vmatpush3.bf16.msra.mxu0 %v884_v2  ;;  %876 = vmatpush3.bf16.msra.mxu1 %v884_v2  ;;  %v376_v0 = vld [vmem:[%s1364_s3 + $0x78] sm:$0xff]  ;;  %v366_v4 = vld [vmem:[%s1364_s3 + $0x28] sm:$0xff] }
   0xc   :  { %840 = vmatprep.subr.bf16.mxu0 %v885_v3  ;;  %869 = vmatprep.subr.bf16.mxu1 %v885_v3 }
   0xf   :  { %841 = vmatpush3.bf16.msra.mxu0 %v885_v3  ;;  %877 = vmatpush3.bf16.msra.mxu1 %v885_v3 }
  0x10   :  { %842 = vmatprep.subr.bf16.mxu0 %v886_v6  ;;  %870 = vmatprep.subr.bf16.mxu1 %v886_v6 }
  0x13   :  { %843 = vmatpush3.bf16.msra.mxu0 %v886_v6  ;;  %878 = vmatpush3.bf16.msra.mxu1 %v886_v6 }
  0x14   :  { %844 = vmatprep.subr.bf16.mxu0 %v887_v7  ;;  %871 = vmatprep.subr.bf16.mxu1 %v887_v7 }
  0x17   :  { %845 = vmatpush3.bf16.msra.mxu0 %v887_v7  ;;  %879 = vmatpush3.bf16.msra.mxu1 %v887_v7 }
  0x18   :  { %846 = vmatprep.subr.bf16.mxu0 %v888_v8  ;;  %872 = vmatprep.subr.bf16.mxu1 %v888_v8 }
  0x1b   :  { %847 = vmatpush3.bf16.msra.mxu0 %v888_v8  ;;  %880 = vmatpush3.bf16.msra.mxu1 %v888_v8  ;;  %v374_v8 = vld [vmem:[%s1364_s3 + $0x68] sm:$0xff] }
  0x1c   :  { %848 = vmatprep.subr.bf16.mxu0 %v889_v9  ;;  %873 = vmatprep.subr.bf16.mxu1 %v889_v9 }
  0x1f   :  { %849 = vmatpush3.bf16.msra.mxu0 %v889_v9  ;;  %881 = vmatpush3.bf16.msra.mxu1 %v889_v9 }
  0x22   :  { %851 = vmatmul.mubr.bf16.vlgmr.msra.gmra.mrb[0].mxu0 %v892_v10  ;;  %859 = vmatmul.mubr.bf16.vlgmr.msra.gmra.mrb[0].mxu1 %v893_v11 }
  0x23   :  { %854 = vmatprep.mubr.bf16.mxu0 %v894_v12  ;;  %862 = vmatprep.mubr.bf16.mxu1 %v896_v13 }
  0x2a   :  { %855 = vmatmul.mubr.bf16.gmra.mrb[4].mxu0 %v895_v14  ;;  %863 = vmatmul.mubr.bf16.gmra.mrb[4].mxu1 %v897_v15 }
  0xf5   :  { %v852_v17 = vpop.f32.mrb[0].mxu0  ;;  %v860_v19 = vpop.f32.mrb[0].mxu1 }
  0xf6   :  { %v347_v21 = vadd.f32 %v852_v17, %v1021_v16  ;;  %v355_v22 = vadd.f32 %v860_v19, %v1021_v16  ;;  %v224_v23 = vpop.f32.mrb[1].mxu0  ;;  %v256_v25 = vpop.f32.mrb[1].mxu1 }
  0xf7   :  { %v345_v27 = vadd.f32 %v1021_v16, %v224_v23  ;;  %v353_v28 = vadd.f32 %v1021_v16, %v256_v25  ;;  %v853_v29 = vpop.f32.mrb[2].mxu0  ;;  %v861_v31 = vpop.f32.mrb[2].mxu1 }
  0xf8   :  { %v1045_v33 = vadd.f32 %v363_v18, %v347_v21  ;;  %v1047_v34 = vadd.f32 %v371_v20, %v355_v22  ;;  %v348_v35 = vadd.f32 %v853_v29, %v1021_v16  ;;  %v356_v36 = vadd.f32 %v861_v31, %v1021_v16  ;;  %v227_v37 = vpop.f32.mrb[3].mxu0  ;;  %v259_v39 = vpop.f32.mrb[3].mxu1 }
  0xf9   :  { %v1057_v41 = vadd.f32 %v361_v24, %v345_v27  ;;  %v1059_v42 = vadd.f32 %v369_v26, %v353_v28  ;;  %v346_v43 = vadd.f32 %v1021_v16, %v227_v37  ;;  %v354_v44 = vadd.f32 %v1021_v16, %v259_v39 }
  0xfa   :  { %395 = vst [vmem:[%s1365_s6 + $0x10] sm:$0xff] %v1045_v33  ;;  %403 = vst [vmem:[%s1365_s6 + $0x50] sm:$0xff] %v1047_v34  ;;  %v1071_v45 = vadd.f32 %v364_v30, %v348_v35  ;;  %v1073_v46 = vadd.f32 %v372_v32, %v356_v36  ;;  %429 = vadd.xlane.f32.xlu0 %v1047_v34  ;;  %413 = vadd.xlane.f32.xlu1 %v1045_v33 }
  0xfb   :  { %393 = vst [vmem:[%s1365_s6] sm:$0xff] %v1057_v41  ;;  %401 = vst [vmem:[%s1365_s6 + $0x40] sm:$0xff] %v1059_v42  ;;  %v1085_v47 = vadd.f32 %v362_v38, %v346_v43  ;;  %v1087_v48 = vadd.f32 %v370_v40, %v354_v44 }
  0xfc   :  { %396 = vst [vmem:[%s1365_s6 + $0x18] sm:$0xff] %v1071_v45  ;;  %404 = vst [vmem:[%s1365_s6 + $0x58] sm:$0xff] %v1073_v46 }
  0xfd   :  { %394 = vst [vmem:[%s1365_s6 + $0x8] sm:$0xff] %v1085_v47  ;;  %402 = vst [vmem:[%s1365_s6 + $0x48] sm:$0xff] %v1087_v48  ;;  %v856_v49 = vpop.f32.mrb[4].mxu0  ;;  %v864_v51 = vpop.f32.mrb[4].mxu1 }
  0xfe   :  { %409 = vadd.xlane.f32.xlu0 %v1057_v41  ;;  %415 = vadd.xlane.f32.xlu1 %v1071_v45  ;;  %v351_v53 = vadd.f32 %v856_v49, %v1021_v16  ;;  %v240_v54 = vpop.f32.mrb[5].mxu0  ;;  %v359_v56 = vadd.f32 %v864_v51, %v1021_v16  ;;  %v272_v57 = vpop.f32.mrb[5].mxu1 }
  0xff   :  { %v349_v59 = vadd.f32 %v1021_v16, %v240_v54  ;;  %v857_v60 = vpop.f32.mrb[6].mxu0  ;;  %v357_v62 = vadd.f32 %v1021_v16, %v272_v57  ;;  %v865_v63 = vpop.f32.mrb[6].mxu1 }
 0x100   :  { %v1129_v1 = vadd.f32 %v367_v50, %v351_v53  ;;  %v352_v2 = vadd.f32 %v857_v60, %v1021_v16  ;;  %v243_v3 = vpop.f32.mrb[7].mxu0  ;;  %v1135_v5 = vadd.f32 %v375_v52, %v359_v56  ;;  %v360_v6 = vadd.f32 %v865_v63, %v1021_v16  ;;  %v275_v7 = vpop.f32.mrb[7].mxu1 }
 0x101   :  { %v1141_v9 = vadd.f32 %v365_v55, %v349_v59  ;;  %v350_v10 = vadd.f32 %v1021_v16, %v243_v3  ;;  %v1144_v11 = vadd.f32 %v373_v58, %v357_v62  ;;  %v358_v12 = vadd.f32 %v1021_v16, %v275_v7 }
 0x102   :  { %425 = vadd.xlane.f32.xlu0 %v1059_v42  ;;  %431 = vadd.xlane.f32.xlu1 %v1073_v46  ;;  %399 = vst [vmem:[%s1365_s6 + $0x30] sm:$0xff] %v1129_v1  ;;  %v1153_v13 = vadd.f32 %v368_v61, %v352_v2  ;;  %407 = vst [vmem:[%s1365_s6 + $0x70] sm:$0xff] %v1135_v5  ;;  %v1159_v14 = vadd.f32 %v376_v0, %v360_v6 }
 0x103   :  { %397 = vst [vmem:[%s1365_s6 + $0x20] sm:$0xff] %v1141_v9  ;;  %v1165_v15 = vadd.f32 %v366_v4, %v350_v10  ;;  %405 = vst [vmem:[%s1365_s6 + $0x60] sm:$0xff] %v1144_v11  ;;  %v1171_v16 = vadd.f32 %v374_v8, %v358_v12 }
 0x104   :  { %400 = vst [vmem:[%s1365_s6 + $0x38] sm:$0xff] %v1153_v13  ;;  %408 = vst [vmem:[%s1365_s6 + $0x78] sm:$0xff] %v1159_v14 }
 0x105   :  { %398 = vst [vmem:[%s1365_s6 + $0x28] sm:$0xff] %v1165_v15  ;;  %406 = vst [vmem:[%s1365_s6 + $0x68] sm:$0xff] %v1171_v16 }
 0x106   :  { %427 = vadd.xlane.f32.xlu1 %v1087_v48  ;;  %411 = vadd.xlane.f32.xlu0 %v1085_v47 }
 0x10a   :  { %421 = vadd.xlane.f32.xlu0 %v1129_v1  ;;  %423 = vadd.xlane.f32.xlu1 %v1153_v13 }
 0x10e   :  { %417 = vadd.xlane.f32.xlu0 %v1141_v9  ;;  %419 = vadd.xlane.f32.xlu1 %v1165_v15 }
 0x112   :  { %433 = vadd.xlane.f32.xlu0 %v1144_v11  ;;  %435 = vadd.xlane.f32.xlu1 %v1171_v16 }
 0x116   :  { %437 = vadd.xlane.f32.xlu0 %v1135_v5  ;;  %439 = vadd.xlane.f32.xlu1 %v1159_v14 }
 0x187   :  { %v430_v17 = vpop.xlane.xlu0 %429  ;;  %v414_v18 = vpop.xlane.xlu1 %413 }
 0x188   :  { %v452_v19 = vmul.f32 0.0078125, %v430_v17  ;;  %v444_v20 = vmul.f32 0.0078125, %v414_v18 }
 0x18a   :  { %v1200_v21 = vsub.f32 %v1045_v33, %v444_v20  ;;  %v1203_v24 = vsub.f32 %v1047_v34, %v452_v19 }
 0x18b   :  { %v410_v22 = vpop.xlane.xlu0 %409  ;;  %v416_v23 = vpop.xlane.xlu1 %415 }
 0x18c   :  { %v442_v25 = vmul.f32 0.0078125, %v410_v22  ;;  %v445_v26 = vmul.f32 0.0078125, %v416_v23  ;;  %v476_v27 = vmul.f32 %v1200_v21, %v1200_v21  ;;  %v484_v34 = vmul.f32 %v1203_v24, %v1203_v24 }
 0x18e   :  { %v1208_v28 = vsub.f32 %v1071_v45, %v445_v26  ;;  %494 = vadd.xlane.f32.xlu0 %v476_v27  ;;  %v1211_v29 = vsub.f32 %v1057_v41, %v442_v25 }
 0x18f   :  { %v426_v30 = vpop.xlane.xlu0 %425  ;;  %v432_v31 = vpop.xlane.xlu1 %431 }
 0x190   :  { %v450_v32 = vmul.f32 0.0078125, %v426_v30  ;;  %v453_v33 = vmul.f32 0.0078125, %v432_v31  ;;  %v477_v35 = vmul.f32 %v1208_v28, %v1208_v28  ;;  %v474_v39 = vmul.f32 %v1211_v29, %v1211_v29 }
 0x192   :  { %v1218_v36 = vsub.f32 %v1073_v46, %v453_v33  ;;  %510 = vadd.xlane.f32.xlu0 %v484_v34  ;;  %496 = vadd.xlane.f32.xlu1 %v477_v35  ;;  %v1223_v40 = vsub.f32 %v1059_v42, %v450_v32 }
 0x193   :  { %v428_v37 = vpop.xlane.xlu1 %427  ;;  %v412_v38 = vpop.xlane.xlu0 %411 }
 0x194   :  { %v451_v41 = vmul.f32 0.0078125, %v428_v37  ;;  %v443_v43 = vmul.f32 0.0078125, %v412_v38  ;;  %v485_v44 = vmul.f32 %v1218_v36, %v1218_v36  ;;  %v482_v42 = vmul.f32 %v1223_v40, %v1223_v40 }
 0x196   :  { %v1228_v45 = vsub.f32 %v1085_v47, %v443_v43  ;;  %490 = vadd.xlane.f32.xlu0 %v474_v39  ;;  %512 = vadd.xlane.f32.xlu1 %v485_v44  ;;  %v1231_v46 = vsub.f32 %v1087_v48, %v451_v41 }
 0x197   :  { %v422_v49 = vpop.xlane.xlu0 %421  ;;  %v424_v50 = vpop.xlane.xlu1 %423 }
 0x198   :  { %v448_v51 = vmul.f32 0.0078125, %v422_v49  ;;  %v449_v52 = vmul.f32 0.0078125, %v424_v50  ;;  %v475_v53 = vmul.f32 %v1228_v45, %v1228_v45  ;;  %v483_v48 = vmul.f32 %v1231_v46, %v1231_v46 }
 0x19a   :  { %v1238_v54 = vsub.f32 %v1129_v1, %v448_v51  ;;  %506 = vadd.xlane.f32.xlu0 %v482_v42  ;;  %492 = vadd.xlane.f32.xlu1 %v475_v53  ;;  %v1243_v56 = vsub.f32 %v1153_v13, %v449_v52  ;;  %v1283_v42 = vld [vmem:[%s1366_s4] ss:$0 sm:$0xff] }
 0x19b   :  { %v418_v47 = vpop.xlane.xlu0 %417  ;;  %v420_v55 = vpop.xlane.xlu1 %419 }
 0x19c   :  { %v446_v57 = vmul.f32 0.0078125, %v418_v47  ;;  %v447_v58 = vmul.f32 0.0078125, %v420_v55  ;;  %v480_v59 = vmul.f32 %v1238_v54, %v1238_v54  ;;  %v481_v3 = vmul.f32 %v1243_v56, %v1243_v56 }
 0x19e   :  { %v1248_v60 = vsub.f32 %v1141_v9, %v446_v57  ;;  %502 = vadd.xlane.f32.xlu0 %v480_v59  ;;  %508 = vadd.xlane.f32.xlu1 %v483_v48  ;;  %v1251_v61 = vsub.f32 %v1165_v15, %v447_v58 }
 0x19f   :  { %v434_v62 = vpop.xlane.xlu0 %433  ;;  %v436_v63 = vpop.xlane.xlu1 %435 }
 0x1a0   :  { %v454_v0 = vmul.f32 0.0078125, %v434_v62  ;;  %v455_v1 = vmul.f32 0.0078125, %v436_v63  ;;  %v478_v2 = vmul.f32 %v1248_v60, %v1248_v60  ;;  %v479_v8 = vmul.f32 %v1251_v61, %v1251_v61 }
 0x1a2   :  { %v1258_v4 = vsub.f32 %v1144_v11, %v454_v0  ;;  %498 = vadd.xlane.f32.xlu0 %v478_v2  ;;  %504 = vadd.xlane.f32.xlu1 %v481_v3  ;;  %v1263_v9 = vsub.f32 %v1171_v16, %v455_v1  ;;  %v1290_v0 = vld [vmem:[%s1367_s5] ss:$0 sm:$0xff] }
 0x1a3   :  { %v438_v6 = vpop.xlane.xlu0 %437  ;;  %v440_v7 = vpop.xlane.xlu1 %439 }
 0x1a4   :  { %v456_v10 = vmul.f32 0.0078125, %v438_v6  ;;  %v457_v12 = vmul.f32 0.0078125, %v440_v7  ;;  %v486_v13 = vmul.f32 %v1258_v4, %v1258_v4  ;;  %v487_v16 = vmul.f32 %v1263_v9, %v1263_v9 }
 0x1a6   :  { %v1268_v15 = vsub.f32 %v1135_v5, %v456_v10  ;;  %514 = vadd.xlane.f32.xlu0 %v486_v13  ;;  %500 = vadd.xlane.f32.xlu1 %v479_v8  ;;  %v1271_v11 = vsub.f32 %v1159_v14, %v457_v12 }
 0x1a8   :  { %v488_v17 = vmul.f32 %v1268_v15, %v1268_v15  ;;  %v489_v18 = vmul.f32 %v1271_v11, %v1271_v11 }
 0x1aa   :  { %518 = vadd.xlane.f32.xlu0 %v488_v17  ;;  %516 = vadd.xlane.f32.xlu1 %v487_v16 }
 0x1ae   :  { %520 = vadd.xlane.f32.xlu1 %v489_v18 }
 0x21b   :  { %v495_v19 = vpop.xlane.xlu0 %494 }
 0x21c   :  { %v524_v5 = vmul.f32 0.0078125, %v495_v19 }
 0x21e   :  { %v540_v20 = vadd.f32 1e-05, %v524_v5 }
 0x21f   :  { %v511_v22 = vpop.xlane.xlu0 %510  ;;  %v497_v23 = vpop.xlane.xlu1 %496 }
 0x220   :  { %898 = vrsqrt.f32 %v540_v20  ;;  %v532_v14 = vmul.f32 0.0078125, %v511_v22  ;;  %v525_v25 = vmul.f32 0.0078125, %v497_v23 }
 0x222   :  { %v548_v26 = vadd.f32 1e-05, %v532_v14  ;;  %v541_v27 = vadd.f32 1e-05, %v525_v25 }
 0x223   :  { %v491_v30 = vpop.xlane.xlu0 %490  ;;  %v513_v31 = vpop.xlane.xlu1 %512 }
 0x224   :  { %900 = vrsqrt.f32 %v548_v26  ;;  %v522_v32 = vmul.f32 0.0078125, %v491_v30  ;;  %v533_v33 = vmul.f32 0.0078125, %v513_v31 }
 0x225   :  { %902 = vrsqrt.f32 %v541_v27 }
 0x226   :  { %v538_v34 = vadd.f32 1e-05, %v522_v32  ;;  %v549_v35 = vadd.f32 1e-05, %v533_v33 }
 0x227   :  { %v507_v37 = vpop.xlane.xlu0 %506  ;;  %v493_v38 = vpop.xlane.xlu1 %492 }
 0x228   :  { %904 = vrsqrt.f32 %v538_v34  ;;  %v530_v39 = vmul.f32 0.0078125, %v507_v37  ;;  %v523_v41 = vmul.f32 0.0078125, %v493_v38 }
 0x229   :  { %906 = vrsqrt.f32 %v549_v35 }
 0x22a   :  { %v899_v43 = vpop.eup %898  ;;  %v546_v44 = vadd.f32 1e-05, %v530_v39  ;;  %v539_v49 = vadd.f32 1e-05, %v523_v41 }
 0x22b   :  { %v572_v50 = vmul.f32 %v899_v43, %v1200_v21  ;;  %v503_v51 = vpop.xlane.xlu0 %502  ;;  %v509_v52 = vpop.xlane.xlu1 %508 }
 0x22c   :  { %908 = vrsqrt.f32 %v546_v44  ;;  %v528_v53 = vmul.f32 0.0078125, %v503_v51  ;;  %v531_v47 = vmul.f32 0.0078125, %v509_v52 }
 0x22d   :  { %910 = vrsqrt.f32 %v539_v49  ;;  %v595_v59 = vmul.f32 %v1283_v42, %v572_v50 }
 0x22e   :  { %v901_v55 = vpop.eup %900  ;;  %v544_v48 = vadd.f32 1e-05, %v528_v53  ;;  %v547_v57 = vadd.f32 1e-05, %v531_v47 }
 0x22f   :  { %v903_v58 = vpop.eup %902  ;;  %v580_v62 = vmul.f32 %v901_v55, %v1203_v24  ;;  %v499_v21 = vpop.xlane.xlu0 %498  ;;  %v618_v24 = vadd.f32 %v1290_v0, %v595_v59 }
 0x230   :  { %v505_v63 = vpop.xlane.xlu1 %504  ;;  %v573_v1 = vmul.f32 %v903_v58, %v1208_v28  ;;  %912 = vrsqrt.f32 %v544_v48  ;;  %v526_v2 = vmul.f32 0.0078125, %v499_v21 }
 0x231   :  { %v529_v3 = vmul.f32 0.0078125, %v505_v63  ;;  %914 = vrsqrt.f32 %v547_v57  ;;  %v603_v13 = vmul.f32 %v1283_v42, %v580_v62 }
 0x232   :  { %v905_v6 = vpop.eup %904  ;;  %v596_v7 = vmul.f32 %v1283_v42, %v573_v1  ;;  %v542_v8 = vadd.f32 1e-05, %v526_v2 }
 0x233   :  { %v545_v10 = vadd.f32 1e-05, %v529_v3  ;;  %v907_v12 = vpop.eup %906  ;;  %v570_v17 = vmul.f32 %v905_v6, %v1211_v29  ;;  %v515_v16 = vpop.xlane.xlu0 %514  ;;  %v626_v27 = vadd.f32 %v1290_v0, %v603_v13 }
 0x234   :  { %v501_v18 = vpop.xlane.xlu1 %500  ;;  %v619_v28 = vadd.f32 %v1290_v0, %v596_v7  ;;  %v581_v19 = vmul.f32 %v907_v12, %v1218_v36  ;;  %916 = vrsqrt.f32 %v542_v8  ;;  %v534_v5 = vmul.f32 0.0078125, %v515_v16 }
 0x235   :  { %918 = vrsqrt.f32 %v545_v10  ;;  %v527_v20 = vmul.f32 0.0078125, %v501_v18  ;;  %v593_v29 = vmul.f32 %v1283_v42, %v570_v17 }
 0x236   :  { %v909_v22 = vpop.eup %908  ;;  %v779_v23 = vpack.c.bf16 %v619_v28, %v618_v24  ;;  %v604_v14 = vmul.f32 %v1283_v42, %v581_v19  ;;  %v550_v25 = vadd.f32 1e-05, %v534_v5 }
 0x237   :  { %v911_v26 = vpop.eup %910  ;;  %v578_v30 = vmul.f32 %v909_v22, %v1223_v40  ;;  %v543_v31 = vadd.f32 1e-05, %v527_v20  ;;  %v519_v32 = vpop.xlane.xlu0 %518  ;;  %v616_v44 = vadd.f32 %v1290_v0, %v593_v29 }
 0x238   :  { %v517_v33 = vpop.xlane.xlu1 %516  ;;  %811 = vst [vmem:[%s1368_s7 + $0x8] sm:$0xff] %v779_v23   ;;  %v627_v36 = vadd.f32 %v1290_v0, %v604_v14  ;;  %v571_v34 = vmul.f32 %v911_v26, %v1228_v45  ;;  %920 = vrsqrt.f32 %v550_v25  ;;  %v536_v35 = vmul.f32 0.0078125, %v519_v32 }
 0x239   :  { %922 = vrsqrt.f32 %v543_v31  ;;  %v535_v37 = vmul.f32 0.0078125, %v517_v33  ;;  %v601_v49 = vmul.f32 %v1283_v42, %v578_v30 }
 0x23a   :  { %v913_v38 = vpop.eup %912  ;;  %v799_v39 = vpack.c.bf16 %v627_v36, %v626_v27  ;;  %v594_v41 = vmul.f32 %v1283_v42, %v571_v34  ;;  %v552_v40 = vadd.f32 1e-05, %v536_v35 }
 0x23b   :  { %v915_v43 = vpop.eup %914  ;;  %v576_v50 = vmul.f32 %v913_v38, %v1238_v54  ;;  %v551_v51 = vadd.f32 1e-05, %v535_v37  ;;  %v624_v54 = vadd.f32 %v1290_v0, %v601_v49 }
 0x23c   :  { %v521_v52 = vpop.xlane.xlu1 %520  ;;  %815 = vst [vmem:[%s1368_s7 + $0x28] sm:$0xff] %v799_v39   ;;  %v617_v45 = vadd.f32 %v1290_v0, %v594_v41  ;;  %v579_v53 = vmul.f32 %v915_v43, %v1231_v46  ;;  %924 = vrsqrt.f32 %v552_v40 }
 0x23d   :  { %v537_v47 = vmul.f32 0.0078125, %v521_v52  ;;  %926 = vrsqrt.f32 %v551_v51  ;;  %v599_v62 = vmul.f32 %v1283_v42, %v576_v50 }
 0x23e   :  { %v917_v55 = vpop.eup %916  ;;  %v774_v48 = vpack.c.bf16 %v617_v45, %v616_v44  ;;  %v602_v57 = vmul.f32 %v1283_v42, %v579_v53 }
 0x23f   :  { %v553_v58 = vadd.f32 1e-05, %v537_v47  ;;  %v919_v59 = vpop.eup %918  ;;  %v574_v46 = vmul.f32 %v917_v55, %v1248_v60  ;;  %v622_v7 = vadd.f32 %v1290_v0, %v599_v62 }
 0x240   :  { %775 = vst [vmem:[%s1368_s7] sm:$0xff] %v774_v48   ;;  %v625_v21 = vadd.f32 %v1290_v0, %v602_v57  ;;  %v577_v63 = vmul.f32 %v919_v59, %v1243_v56 }
 0x241   :  { %928 = vrsqrt.f32 %v553_v58  ;;  %v597_v8 = vmul.f32 %v1283_v42, %v574_v46 }
 0x242   :  { %v921_v1 = vpop.eup %920  ;;  %v794_v2 = vpack.c.bf16 %v625_v21, %v624_v54  ;;  %v600_v3 = vmul.f32 %v1283_v42, %v577_v63 }
 0x243   :  { %v923_v6 = vpop.eup %922  ;;  %v582_v60 = vmul.f32 %v921_v1, %v1258_v4  ;;  %v620_v18 = vadd.f32 %v1290_v0, %v597_v8 }
 0x244   :  { %814 = vst [vmem:[%s1368_s7 + $0x20] sm:$0xff] %v794_v2   ;;  %v623_v10 = vadd.f32 %v1290_v0, %v600_v3  ;;  %v575_v56 = vmul.f32 %v923_v6, %v1251_v61 }
 0x245   :  { %v605_v28 = vmul.f32 %v1283_v42, %v582_v60 }
 0x246   :  { %v925_v12 = vpop.eup %924  ;;  %v789_v24 = vpack.c.bf16 %v623_v10, %v622_v7  ;;  %v598_v13 = vmul.f32 %v1283_v42, %v575_v56 }
 0x247   :  { %v927_v17 = vpop.eup %926  ;;  %v584_v16 = vmul.f32 %v925_v12, %v1268_v15  ;;  %v628_v23 = vadd.f32 %v1290_v0, %v605_v28 }
 0x248   :  { %813 = vst [vmem:[%s1368_s7 + $0x18] sm:$0xff] %v789_v24   ;;  %v621_v19 = vadd.f32 %v1290_v0, %v598_v13  ;;  %v583_v4 = vmul.f32 %v927_v17, %v1263_v9 }
 0x249   :  { %v607_v22 = vmul.f32 %v1283_v42, %v584_v16 }
 0x24a   :  { %v784_v5 = vpack.c.bf16 %v621_v19, %v620_v18  ;;  %v606_v20 = vmul.f32 %v1283_v42, %v583_v4 }
 0x24b   :  { %v929_v61 = vpop.eup %928  ;;  %v630_v9 = vadd.f32 %v1290_v0, %v607_v22 }
 0x24c   :  { %v585_v15 = vmul.f32 %v929_v61, %v1271_v11  ;;  %812 = vst [vmem:[%s1368_s7 + $0x10] sm:$0xff] %v784_v5   ;;  %v629_v14 = vadd.f32 %v1290_v0, %v606_v20 }
 0x24e   :  { %v608_v25 = vmul.f32 %v1283_v42, %v585_v15  ;;  %v804_v26 = vpack.c.bf16 %v629_v14, %v628_v23 }
 0x250   :  { %v631_v27 = vadd.f32 %v1290_v0, %v608_v25  ;;  %816 = vst [vmem:[%s1368_s7 + $0x30] sm:$0xff] %v804_v26  }
 0x252   :  { %v809_v11 = vpack.c.bf16 %v631_v27, %v630_v9 }
 0x254   :  { %817 = vst [vmem:[%s1368_s7 + $0x38] sm:$0xff] %v809_v11  }

// kernel: transformer_forward.15
= control target key start
LH: loop header
LB: loop body
LE: loop exit
PB: predicated region body
PF: predicated region fallthrough
CT: control target
= control target key end

     0   :  { %v2003_v1 = vmov 0   ;;  %v826_v41 = vlaneseq  ;;  %s2716_s1 = inlined_call_operand.vmem [shape: bf16[128,512], index: 1, kind: input, shape index: {}]   ;;  %s2717_s0 = inlined_call_operand.vmem [shape: bf16[128,128], index: 0, kind: input, shape index: {}]   ;;  %s2718_s2 = inlined_call_operand.vmem [shape: f32[1,512], index: 2, kind: input, shape index: {}]   ;;  %s2719_s3 = inlined_call_operand.vmem [shape: bf16[128,512], index: 3, kind: output, shape index: {}]  }
   0x1   :  { %v1691_v0 = vld [vmem:[%s2716_s1 + $0x4] ss:$16 sps:$4 sm:$0xff]   ;;  %435 = vmatprep.mubr.bf16.mxu0 %v2003_v1  ;;  %548 = vmatprep.mubr.bf16.mxu1 %v2003_v1  ;;  %v1693_v2 = vld [vmem:[%s2716_s1 + $0xc] ss:$16 sps:$4 sm:$0xff]   ;;  %v1695_v3 = vld [vmem:[%s2716_s1] ss:$16 sps:$4 sm:$0xff]  }
   0x2   :  { %403 = vmatprep.subr.bf16.mxu0 %v1691_v0  ;;  %v1696_v4 = vld [vmem:[%s2716_s1 + $0x8] ss:$16 sps:$4 sm:$0xff]   ;;  %516 = vmatprep.subr.bf16.mxu1 %v1693_v2  ;;  %v1697_v5 = vld [vmem:[%s2716_s1 + $0x24] ss:$16 sps:$4 sm:$0xff]   ;;  %v1699_v6 = vld [vmem:[%s2716_s1 + $0x2c] ss:$16 sps:$4 sm:$0xff]  }
   0x3   :  { %404 = vmatpush1.bf16.msra.mxu0 %v1695_v3  ;;  %517 = vmatpush1.bf16.msra.mxu1 %v1696_v4  ;;  %v1701_v7 = vld [vmem:[%s2716_s1 + $0x20] ss:$16 sps:$4 sm:$0xff]   ;;  %v1702_v8 = vld [vmem:[%s2716_s1 + $0x28] ss:$16 sps:$4 sm:$0xff]   ;;  %v1703_v9 = vld [vmem:[%s2716_s1 + $0x44] ss:$16 sps:$4 sm:$0xff]  }
   0x4   :  { %405 = vmatprep.subr.bf16.mxu0 %v1697_v5  ;;  %518 = vmatprep.subr.bf16.mxu1 %v1699_v6  ;;  %v1705_v10 = vld [vmem:[%s2716_s1 + $0x4c] ss:$16 sps:$4 sm:$0xff]   ;;  %v1707_v11 = vld [vmem:[%s2716_s1 + $0x40] ss:$16 sps:$4 sm:$0xff]   ;;  %v1708_v12 = vld [vmem:[%s2716_s1 + $0x48] ss:$16 sps:$4 sm:$0xff]  }
   0x5   :  { %v1709_v13 = vld [vmem:[%s2716_s1 + $0x64] ss:$16 sps:$4 sm:$0xff]   ;;  %v1711_v14 = vld [vmem:[%s2716_s1 + $0x6c] ss:$16 sps:$4 sm:$0xff]   ;;  %v1713_v15 = vld [vmem:[%s2716_s1 + $0x60] ss:$16 sps:$4 sm:$0xff]  }
   0x6   :  { %v1714_v16 = vld [vmem:[%s2716_s1 + $0x68] ss:$16 sps:$4 sm:$0xff]   ;;  %v1715_v17 = vld [vmem:[%s2716_s1 + $0x84] ss:$16 sps:$4 sm:$0xff]   ;;  %v1717_v18 = vld [vmem:[%s2716_s1 + $0x8c] ss:$16 sps:$4 sm:$0xff]  }
   0x7   :  { %406 = vmatpush1.bf16.msra.mxu0 %v1701_v7  ;;  %519 = vmatpush1.bf16.msra.mxu1 %v1702_v8  ;;  %v1719_v19 = vld [vmem:[%s2716_s1 + $0x80] ss:$16 sps:$4 sm:$0xff]   ;;  %v1720_v20 = vld [vmem:[%s2716_s1 + $0x88] ss:$16 sps:$4 sm:$0xff]   ;;  %v1721_v21 = vld [vmem:[%s2716_s1 + $0xa4] ss:$16 sps:$4 sm:$0xff]  }
   0x8   :  { %407 = vmatprep.subr.bf16.mxu0 %v1703_v9  ;;  %520 = vmatprep.subr.bf16.mxu1 %v1705_v10  ;;  %v1723_v22 = vld [vmem:[%s2716_s1 + $0xac] ss:$16 sps:$4 sm:$0xff]   ;;  %v1725_v23 = vld [vmem:[%s2716_s1 + $0xa0] ss:$16 sps:$4 sm:$0xff]   ;;  %v1726_v24 = vld [vmem:[%s2716_s1 + $0xa8] ss:$16 sps:$4 sm:$0xff]  }
   0x9   :  { %v1727_v25 = vld [vmem:[%s2716_s1 + $0xc4] ss:$16 sps:$4 sm:$0xff]   ;;  %v1729_v26 = vld [vmem:[%s2716_s1 + $0xcc] ss:$16 sps:$4 sm:$0xff]   ;;  %v1731_v27 = vld [vmem:[%s2716_s1 + $0xc0] ss:$16 sps:$4 sm:$0xff]  }
   0xa   :  { %v1732_v28 = vld [vmem:[%s2716_s1 + $0xc8] ss:$16 sps:$4 sm:$0xff]   ;;  %v1733_v29 = vld [vmem:[%s2716_s1 + $0xe4] ss:$16 sps:$4 sm:$0xff]   ;;  %v1735_v30 = vld [vmem:[%s2716_s1 + $0xec] ss:$16 sps:$4 sm:$0xff]  }
   0xb   :  { %408 = vmatpush1.bf16.msra.mxu0 %v1707_v11  ;;  %521 = vmatpush1.bf16.msra.mxu1 %v1708_v12  ;;  %v1737_v31 = vld [vmem:[%s2716_s1 + $0xe0] ss:$16 sps:$4 sm:$0xff]   ;;  %v1738_v32 = vld [vmem:[%s2716_s1 + $0xe8] ss:$16 sps:$4 sm:$0xff]   ;;  %v827_v42 = vshrl.u32 %v826_v41, 7 }
   0xc   :  { %409 = vmatprep.subr.bf16.mxu0 %v1709_v13  ;;  %522 = vmatprep.subr.bf16.mxu1 %v1711_v14  ;;  %v1739_v33 = vld [vmem:[%s2717_s0] sm:$0xff]   ;;  %v1740_v34 = vld [vmem:[%s2717_s0 + $0x8] sm:$0xff]   ;;  %v1741_v35 = vld [vmem:[%s2717_s0 + $0x10] sm:$0xff]  }
   0xd   :  { %v1742_v36 = vld [vmem:[%s2717_s0 + $0x18] sm:$0xff]   ;;  %v1743_v37 = vld [vmem:[%s2717_s0 + $0x20] sm:$0xff]   ;;  %v1744_v38 = vld [vmem:[%s2717_s0 + $0x28] sm:$0xff]   ;;  %v828_v43 = vsub.s32 0, %v827_v42  ;;  %v836_v44 = vsub.s32 2, %v827_v42  ;;  %v832_v46 = vsub.s32 1, %v827_v42 }
   0xe   :  { %v1745_v39 = vld [vmem:[%s2717_s0 + $0x30] sm:$0xff]   ;;  %v1746_v40 = vld [vmem:[%s2717_s0 + $0x38] sm:$0xff]   ;;  %v824_v45 = vld [vmem:[%s2718_s2] sm:$0xf]  ;;  %v840_v47 = vsub.s32 3, %v827_v42 }
   0xf   :  { %410 = vmatpush1.bf16.msra.mxu0 %v1713_v15  ;;  %523 = vmatpush1.bf16.msra.mxu1 %v1714_v16  ;;  %v2163_v48 = vrot.slane %v824_v45, %v828_v43  ;;  %v2165_v49 = vrot.slane %v824_v45, %v836_v44  ;;  %v2167_v50 = vrot.slane %v824_v45, %v832_v46 }
  0x10   :  { %411 = vmatprep.subr.bf16.mxu0 %v1715_v17  ;;  %524 = vmatprep.subr.bf16.mxu1 %v1717_v18  ;;  %v2169_v51 = vrot.slane %v824_v45, %v840_v47 }
  0x13   :  { %412 = vmatpush1.bf16.msra.mxu0 %v1719_v19  ;;  %525 = vmatpush1.bf16.msra.mxu1 %v1720_v20 }
  0x14   :  { %413 = vmatprep.subr.bf16.mxu0 %v1721_v21  ;;  %526 = vmatprep.subr.bf16.mxu1 %v1723_v22 }
  0x17   :  { %414 = vmatpush1.bf16.msra.mxu0 %v1725_v23  ;;  %527 = vmatpush1.bf16.msra.mxu1 %v1726_v24 }
  0x18   :  { %415 = vmatprep.subr.bf16.mxu0 %v1727_v25  ;;  %528 = vmatprep.subr.bf16.mxu1 %v1729_v26 }
  0x1b   :  { %416 = vmatpush1.bf16.msra.mxu0 %v1731_v27  ;;  %529 = vmatpush1.bf16.msra.mxu1 %v1732_v28 }
  0x1c   :  { %417 = vmatprep.subr.bf16.mxu0 %v1733_v29  ;;  %530 = vmatprep.subr.bf16.mxu1 %v1735_v30 }
  0x1f   :  { %418 = vmatpush1.bf16.msra.mxu0 %v1737_v31  ;;  %531 = vmatpush1.bf16.msra.mxu1 %v1738_v32 }
  0x22   :  { %436 = vmatmul.mubr.bf16.vlgmr.msra.gmra.mrb[0].mxu0 %v1739_v33  ;;  %549 = vmatmul.mubr.bf16.vlgmr.msra.gmra.mrb[0].mxu1 %v1739_v33 }
  0x23   :  { %445 = vmatprep.mubr.bf16.mxu0 %v2003_v1  ;;  %558 = vmatprep.mubr.bf16.mxu1 %v2003_v1 }
  0x2a   :  { %446 = vmatmul.mubr.bf16.gmra.mrb[4].mxu0 %v1740_v34  ;;  %559 = vmatmul.mubr.bf16.gmra.mrb[4].mxu1 %v1740_v34 }
  0x2b   :  { %455 = vmatprep.mubr.bf16.mxu0 %v2003_v1  ;;  %568 = vmatprep.mubr.bf16.mxu1 %v2003_v1 }
  0x32   :  { %456 = vmatmul.mubr.bf16.gmra.mrb[8].mxu0 %v1741_v35  ;;  %569 = vmatmul.mubr.bf16.gmra.mrb[8].mxu1 %v1741_v35 }
  0x33   :  { %465 = vmatprep.mubr.bf16.mxu0 %v2003_v1  ;;  %578 = vmatprep.mubr.bf16.mxu1 %v2003_v1 }
  0x3a   :  { %466 = vmatmul.mubr.bf16.gmra.mrb[12].mxu0 %v1742_v36  ;;  %579 = vmatmul.mubr.bf16.gmra.mrb[12].mxu1 %v1742_v36 }
  0x3b   :  { %475 = vmatprep.mubr.bf16.mxu0 %v2003_v1  ;;  %588 = vmatprep.mubr.bf16.mxu1 %v2003_v1 }
  0x42   :  { %476 = vmatmul.mubr.bf16.gmra.mrb[16].mxu0 %v1743_v37  ;;  %589 = vmatmul.mubr.bf16.gmra.mrb[16].mxu1 %v1743_v37 }
  0x43   :  { %485 = vmatprep.mubr.bf16.mxu0 %v2003_v1  ;;  %598 = vmatprep.mubr.bf16.mxu1 %v2003_v1 }
  0x4a   :  { %486 = vmatmul.mubr.bf16.gmra.mrb[20].mxu0 %v1744_v38  ;;  %599 = vmatmul.mubr.bf16.gmra.mrb[20].mxu1 %v1744_v38 }
  0x4b   :  { %495 = vmatprep.mubr.bf16.mxu0 %v2003_v1  ;;  %608 = vmatprep.mubr.bf16.mxu1 %v2003_v1 }
  0x52   :  { %496 = vmatmul.mubr.bf16.gmra.mrb[24].mxu0 %v1745_v39  ;;  %609 = vmatmul.mubr.bf16.gmra.mrb[24].mxu1 %v1745_v39 }
  0x53   :  { %505 = vmatprep.mubr.bf16.mxu0 %v2003_v1  ;;  %618 = vmatprep.mubr.bf16.mxu1 %v2003_v1 }
  0x5a   :  { %506 = vmatmul.mubr.bf16.gmra.mrb[28].mxu0 %v1746_v40  ;;  %619 = vmatmul.mubr.bf16.gmra.mrb[28].mxu1 %v1746_v40 }
  0xf5   :  { %v437_v52 = vpop.f32.mrb[0].mxu0  ;;  %v550_v53 = vpop.f32.mrb[0].mxu1 }
  0xf6   :  { %v2172_v54 = vadd.f32 %v2163_v48, %v437_v52  ;;  %v2175_v55 = vadd.f32 %v2165_v49, %v550_v53  ;;  %v439_v56 = vpop.f32.mrb[1].mxu0  ;;  %v552_v57 = vpop.f32.mrb[1].mxu1 }
  0xf7   :  { %v2178_v58 = vadd.f32 %v2167_v50, %v439_v56  ;;  %v2181_v59 = vadd.f32 %v2169_v51, %v552_v57  ;;  %v441_v60 = vpop.f32.mrb[2].mxu0  ;;  %v554_v61 = vpop.f32.mrb[2].mxu1 }
  0xf8   :  { %v910_v62 = vmul.f32 -1.702, %v2172_v54  ;;  %v912_v63 = vmul.f32 -1.702, %v2175_v55  ;;  %v2186_v0 = vadd.f32 %v2163_v48, %v441_v60  ;;  %v2189_v1 = vadd.f32 %v2165_v49, %v554_v61  ;;  %v443_v2 = vpop.f32.mrb[3].mxu0  ;;  %v556_v3 = vpop.f32.mrb[3].mxu1 }
  0xf9   :  { %v911_v4 = vmul.f32 -1.702, %v2178_v58  ;;  %v913_v5 = vmul.f32 -1.702, %v2181_v59  ;;  %v2194_v6 = vadd.f32 %v2167_v50, %v443_v2  ;;  %v2197_v7 = vadd.f32 %v2169_v51, %v556_v3 }
  0xfa   :  { %v974_v8 = vmul.f32 1.442695, %v910_v62  ;;  %v978_v9 = vmul.f32 1.442695, %v912_v63  ;;  %v914_v10 = vmul.f32 -1.702, %v2186_v0 }
  0xfb   :  { %v976_v11 = vmul.f32 1.442695, %v911_v4  ;;  %v980_v12 = vmul.f32 1.442695, %v913_v5  ;;  %v916_v13 = vmul.f32 -1.702, %v2189_v1 }
  0xfc   :  { %1747 = vpow2.f32 %v974_v8  ;;  %v982_v14 = vmul.f32 1.442695, %v914_v10  ;;  %v915_v15 = vmul.f32 -1.702, %v2194_v6  ;;  %v917_v16 = vmul.f32 -1.702, %v2197_v7 }
  0xfd   :  { %1749 = vpow2.f32 %v978_v9  ;;  %v986_v17 = vmul.f32 1.442695, %v916_v13  ;;  %v447_v18 = vpop.f32.mrb[4].mxu0  ;;  %v560_v19 = vpop.f32.mrb[4].mxu1 }
  0xfe   :  { %1751 = vpow2.f32 %v976_v11  ;;  %v984_v20 = vmul.f32 1.442695, %v915_v15  ;;  %v988_v21 = vmul.f32 1.442695, %v917_v16  ;;  %v2204_v22 = vadd.f32 %v2163_v48, %v447_v18  ;;  %v449_v23 = vpop.f32.mrb[5].mxu0  ;;  %v562_v24 = vpop.f32.mrb[5].mxu1 }
  0xff   :  { %1753 = vpow2.f32 %v980_v12  ;;  %v2207_v25 = vadd.f32 %v2165_v49, %v560_v19  ;;  %v2210_v26 = vadd.f32 %v2167_v50, %v449_v23  ;;  %v2213_v27 = vadd.f32 %v2169_v51, %v562_v24  ;;  %v451_v28 = vpop.f32.mrb[6].mxu0  ;;  %v564_v29 = vpop.f32.mrb[6].mxu1 }
 0x100   :  { %1755 = vpow2.f32 %v982_v14  ;;  %v918_v30 = vmul.f32 -1.702, %v2204_v22  ;;  %v2217_v31 = vadd.f32 %v2163_v48, %v451_v28  ;;  %v453_v32 = vpop.f32.mrb[7].mxu0  ;;  %v566_v33 = vpop.f32.mrb[7].mxu1  ;;  %v2224_v39 = vadd.f32 %v2165_v49, %v564_v29 }
 0x101   :  { %1757 = vpow2.f32 %v986_v17  ;;  %v920_v34 = vmul.f32 -1.702, %v2207_v25  ;;  %v919_v35 = vmul.f32 -1.702, %v2210_v26  ;;  %v921_v36 = vmul.f32 -1.702, %v2213_v27 }
 0x102   :  { %1759 = vpow2.f32 %v984_v20  ;;  %v990_v37 = vmul.f32 1.442695, %v918_v30  ;;  %v922_v38 = vmul.f32 -1.702, %v2217_v31  ;;  %v2227_v44 = vadd.f32 %v2167_v50, %v453_v32 }
 0x103   :  { %1761 = vpow2.f32 %v988_v21  ;;  %v994_v40 = vmul.f32 1.442695, %v920_v34  ;;  %v992_v41 = vmul.f32 1.442695, %v919_v35  ;;  %v996_v42 = vmul.f32 1.442695, %v921_v36 }
 0x104   :  { %1763 = vpow2.f32 %v990_v37  ;;  %v998_v43 = vmul.f32 1.442695, %v922_v38  ;;  %v924_v60 = vmul.f32 -1.702, %v2224_v39  ;;  %v2231_v61 = vadd.f32 %v2169_v51, %v566_v33 }
 0x105   :  { %1765 = vpow2.f32 %v994_v40  ;;  %v457_v45 = vpop.f32.mrb[8].mxu0  ;;  %v570_v46 = vpop.f32.mrb[8].mxu1  ;;  %v923_v10 = vmul.f32 -1.702, %v2227_v44 }
 0x106   :  { %v1748_v47 = vpop.eup %1747  ;;  %1767 = vpow2.f32 %v992_v41  ;;  %v459_v52 = vpop.f32.mrb[9].mxu0  ;;  %v2234_v4 = vadd.f32 %v2163_v48, %v457_v45  ;;  %v2238_v14 = vadd.f32 %v2165_v49, %v570_v46  ;;  %v1002_v17 = vmul.f32 1.442695, %v924_v60 }
 0x107   :  { %v572_v53 = vpop.f32.mrb[9].mxu1  ;;  %v1750_v56 = vpop.eup %1749  ;;  %v1102_v57 = vadd.f32 1.0, %v1748_v47  ;;  %1769 = vpow2.f32 %v996_v42  ;;  %v925_v18 = vmul.f32 -1.702, %v2231_v61  ;;  %v2243_v23 = vadd.f32 %v2167_v50, %v459_v52 }
 0x108   :  { %v461_v62 = vpop.f32.mrb[10].mxu0  ;;  %v574_v63 = vpop.f32.mrb[10].mxu1  ;;  %v1104_v3 = vadd.f32 1.0, %v1750_v56  ;;  %1771 = vpow2.f32 %v998_v43  ;;  %v926_v21 = vmul.f32 -1.702, %v2234_v4  ;;  %v2246_v30 = vadd.f32 %v2169_v51, %v572_v53 }
 0x109   :  { %v1752_v2 = vpop.eup %1751  ;;  %v463_v5 = vpop.f32.mrb[11].mxu0  ;;  %1773 = vrcp.f32 %v1102_v57  ;;  %v1000_v29 = vmul.f32 1.442695, %v923_v10  ;;  %v928_v36 = vmul.f32 -1.702, %v2238_v14  ;;  %v2254_v43 = vadd.f32 %v2163_v48, %v461_v62 }
 0x10a   :  { %v1754_v8 = vpop.eup %1753  ;;  %v1103_v9 = vadd.f32 1.0, %v1752_v2  ;;  %v576_v11 = vpop.f32.mrb[11].mxu1  ;;  %1775 = vrcp.f32 %v1104_v3  ;;  %v1004_v42 = vmul.f32 1.442695, %v925_v18  ;;  %v1006_v52 = vmul.f32 1.442695, %v926_v21 }
 0x10b   :  { %v1756_v12 = vpop.eup %1755  ;;  %v1105_v13 = vadd.f32 1.0, %v1754_v8  ;;  %v927_v53 = vmul.f32 -1.702, %v2243_v23  ;;  %v929_v2 = vmul.f32 -1.702, %v2246_v30  ;;  %v2271_v18 = vadd.f32 %v2167_v50, %v463_v5 }
 0x10c   :  { %v1758_v15 = vpop.eup %1757  ;;  %1777 = vrcp.f32 %v1103_v9  ;;  %v1106_v16 = vadd.f32 1.0, %v1756_v12  ;;  %v1010_v10 = vmul.f32 1.442695, %v928_v36  ;;  %v2267_v12 = vadd.f32 %v2165_v49, %v574_v63 }
 0x10d   :  { %v1760_v19 = vpop.eup %1759  ;;  %1779 = vrcp.f32 %v1105_v13  ;;  %v1108_v20 = vadd.f32 1.0, %v1758_v15  ;;  %v467_v32 = vpop.f32.mrb[12].mxu0  ;;  %v1008_v21 = vmul.f32 1.442695, %v927_v53 }
 0x10e   :  { %v1762_v24 = vpop.eup %1761  ;;  %1781 = vrcp.f32 %v1106_v16  ;;  %v1107_v28 = vadd.f32 1.0, %v1760_v19  ;;  %v580_v33 = vpop.f32.mrb[12].mxu1  ;;  %v930_v16 = vmul.f32 -1.702, %v2254_v43 }
 0x10f   :  { %v1764_v34 = vpop.eup %1763  ;;  %1783 = vrcp.f32 %v1108_v20  ;;  %v1109_v35 = vadd.f32 1.0, %v1762_v24  ;;  %v2249_v37 = vpop.f32.mrb[13].mxu0  ;;  %v2275_v24 = vadd.f32 %v2169_v51, %v576_v11  ;;  %v2288_v11 = vadd.f32 %v2165_v49, %v580_v33 }
 0x110   :  { %v2251_v38 = vpop.f32.mrb[13].mxu1  ;;  %v1766_v40 = vpop.eup %1765  ;;  %1785 = vrcp.f32 %v1107_v28  ;;  %v1110_v41 = vadd.f32 1.0, %v1764_v34  ;;  %v1012_v34 = vmul.f32 1.442695, %v929_v2  ;;  %v1014_v53 = vmul.f32 1.442695, %v930_v16 }
 0x111   :  { %v2256_v45 = vpop.f32.mrb[14].mxu0  ;;  %v1768_v46 = vpop.eup %1767  ;;  %1787 = vrcp.f32 %v1109_v35  ;;  %v1112_v47 = vadd.f32 1.0, %v1766_v40  ;;  %v2279_v35 = vadd.f32 %v2163_v48, %v467_v32 }
 0x112   :  { %v2259_v56 = vpop.f32.mrb[14].mxu1  ;;  %v1770_v57 = vpop.eup %1769  ;;  %1789 = vrcp.f32 %v1110_v41  ;;  %v1111_v60 = vadd.f32 1.0, %v1768_v46  ;;  %v932_v41 = vmul.f32 -1.702, %v2267_v12 }
 0x113   :  { %v2262_v3 = vpop.f32.mrb[15].mxu0  ;;  %v2264_v8 = vpop.f32.mrb[15].mxu1  ;;  %1791 = vrcp.f32 %v1112_v47  ;;  %v1113_v9 = vadd.f32 1.0, %v1770_v57  ;;  %v931_v57 = vmul.f32 -1.702, %v2271_v18 }
 0x114   :  { %v1772_v62 = vpop.eup %1771  ;;  %1793 = vrcp.f32 %v1111_v60  ;;  %v934_v16 = vmul.f32 -1.702, %v2279_v35 }
 0x115   :  { %v1774_v13 = vpop.eup %1773  ;;  %v1114_v15 = vadd.f32 1.0, %v1772_v62  ;;  %1795 = vrcp.f32 %v1113_v9  ;;  %v2281_v36 = vpop.f32.mrb[16].mxu0  ;;  %v933_v62 = vmul.f32 -1.702, %v2275_v24 }
 0x116   :  { %v1776_v19 = vpop.eup %1775  ;;  %v1294_v20 = vmul.f32 %v1774_v13, %v2172_v54  ;;  %v2283_v5 = vpop.f32.mrb[16].mxu1 }
 0x117   :  { %v1778_v28 = vpop.eup %1777  ;;  %v1296_v63 = vmul.f32 %v1776_v19, %v2175_v55  ;;  %1797 = vrcp.f32 %v1114_v15  ;;  %v2290_v46 = vpop.f32.mrb[17].mxu0 }
 0x118   :  { %v1780_v40 = vpop.eup %1779  ;;  %v1295_v54 = vmul.f32 %v1778_v28, %v2178_v58  ;;  %1799 = vpow2.f32 %v1002_v17  ;;  %v2292_v55 = vpop.f32.mrb[17].mxu1 }
 0x119   :  { %v1782_v47 = vpop.eup %1781  ;;  %v1297_v32 = vmul.f32 %v1780_v40, %v2181_v59  ;;  %1801 = vpow2.f32 %v1000_v29  ;;  %v2296_v60 = vpop.f32.mrb[18].mxu0 }
 0x11a   :  { %v2298_v58 = vpop.f32.mrb[18].mxu1  ;;  %v1784_v17 = vpop.eup %1783  ;;  %v1658_v2 = vpack.c.bf16 %v1295_v54, %v1294_v20  ;;  %v1298_v33 = vmul.f32 %v1782_v47, %v2186_v0  ;;  %1803 = vpow2.f32 %v1004_v42  ;;  %v1018_v42 = vmul.f32 1.442695, %v932_v41 }
 0x11b   :  { %v2302_v9 = vpop.f32.mrb[19].mxu0  ;;  %v2304_v13 = vpop.f32.mrb[19].mxu1  ;;  %v1659_v29 = vpack.c.bf16 %v1297_v32, %v1296_v63  ;;  %v1300_v15 = vmul.f32 %v1784_v17, %v2189_v1  ;;  %1805 = vpow2.f32 %v1006_v52  ;;  %v936_v20 = vmul.f32 -1.702, %v2288_v11 }
 0x11c   :  { %v1786_v59 = vpop.eup %1785  ;;  %1550 = vst [vmem:[%s2719_s3] sm:$0xff] %v1658_v2  ;;  %1807 = vpow2.f32 %v1010_v10  ;;  %v1016_v52 = vmul.f32 1.442695, %v931_v57  ;;  %v1020_v47 = vmul.f32 1.442695, %v933_v62  ;;  %v1022_v32 = vmul.f32 1.442695, %v934_v16 }
 0x11d   :  { %v1788_v19 = vpop.eup %1787  ;;  %v1299_v0 = vmul.f32 %v1786_v59, %v2194_v6  ;;  %1551 = vst [vmem:[%s2719_s3 + $0x8] sm:$0xff] %v1659_v29  ;;  %1809 = vpow2.f32 %v1008_v21  ;;  %v2319_v17 = vpop.f32.mrb[20].mxu0  ;;  %v2329_v21 = vadd.f32 %v2167_v50, %v2249_v37  ;;  %v2347_v37 = vadd.f32 %v2163_v48, %v2256_v45 }
 0x11e   :  { %v1790_v28 = vpop.eup %1789  ;;  %v1301_v1 = vmul.f32 %v1788_v19, %v2197_v7  ;;  %1811 = vpow2.f32 %v1012_v34  ;;  %v2321_v2 = vpop.f32.mrb[20].mxu1 }
 0x11f   :  { %v1792_v63 = vpop.eup %1791  ;;  %v1660_v40 = vpack.c.bf16 %v1299_v0, %v1298_v33  ;;  %v1302_v54 = vmul.f32 %v1790_v28, %v2204_v22  ;;  %1813 = vpow2.f32 %v1014_v53  ;;  %v1026_v22 = vmul.f32 1.442695, %v936_v20  ;;  %v2333_v34 = vpop.f32.mrb[21].mxu1 }
 0x120   :  { %v1794_v6 = vpop.eup %1793  ;;  %v1661_v10 = vpack.c.bf16 %v1301_v1, %v1300_v15  ;;  %v1304_v41 = vmul.f32 %v1792_v63, %v2207_v25  ;;  %1815 = vpow2.f32 %v1018_v42  ;;  %v2331_v25 = vpop.f32.mrb[21].mxu0  ;;  %v935_v20 = vmul.f32 -1.702, %v2329_v21 }
 0x121   :  { %v1796_v59 = vpop.eup %1795  ;;  %1552 = vst [vmem:[%s2719_s3 + $0x10] sm:$0xff] %v1660_v40  ;;  %v1303_v7 = vmul.f32 %v1794_v6, %v2210_v26  ;;  %1817 = vpow2.f32 %v1016_v52  ;;  %v2343_v26 = vadd.f32 %v2169_v51, %v2251_v38  ;;  %v2349_v33 = vpop.f32.mrb[22].mxu0  ;;  %v2363_v28 = vadd.f32 %v2165_v49, %v2259_v56 }
 0x122   :  { %v2335_v53 = vpop.eup %1797  ;;  %1553 = vst [vmem:[%s2719_s3 + $0x18] sm:$0xff] %v1661_v10  ;;  %v1305_v57 = vmul.f32 %v1796_v59, %v2213_v27  ;;  %v2351_v62 = vpop.f32.mrb[22].mxu1  ;;  %1819 = vpow2.f32 %v1020_v47  ;;  %v938_v40 = vmul.f32 -1.702, %v2347_v37  ;;  %v2372_v6 = vadd.f32 %v2167_v50, %v2262_v3 }
 0x123   :  { %v1800_v29 = vpop.eup %1799  ;;  %v1662_v15 = vpack.c.bf16 %v1303_v7, %v1302_v54  ;;  %v2353_v16 = vpop.f32.mrb[23].mxu0  ;;  %1821 = vpow2.f32 %v1022_v32  ;;  %v937_v63 = vmul.f32 -1.702, %v2343_v26 }
 0x124   :  { %v2355_v19 = vpop.f32.mrb[23].mxu1  ;;  %v1802_v27 = vpop.eup %1801  ;;  %v1663_v0 = vpack.c.bf16 %v1305_v57, %v1304_v41  ;;  %v1116_v42 = vadd.f32 1.0, %v1800_v29  ;;  %1823 = vpow2.f32 %v1026_v22  ;;  %2722 = vst [vmem:[#allocation3_spill] sm:$0xff] %v2372_v6  ;;  %v2376_v41 = vadd.f32 %v2169_v51, %v2264_v8 }
 0x125   :  { %v1804_v38 = vpop.eup %1803  ;;  %1554 = vst [vmem:[%s2719_s3 + $0x20] sm:$0xff] %v1662_v15  ;;  %v1115_v45 = vadd.f32 1.0, %v1802_v27  ;;  %v2378_v32 = vpop.f32.mrb[24].mxu0  ;;  %v1024_v57 = vmul.f32 1.442695, %v935_v20  ;;  %v2392_v20 = vadd.f32 %v2163_v48, %v2281_v36  ;;  %v2405_v36 = vadd.f32 %v2165_v49, %v2283_v5 }
 0x126   :  { %v1806_v1 = vpop.eup %1805  ;;  %1555 = vst [vmem:[%s2719_s3 + $0x28] sm:$0xff] %v1663_v0  ;;  %1825 = vrcp.f32 %v1116_v42  ;;  %v1117_v52 = vadd.f32 1.0, %v1804_v38  ;;  %2723 = vst [vmem:[#allocation4_spill] sm:$0xff] %v2376_v41  ;;  %v2380_v59 = vpop.f32.mrb[24].mxu1  ;;  %v940_v29 = vmul.f32 -1.702, %v2363_v28 }
 0x127   :  { %v1808_v54 = vpop.eup %1807  ;;  %1827 = vrcp.f32 %v1115_v45  ;;  %v1118_v47 = vadd.f32 1.0, %v1806_v1  ;;  %v2383_v15 = vpop.f32.mrb[25].mxu0  ;;  %v1028_v0 = vmul.f32 1.442695, %v937_v63  ;;  %v2385_v42 = vmul.f32 1.442695, %v938_v40 }
 0x128   :  { %v1810_v56 = vpop.eup %1809  ;;  %1829 = vrcp.f32 %v1117_v52  ;;  %v1120_v10 = vadd.f32 1.0, %v1808_v54  ;;  %v2387_v8 = vpop.f32.mrb[25].mxu1  ;;  %v939_v1 = vmul.f32 -1.702, %v2372_v6  ;;  %v941_v40 = vmul.f32 -1.702, %v2376_v41 }
 0x129   :  { %v1812_v7 = vpop.eup %1811  ;;  %1831 = vrcp.f32 %v1118_v47  ;;  %v1119_v22 = vadd.f32 1.0, %v1810_v56  ;;  %v2394_v52 = vpop.f32.mrb[26].mxu0  ;;  %v2416_v6 = vadd.f32 %v2169_v51, %v2292_v55 }
 0x12a   :  { %v1814_v3 = vpop.eup %1813  ;;  %1833 = vrcp.f32 %v1120_v10  ;;  %v1121_v27 = vadd.f32 1.0, %v1812_v7  ;;  %2724 = vst [vmem:[#allocation5_spill] sm:$0xff] %v2394_v52  ;;  %v2396_v54 = vpop.f32.mrb[26].mxu1  ;;  %v1036_v41 = vmul.f32 1.442695, %v941_v40 }
 0x12b   :  { %v1816_v38 = vpop.eup %1815  ;;  %1835 = vrcp.f32 %v1119_v22  ;;  %v1122_v45 = vadd.f32 1.0, %v1814_v3  ;;  %2725 = vst [vmem:[#allocation6_spill] sm:$0xff] %v2396_v54  ;;  %v2399_v56 = vpop.f32.mrb[27].mxu0  ;;  %v1034_v3 = vmul.f32 1.442695, %v940_v29  ;;  %v1306_v54 = vmul.f32 %v2335_v53, %v2217_v31 }
 0x12c   :  { %v1818_v47 = vpop.eup %1817  ;;  %1837 = vrcp.f32 %v1121_v27  ;;  %v1124_v63 = vadd.f32 1.0, %v1816_v38  ;;  %2726 = vst [vmem:[#allocation7_spill] sm:$0xff] %v2399_v56  ;;  %v2401_v10 = vpop.f32.mrb[27].mxu1  ;;  %v2411_v38 = vadd.f32 %v2167_v50, %v2290_v46  ;;  %v942_v29 = vmul.f32 -1.702, %v2392_v20 }
 0x12d   :  { %2727 = vst [vmem:[#allocation8_spill] sm:$0xff] %v2401_v10  ;;  %v1820_v7 = vpop.eup %1819  ;;  %1839 = vrcp.f32 %v1122_v45  ;;  %v1123_v22 = vadd.f32 1.0, %v1818_v47  ;;  %v1032_v45 = vmul.f32 1.442695, %v939_v1  ;;  %v2418_v31 = vpop.f32.mrb[28].mxu0  ;;  %v2424_v1 = vadd.f32 %v2163_v48, %v2296_v60 }
 0x12e   :  { %v1822_v52 = vpop.eup %1821  ;;  %1841 = vrcp.f32 %v1124_v63  ;;  %v1125_v27 = vadd.f32 1.0, %v1820_v7  ;;  %v944_v63 = vmul.f32 -1.702, %v2405_v36  ;;  %v943_v7 = vmul.f32 -1.702, %v2411_v38 }
 0x12f   :  { %v1824_v56 = vpop.eup %1823  ;;  %1843 = vrcp.f32 %v1123_v22  ;;  %v1126_v10 = vadd.f32 1.0, %v1822_v52  ;;  %v2426_v52 = vpop.f32.mrb[28].mxu1 }
 0x130   :  { %v1826_v47 = vpop.eup %1825  ;;  %1845 = vrcp.f32 %v1125_v27  ;;  %v1128_v5 = vadd.f32 1.0, %v1824_v56  ;;  %2728 = vst [vmem:[#allocation9_spill] sm:$0xff] %v2426_v52  ;;  %v2428_v56 = vpop.f32.mrb[29].mxu0 }
 0x131   :  { %v1828_v53 = vpop.eup %1827  ;;  %v1308_v46 = vmul.f32 %v1826_v47, %v2224_v39  ;;  %1847 = vrcp.f32 %v1126_v10  ;;  %2729 = vst [vmem:[#allocation10_spill] sm:$0xff] %v2428_v56  ;;  %v2434_v39 = vadd.f32 %v2165_v49, %v2298_v58  ;;  %v2436_v10 = vpop.f32.mrb[29].mxu1  ;;  %v1038_v47 = vmul.f32 1.442695, %v942_v29 }
 0x132   :  { %v1830_v40 = vpop.eup %1829  ;;  %v1307_v55 = vmul.f32 %v1828_v53, %v2227_v44  ;;  %1849 = vrcp.f32 %v1128_v5  ;;  %2730 = vst [vmem:[#allocation11_spill] sm:$0xff] %v2436_v10  ;;  %v2438_v22 = vpop.f32.mrb[30].mxu0  ;;  %v2443_v56 = vadd.f32 %v2167_v50, %v2302_v9  ;;  %v946_v9 = vmul.f32 -1.702, %v2424_v1 }
 0x133   :  { %2731 = vst [vmem:[#allocation12_spill] sm:$0xff] %v2438_v22  ;;  %v1832_v60 = vpop.eup %1831  ;;  %v1309_v27 = vmul.f32 %v1830_v40, %v2231_v61  ;;  %1851 = vpow2.f32 %v1024_v57  ;;  %v2445_v44 = vpop.f32.mrb[30].mxu1  ;;  %v945_v22 = vmul.f32 -1.702, %v2416_v6 }
 0x134   :  { %v2447_v5 = vpop.f32.mrb[31].mxu0  ;;  %v1834_v53 = vpop.eup %1833  ;;  %v1664_v58 = vpack.c.bf16 %v1307_v55, %v1306_v54  ;;  %v1310_v52 = vmul.f32 %v1832_v60, %v2234_v4  ;;  %1853 = vpow2.f32 %v1028_v0  ;;  %v1042_v0 = vmul.f32 1.442695, %v944_v63 }
 0x135   :  { %v2451_v10 = vpop.f32.mrb[31].mxu1  ;;  %v1836_v61 = vpop.eup %1835  ;;  %v1665_v57 = vpack.c.bf16 %v1309_v27, %v1308_v46  ;;  %v1312_v29 = vmul.f32 %v1834_v53, %v2238_v14  ;;  %1855 = vpow2.f32 %v2385_v42  ;;  %v948_v54 = vmul.f32 -1.702, %v2434_v39 }
 0x136   :  { %2732 = vst [vmem:[#allocation13_spill] sm:$0xff] %v2451_v10  ;;  %v1838_v40 = vpop.eup %1837  ;;  %1556 = vst [vmem:[%s2719_s3 + $0x30] sm:$0xff] %v1664_v58  ;;  %v1311_v4 = vmul.f32 %v1836_v61, %v2243_v23  ;;  %1857 = vpow2.f32 %v1034_v3  ;;  %v1040_v42 = vmul.f32 1.442695, %v943_v7  ;;  %v947_v46 = vmul.f32 -1.702, %v2443_v56 }
 0x137   :  { %v1840_v55 = vpop.eup %1839  ;;  %1557 = vst [vmem:[%s2719_s3 + $0x38] sm:$0xff] %v1665_v57  ;;  %v1313_v14 = vmul.f32 %v1838_v40, %v2246_v30  ;;  %1859 = vpow2.f32 %v1032_v45  ;;  %v1044_v23 = vmul.f32 1.442695, %v945_v22  ;;  %v1046_v61 = vmul.f32 1.442695, %v946_v9 }
 0x138   :  { %v1842_v60 = vpop.eup %1841  ;;  %v1666_v27 = vpack.c.bf16 %v1311_v4, %v1310_v52  ;;  %v1314_v53 = vmul.f32 %v1840_v55, %v2254_v43  ;;  %1861 = vpow2.f32 %v1036_v41  ;;  %v1050_v45 = vmul.f32 1.442695, %v948_v54 }
 0x139   :  { %v1844_v3 = vpop.eup %1843  ;;  %v1667_v63 = vpack.c.bf16 %v1313_v14, %v1312_v29  ;;  %v1316_v58 = vmul.f32 %v1842_v60, %v2267_v12  ;;  %1863 = vpow2.f32 %v1038_v47  ;;  %v1048_v12 = vmul.f32 1.442695, %v947_v46 }
 0x13a   :  { %v1846_v10 = vpop.eup %1845  ;;  %1558 = vst [vmem:[%s2719_s3 + $0x40] sm:$0xff] %v1666_v27  ;;  %v1315_v30 = vmul.f32 %v1844_v3, %v2271_v18  ;;  %1865 = vpow2.f32 %v1042_v0  ;;  %v2482_v22 = vadd.f32 %v2169_v51, %v2304_v13  ;;  %v2486_v18 = vadd.f32 %v2163_v48, %v2319_v17 }
 0x13b   :  { %v2472_v52 = vpop.eup %1847  ;;  %1559 = vst [vmem:[%s2719_s3 + $0x48] sm:$0xff] %v1667_v63  ;;  %v1317_v43 = vmul.f32 %v1846_v10, %v2275_v24  ;;  %1867 = vpow2.f32 %v1040_v42  ;;  %v2490_v24 = vadd.f32 %v2165_v49, %v2321_v2  ;;  %v2497_v13 = vadd.f32 %v2167_v50, %v2331_v25 }
 0x13c   :  { %v2478_v41 = vpop.eup %1849  ;;  %v1668_v7 = vpack.c.bf16 %v1315_v30, %v1314_v53  ;;  %1869 = vpow2.f32 %v1044_v23  ;;  %v2504_v2 = vadd.f32 %v2169_v51, %v2333_v34  ;;  %v949_v0 = vmul.f32 -1.702, %v2482_v22 }
 0x13d   :  { %v1852_v47 = vpop.eup %1851  ;;  %v1669_v57 = vpack.c.bf16 %v1317_v43, %v1316_v58  ;;  %1871 = vpow2.f32 %v1046_v61  ;;  %v950_v54 = vmul.f32 -1.702, %v2486_v18  ;;  %v952_v14 = vmul.f32 -1.702, %v2490_v24 }
 0x13e   :  { %v1854_v10 = vpop.eup %1853  ;;  %1560 = vst [vmem:[%s2719_s3 + $0x50] sm:$0xff] %v1668_v7  ;;  %v1127_v29 = vadd.f32 1.0, %v1852_v47  ;;  %1873 = vpow2.f32 %v1050_v45  ;;  %v2511_v42 = vadd.f32 %v2163_v48, %v2349_v33  ;;  %v951_v60 = vmul.f32 -1.702, %v2497_v13 }
 0x13f   :  { %v1856_v17 = vpop.eup %1855  ;;  %1561 = vst [vmem:[%s2719_s3 + $0x58] sm:$0xff] %v1669_v57  ;;  %v1129_v9 = vadd.f32 1.0, %v1854_v10  ;;  %1875 = vpow2.f32 %v1048_v12  ;;  %v2516_v27 = vadd.f32 %v2165_v49, %v2351_v62  ;;  %v953_v3 = vmul.f32 -1.702, %v2504_v2 }
 0x140   :  { %v1858_v40 = vpop.eup %1857  ;;  %1877 = vrcp.f32 %v1127_v29  ;;  %v1130_v4 = vadd.f32 1.0, %v1856_v17  ;;  %v1052_v61 = vmul.f32 1.442695, %v949_v0  ;;  %v1054_v33 = vmul.f32 1.442695, %v950_v54 }
 0x141   :  { %v1860_v25 = vpop.eup %1859  ;;  %1879 = vrcp.f32 %v1129_v9  ;;  %v1132_v55 = vadd.f32 1.0, %v1858_v40  ;;  %v1058_v43 = vmul.f32 1.442695, %v952_v14  ;;  %v954_v12 = vmul.f32 -1.702, %v2511_v42 }
 0x142   :  { %v1862_v46 = vpop.eup %1861  ;;  %1881 = vrcp.f32 %v1130_v4  ;;  %v1131_v34 = vadd.f32 1.0, %v1860_v25  ;;  %v1056_v47 = vmul.f32 1.442695, %v951_v60  ;;  %v956_v57 = vmul.f32 -1.702, %v2516_v27 }
 0x143   :  { %v1864_v53 = vpop.eup %1863  ;;  %1883 = vrcp.f32 %v1132_v55  ;;  %v1133_v23 = vadd.f32 1.0, %v1862_v46  ;;  %v1060_v17 = vmul.f32 1.442695, %v953_v3  ;;  %v2523_v9 = vadd.f32 %v2167_v50, %v2353_v16 }
 0x144   :  { %v1866_v63 = vpop.eup %1865  ;;  %1885 = vrcp.f32 %v1131_v34  ;;  %v1134_v58 = vadd.f32 1.0, %v1864_v53  ;;  %v1318_v4 = vmul.f32 %v2472_v52, %v2279_v35  ;;  %v2529_v54 = vadd.f32 %v2169_v51, %v2355_v19 }
 0x145   :  { %v1868_v30 = vpop.eup %1867  ;;  %1887 = vrcp.f32 %v1133_v23  ;;  %v1136_v45 = vadd.f32 1.0, %v1866_v63  ;;  %v1320_v55 = vmul.f32 %v2478_v41, %v2288_v11  ;;  %v1062_v46 = vmul.f32 1.442695, %v954_v12 }
 0x146   :  { %v1870_v7 = vpop.eup %1869  ;;  %1889 = vrcp.f32 %v1134_v58  ;;  %v1135_v62 = vadd.f32 1.0, %v1868_v30  ;;  %v1066_v60 = vmul.f32 1.442695, %v956_v57  ;;  %v2535_v35 = vadd.f32 %v2163_v48, %v2378_v32 }
 0x147   :  { %v1872_v10 = vpop.eup %1871  ;;  %1891 = vrcp.f32 %v1136_v45  ;;  %v1137_v29 = vadd.f32 1.0, %v1870_v7  ;;  %v955_v19 = vmul.f32 -1.702, %v2523_v9  ;;  %v2541_v11 = vadd.f32 %v2165_v49, %v2380_v59 }
 0x148   :  { %v1874_v40 = vpop.eup %1873  ;;  %1893 = vrcp.f32 %v1135_v62  ;;  %v1138_v0 = vadd.f32 1.0, %v1872_v10  ;;  %v957_v3 = vmul.f32 -1.702, %v2529_v54  ;;  %v2547_v32 = vadd.f32 %v2167_v50, %v2383_v15  ;;  %v2733_v15 = vld [vmem:[#allocation3_spill] sm:$0xff] }
 0x149   :  { %v1876_v25 = vpop.eup %1875  ;;  %1895 = vrcp.f32 %v1137_v29  ;;  %v1140_v14 = vadd.f32 1.0, %v1874_v40  ;;  %v2552_v30 = vadd.f32 %v2169_v51, %v2387_v8  ;;  %v958_v12 = vmul.f32 -1.702, %v2535_v35 }
 0x14a   :  { %v1878_v34 = vpop.eup %1877  ;;  %1897 = vrcp.f32 %v1138_v0  ;;  %v1139_v16 = vadd.f32 1.0, %v1876_v25  ;;  %v1068_v57 = vmul.f32 1.442695, %v957_v3  ;;  %v959_v10 = vmul.f32 -1.702, %v2547_v32 }
 0x14b   :  { %v1880_v52 = vpop.eup %1879  ;;  %v1319_v53 = vmul.f32 %v1878_v34, %v2329_v21  ;;  %1899 = vrcp.f32 %v1140_v14  ;;  %v1070_v14 = vmul.f32 1.442695, %v958_v12 }
 0x14c   :  { %v1882_v41 = vpop.eup %1881  ;;  %v1321_v23 = vmul.f32 %v1880_v52, %v2343_v26  ;;  %1901 = vrcp.f32 %v1139_v16 }
 0x14d   :  { %v1884_v63 = vpop.eup %1883  ;;  %v1670_v58 = vpack.c.bf16 %v1319_v53, %v1318_v4  ;;  %v1322_v21 = vmul.f32 %v1882_v41, %v2347_v37  ;;  %1903 = vpow2.f32 %v1052_v61  ;;  %v1064_v37 = vmul.f32 1.442695, %v955_v19 }
 0x14e   :  { %v1886_v59 = vpop.eup %1885  ;;  %v1671_v45 = vpack.c.bf16 %v1321_v23, %v1320_v55  ;;  %v1324_v26 = vmul.f32 %v1884_v63, %v2363_v28  ;;  %1905 = vpow2.f32 %v1054_v33  ;;  %v960_v61 = vmul.f32 -1.702, %v2541_v11  ;;  %v2734_v28 = vld [vmem:[#allocation4_spill] sm:$0xff]  ;;  %v2736_v63 = vld [vmem:[#allocation6_spill] sm:$0xff] }
 0x14f   :  { %v1888_v7 = vpop.eup %1887  ;;  %1562 = vst [vmem:[%s2719_s3 + $0x60] sm:$0xff] %v1670_v58  ;;  %v1323_v62 = vmul.f32 %v1886_v59, %v2733_v15  ;;  %1907 = vpow2.f32 %v1058_v43  ;;  %v961_v43 = vmul.f32 -1.702, %v2552_v30  ;;  %v2737_v59 = vld [vmem:[#allocation7_spill] sm:$0xff] }
 0x150   :  { %v1890_v8 = vpop.eup %1889  ;;  %1563 = vst [vmem:[%s2719_s3 + $0x68] sm:$0xff] %v1671_v45  ;;  %v1325_v33 = vmul.f32 %v1888_v7, %v2734_v28  ;;  %1909 = vpow2.f32 %v1056_v47  ;;  %v1074_v16 = vmul.f32 1.442695, %v960_v61  ;;  %v2597_v45 = vadd.f32 %v2167_v50, %v2737_v59  ;;  %v2738_v7 = vld [vmem:[#allocation8_spill] sm:$0xff] }
 0x151   :  { %v1892_v29 = vpop.eup %1891  ;;  %v1672_v40 = vpack.c.bf16 %v1323_v62, %v1322_v21  ;;  %v1326_v4 = vmul.f32 %v1890_v8, %v2392_v20  ;;  %1911 = vpow2.f32 %v1060_v17  ;;  %v1076_v19 = vmul.f32 1.442695, %v961_v43 }
 0x152   :  { %v1894_v0 = vpop.eup %1893  ;;  %v1673_v25 = vpack.c.bf16 %v1325_v33, %v1324_v26  ;;  %v1328_v55 = vmul.f32 %v1892_v29, %v2405_v36  ;;  %1913 = vpow2.f32 %v1062_v46  ;;  %v1072_v36 = vmul.f32 1.442695, %v959_v10 }
 0x153   :  { %v1896_v34 = vpop.eup %1895  ;;  %1564 = vst [vmem:[%s2719_s3 + $0x70] sm:$0xff] %v1672_v40  ;;  %v1327_v47 = vmul.f32 %v1894_v0, %v2411_v38  ;;  %1915 = vpow2.f32 %v1066_v60  ;;  %v2601_v15 = vadd.f32 %v2169_v51, %v2738_v7  ;;  %v2605_v61 = vadd.f32 %v2163_v48, %v2418_v31 }
 0x154   :  { %v1898_v52 = vpop.eup %1897  ;;  %1565 = vst [vmem:[%s2719_s3 + $0x78] sm:$0xff] %v1673_v25  ;;  %v1329_v20 = vmul.f32 %v1896_v34, %v2416_v6  ;;  %1917 = vpow2.f32 %v1064_v37  ;;  %v2735_v6 = vld [vmem:[#allocation5_spill] sm:$0xff]  ;;  %v963_v40 = vmul.f32 -1.702, %v2597_v45 }
 0x155   :  { %v2577_v17 = vpop.eup %1899  ;;  %v1674_v46 = vpack.c.bf16 %v1327_v47, %v1326_v4  ;;  %v1330_v53 = vmul.f32 %v1898_v52, %v2424_v1  ;;  %1919 = vpow2.f32 %v1068_v57  ;;  %v2586_v3 = vadd.f32 %v2163_v48, %v2735_v6  ;;  %v2741_v6 = vld [vmem:[#allocation11_spill] sm:$0xff] }
 0x156   :  { %v1902_v41 = vpop.eup %1901  ;;  %v1675_v38 = vpack.c.bf16 %v1329_v20, %v1328_v55  ;;  %1921 = vpow2.f32 %v1070_v14  ;;  %v2590_v1 = vadd.f32 %v2165_v49, %v2736_v63  ;;  %v965_v43 = vmul.f32 -1.702, %v2601_v15  ;;  %v2739_v14 = vld [vmem:[#allocation9_spill] sm:$0xff] }
 0x157   :  { %v1904_v60 = vpop.eup %1903  ;;  %1566 = vst [vmem:[%s2719_s3 + $0x80] sm:$0xff] %v1674_v46  ;;  %v1331_v23 = vmul.f32 %v1902_v41, %v2443_v56  ;;  %1923 = vpow2.f32 %v1074_v16  ;;  %v962_v33 = vmul.f32 -1.702, %v2586_v3  ;;  %v966_v55 = vmul.f32 -1.702, %v2605_v61 }
 0x158   :  { %v1906_v58 = vpop.eup %1905  ;;  %1567 = vst [vmem:[%s2719_s3 + $0x88] sm:$0xff] %v1675_v38  ;;  %v1141_v21 = vadd.f32 1.0, %v1904_v60  ;;  %1925 = vpow2.f32 %v1072_v36  ;;  %v964_v57 = vmul.f32 -1.702, %v2590_v1  ;;  %v2617_v34 = vadd.f32 %v2165_v49, %v2739_v14 }
 0x159   :  { %v1908_v56 = vpop.eup %1907  ;;  %v1676_v26 = vpack.c.bf16 %v1331_v23, %v1330_v53  ;;  %v1142_v12 = vadd.f32 1.0, %v1906_v58  ;;  %1927 = vpow2.f32 %v1076_v19  ;;  %v1078_v52 = vmul.f32 1.442695, %v962_v33  ;;  %v2740_v19 = vld [vmem:[#allocation10_spill] sm:$0xff] }
 0x15a   :  { %v1910_v62 = vpop.eup %1909  ;;  %1929 = vrcp.f32 %v1141_v21  ;;  %v1144_v37 = vadd.f32 1.0, %v1908_v56  ;;  %v1082_v20 = vmul.f32 1.442695, %v964_v57  ;;  %v1080_v53 = vmul.f32 1.442695, %v963_v40 }
 0x15b   :  { %v1912_v8 = vpop.eup %1911  ;;  %1568 = vst [vmem:[%s2719_s3 + $0x90] sm:$0xff] %v1676_v26  ;;  %1931 = vrcp.f32 %v1142_v12  ;;  %v1143_v28 = vadd.f32 1.0, %v1910_v62  ;;  %v2621_v41 = vadd.f32 %v2167_v50, %v2740_v19  ;;  %v1084_v23 = vmul.f32 1.442695, %v965_v43  ;;  %v2742_v62 = vld [vmem:[#allocation12_spill] sm:$0xff] }
 0x15c   :  { %v1914_v10 = vpop.eup %1913  ;;  %1933 = vrcp.f32 %v1144_v37  ;;  %v1145_v29 = vadd.f32 1.0, %v1912_v8  ;;  %v2625_v63 = vadd.f32 %v2169_v51, %v2741_v6  ;;  %v1086_v59 = vmul.f32 1.442695, %v966_v55 }
 0x15d   :  { %v1916_v4 = vpop.eup %1915  ;;  %1935 = vrcp.f32 %v1143_v28  ;;  %v1146_v31 = vadd.f32 1.0, %v1914_v10  ;;  %v968_v56 = vmul.f32 -1.702, %v2617_v34  ;;  %v1332_v12 = vmul.f32 %v2577_v17, %v2434_v39 }
 0x15e   :  { %v1918_v0 = vpop.eup %1917  ;;  %1937 = vrcp.f32 %v1145_v29  ;;  %v1148_v25 = vadd.f32 1.0, %v1916_v4  ;;  %v2632_v37 = vadd.f32 %v2163_v48, %v2742_v62  ;;  %v967_v33 = vmul.f32 -1.702, %v2621_v41 }
 0x15f   :  { %v1920_v47 = vpop.eup %1919  ;;  %1939 = vrcp.f32 %v1146_v31  ;;  %v1147_v16 = vadd.f32 1.0, %v1918_v0  ;;  %v2637_v57 = vadd.f32 %v2165_v49, %v2445_v44  ;;  %v969_v39 = vmul.f32 -1.702, %v2625_v63  ;;  %v2743_v31 = vld [vmem:[#allocation13_spill] sm:$0xff] }
 0x160   :  { %v1922_v36 = vpop.eup %1921  ;;  %1941 = vrcp.f32 %v1148_v25  ;;  %v1149_v46 = vadd.f32 1.0, %v1920_v47  ;;  %v2643_v17 = vadd.f32 %v2167_v50, %v2447_v5  ;;  %v1090_v4 = vmul.f32 1.442695, %v968_v56 }
 0x161   :  { %v1924_v38 = vpop.eup %1923  ;;  %1943 = vrcp.f32 %v1147_v16  ;;  %v1150_v60 = vadd.f32 1.0, %v1922_v36  ;;  %v2648_v43 = vadd.f32 %v2169_v51, %v2743_v31  ;;  %v970_v0 = vmul.f32 -1.702, %v2632_v37 }
 0x162   :  { %v1926_v58 = vpop.eup %1925  ;;  %1945 = vrcp.f32 %v1149_v46  ;;  %v1152_v21 = vadd.f32 1.0, %v1924_v38  ;;  %v1088_v5 = vmul.f32 1.442695, %v967_v33  ;;  %v1092_v14 = vmul.f32 1.442695, %v969_v39 }
 0x163   :  { %v1928_v26 = vpop.eup %1927  ;;  %1947 = vrcp.f32 %v1150_v60  ;;  %v1151_v7 = vadd.f32 1.0, %v1926_v58  ;;  %v1094_v19 = vmul.f32 1.442695, %v970_v0 }
 0x164   :  { %v1930_v8 = vpop.eup %1929  ;;  %1949 = vrcp.f32 %v1152_v21  ;;  %v1153_v28 = vadd.f32 1.0, %v1928_v26 }
 0x165   :  { %v1932_v10 = vpop.eup %1931  ;;  %v1333_v29 = vmul.f32 %v1930_v8, %v2482_v22  ;;  %1951 = vrcp.f32 %v1151_v7 }
 0x166   :  { %v1934_v48 = vpop.eup %1933  ;;  %v1334_v40 = vmul.f32 %v1932_v10, %v2486_v18  ;;  %1953 = vrcp.f32 %v1153_v28  ;;  %v972_v18 = vmul.f32 -1.702, %v2637_v57 }
 0x167   :  { %v1936_v49 = vpop.eup %1935  ;;  %v1677_v44 = vpack.c.bf16 %v1333_v29, %v1332_v12  ;;  %v1336_v22 = vmul.f32 %v1934_v48, %v2490_v24  ;;  %1955 = vpow2.f32 %v1078_v52  ;;  %v971_v24 = vmul.f32 -1.702, %v2643_v17 }
 0x168   :  { %v1938_v25 = vpop.eup %1937  ;;  %v1335_v50 = vmul.f32 %v1936_v49, %v2497_v13  ;;  %1957 = vpow2.f32 %v1082_v20  ;;  %v973_v13 = vmul.f32 -1.702, %v2648_v43 }
 0x169   :  { %v1940_v55 = vpop.eup %1939  ;;  %1569 = vst [vmem:[%s2719_s3 + $0x98] sm:$0xff] %v1677_v44  ;;  %v1337_v51 = vmul.f32 %v1938_v25, %v2504_v2  ;;  %1959 = vpow2.f32 %v1080_v53  ;;  %v1098_v53 = vmul.f32 1.442695, %v972_v18 }
 0x16a   :  { %v1942_v47 = vpop.eup %1941  ;;  %v1678_v16 = vpack.c.bf16 %v1335_v50, %v1334_v40  ;;  %v1338_v52 = vmul.f32 %v1940_v55, %v2511_v42  ;;  %1961 = vpow2.f32 %v1084_v23  ;;  %v1100_v21 = vmul.f32 1.442695, %v973_v13 }
 0x16b   :  { %v1944_v20 = vpop.eup %1943  ;;  %v1679_v36 = vpack.c.bf16 %v1337_v51, %v1336_v22  ;;  %v1340_v46 = vmul.f32 %v1942_v47, %v2516_v27  ;;  %1963 = vpow2.f32 %v1086_v59  ;;  %v1096_v27 = vmul.f32 1.442695, %v971_v24 }
 0x16c   :  { %v1946_v38 = vpop.eup %1945  ;;  %1570 = vst [vmem:[%s2719_s3 + $0xa0] sm:$0xff] %v1678_v16  ;;  %v1339_v2 = vmul.f32 %v1944_v20, %v2523_v9  ;;  %1965 = vpow2.f32 %v1090_v4 }
 0x16d   :  { %v1948_v60 = vpop.eup %1947  ;;  %1571 = vst [vmem:[%s2719_s3 + $0xa8] sm:$0xff] %v1679_v36  ;;  %v1341_v42 = vmul.f32 %v1946_v38, %v2529_v54  ;;  %1967 = vpow2.f32 %v1088_v5 }
 0x16e   :  { %v1950_v23 = vpop.eup %1949  ;;  %v1680_v6 = vpack.c.bf16 %v1339_v2, %v1338_v52  ;;  %v1342_v58 = vmul.f32 %v1948_v60, %v2535_v35  ;;  %1969 = vpow2.f32 %v1092_v14 }
 0x16f   :  { %v1952_v59 = vpop.eup %1951  ;;  %v1681_v56 = vpack.c.bf16 %v1341_v42, %v1340_v46  ;;  %v1344_v9 = vmul.f32 %v1950_v23, %v2541_v11  ;;  %1971 = vpow2.f32 %v1094_v19 }
 0x170   :  { %v1954_v26 = vpop.eup %1953  ;;  %1572 = vst [vmem:[%s2719_s3 + $0xb0] sm:$0xff] %v1680_v6  ;;  %v1343_v54 = vmul.f32 %v1952_v59, %v2547_v32  ;;  %1973 = vpow2.f32 %v1098_v53 }
 0x171   :  { %v1956_v12 = vpop.eup %1955  ;;  %1573 = vst [vmem:[%s2719_s3 + $0xb8] sm:$0xff] %v1681_v56  ;;  %v1345_v35 = vmul.f32 %v1954_v26, %v2552_v30  ;;  %1975 = vpow2.f32 %v1096_v27 }
 0x172   :  { %v1958_v7 = vpop.eup %1957  ;;  %v1682_v62 = vpack.c.bf16 %v1343_v54, %v1342_v58  ;;  %v1154_v11 = vadd.f32 1.0, %v1956_v12  ;;  %1977 = vpow2.f32 %v1100_v21 }
 0x173   :  { %v1960_v8 = vpop.eup %1959  ;;  %v1683_v28 = vpack.c.bf16 %v1345_v35, %v1344_v9  ;;  %v1156_v33 = vadd.f32 1.0, %v1958_v7 }
 0x174   :  { %v1962_v10 = vpop.eup %1961  ;;  %1574 = vst [vmem:[%s2719_s3 + $0xc0] sm:$0xff] %v1682_v62  ;;  %1979 = vrcp.f32 %v1154_v11  ;;  %v1155_v32 = vadd.f32 1.0, %v1960_v8 }
 0x175   :  { %v1964_v29 = vpop.eup %1963  ;;  %1575 = vst [vmem:[%s2719_s3 + $0xc8] sm:$0xff] %v1683_v28  ;;  %1981 = vrcp.f32 %v1156_v33  ;;  %v1157_v30 = vadd.f32 1.0, %v1962_v10 }
 0x176   :  { %v1966_v39 = vpop.eup %1965  ;;  %1983 = vrcp.f32 %v1155_v32  ;;  %v1158_v48 = vadd.f32 1.0, %v1964_v29 }
 0x177   :  { %v1968_v40 = vpop.eup %1967  ;;  %1985 = vrcp.f32 %v1157_v30  ;;  %v1160_v4 = vadd.f32 1.0, %v1966_v39 }
 0x178   :  { %v1970_v31 = vpop.eup %1969  ;;  %1987 = vrcp.f32 %v1158_v48  ;;  %v1159_v49 = vadd.f32 1.0, %v1968_v40 }
 0x179   :  { %v1972_v44 = vpop.eup %1971  ;;  %1989 = vrcp.f32 %v1160_v4  ;;  %v1161_v22 = vadd.f32 1.0, %v1970_v31 }
 0x17a   :  { %v1974_v0 = vpop.eup %1973  ;;  %1991 = vrcp.f32 %v1159_v49  ;;  %v1162_v25 = vadd.f32 1.0, %v1972_v44 }
 0x17b   :  { %v1976_v50 = vpop.eup %1975  ;;  %1993 = vrcp.f32 %v1161_v22  ;;  %v1164_v5 = vadd.f32 1.0, %v1974_v0 }
 0x17c   :  { %v1978_v18 = vpop.eup %1977  ;;  %1995 = vrcp.f32 %v1162_v25  ;;  %v1163_v55 = vadd.f32 1.0, %v1976_v50 }
 0x17d   :  { %1997 = vrcp.f32 %v1164_v5  ;;  %v1165_v51 = vadd.f32 1.0, %v1978_v18 }
 0x17e   :  { %v1980_v14 = vpop.eup %1979  ;;  %1999 = vrcp.f32 %v1163_v55 }
 0x17f   :  { %v1982_v24 = vpop.eup %1981  ;;  %v1346_v47 = vmul.f32 %v1980_v14, %v2586_v3  ;;  %2001 = vrcp.f32 %v1165_v51 }
 0x180   :  { %v1984_v16 = vpop.eup %1983  ;;  %v1348_v52 = vmul.f32 %v1982_v24, %v2590_v1 }
 0x181   :  { %v1986_v13 = vpop.eup %1985  ;;  %v1347_v20 = vmul.f32 %v1984_v16, %v2597_v45 }
 0x182   :  { %v1988_v36 = vpop.eup %1987  ;;  %v1349_v46 = vmul.f32 %v1986_v13, %v2601_v15 }
 0x183   :  { %v1990_v19 = vpop.eup %1989  ;;  %v1684_v38 = vpack.c.bf16 %v1347_v20, %v1346_v47  ;;  %v1350_v2 = vmul.f32 %v1988_v36, %v2605_v61 }
 0x184   :  { %v1992_v53 = vpop.eup %1991  ;;  %v1685_v60 = vpack.c.bf16 %v1349_v46, %v1348_v52  ;;  %v1352_v42 = vmul.f32 %v1990_v19, %v2617_v34 }
 0x185   :  { %v1994_v27 = vpop.eup %1993  ;;  %1576 = vst [vmem:[%s2719_s3 + $0xd0] sm:$0xff] %v1684_v38  ;;  %v1351_v3 = vmul.f32 %v1992_v53, %v2621_v41 }
 0x186   :  { %v1996_v1 = vpop.eup %1995  ;;  %1577 = vst [vmem:[%s2719_s3 + $0xd8] sm:$0xff] %v1685_v60  ;;  %v1353_v45 = vmul.f32 %v1994_v27, %v2625_v63 }
 0x187   :  { %v1998_v15 = vpop.eup %1997  ;;  %v1686_v61 = vpack.c.bf16 %v1351_v3, %v1350_v2  ;;  %v1354_v23 = vmul.f32 %v1996_v1, %v2632_v37 }
 0x188   :  { %v2000_v6 = vpop.eup %1999  ;;  %v1687_v34 = vpack.c.bf16 %v1353_v45, %v1352_v42  ;;  %v1356_v58 = vmul.f32 %v1998_v15, %v2637_v57 }
 0x189   :  { %v2002_v21 = vpop.eup %2001  ;;  %1578 = vst [vmem:[%s2719_s3 + $0xe0] sm:$0xff] %v1686_v61  ;;  %v1355_v41 = vmul.f32 %v2000_v6, %v2643_v17 }
 0x18a   :  { %1579 = vst [vmem:[%s2719_s3 + $0xe8] sm:$0xff] %v1687_v34  ;;  %v1357_v63 = vmul.f32 %v2002_v21, %v2648_v43 }
 0x18b   :  { %v1688_v59 = vpack.c.bf16 %v1355_v41, %v1354_v23 }
 0x18c   :  { %v1689_v56 = vpack.c.bf16 %v1357_v63, %v1356_v58 }
 0x18d   :  { %1580 = vst [vmem:[%s2719_s3 + $0xf0] sm:$0xff] %v1688_v59 }
 0x18e   :  { %1581 = vst [vmem:[%s2719_s3 + $0xf8] sm:$0xff] %v1689_v56 }

// kernel: transformer_forward.21
= control target key start
LH: loop header
LB: loop body
LE: loop exit
PB: predicated region body
PF: predicated region fallthrough
CT: control target
= control target key end

     0   :  { %s1429_s1 = inlined_call_operand.vmem [shape: bf16[512,128], index: 1, kind: input, shape index: {}]   ;;  %s1430_s0 = inlined_call_operand.vmem [shape: bf16[128,512], index: 0, kind: input, shape index: {}]   ;;  %s1431_s2 = inlined_call_operand.vmem [shape: f32[1,128], index: 2, kind: input, shape index: {}]   ;;  %s1432_s3 = inlined_call_operand.vmem [shape: f32[128,128], index: 3, kind: input, shape index: {}]   ;;  %s1433_s4 = inlined_call_operand.vmem [shape: f32[128,128], index: 4, kind: output, shape index: {}]  }
   0x1   :  { %v1015_v0 = vld [vmem:[%s1429_s1 + $0x40] sm:$0xff]   ;;  %v1019_v4 = vld [vmem:[%s1429_s1 + $0x48] sm:$0xff]   ;;  %v1023_v8 = vld [vmem:[%s1429_s1 + $0x50] sm:$0xff]  }
   0x2   :  { %v1016_v1 = vld [vmem:[%s1429_s1 + $0xc0] sm:$0xff]   ;;  %887 = vmatprep.subr.bf16.mxu0 %v1015_v0  ;;  %v1020_v5 = vld [vmem:[%s1429_s1 + $0xc8] sm:$0xff]   ;;  %v1024_v9 = vld [vmem:[%s1429_s1 + $0xd0] sm:$0xff]  }
   0x3   :  { %v1017_v2 = vld [vmem:[%s1429_s1] sm:$0xff]   ;;  %951 = vmatprep.subr.bf16.mxu1 %v1016_v1  ;;  %v1021_v6 = vld [vmem:[%s1429_s1 + $0x8] sm:$0xff]   ;;  %v1025_v10 = vld [vmem:[%s1429_s1 + $0x10] sm:$0xff]  }
   0x4   :  { %v1018_v3 = vld [vmem:[%s1429_s1 + $0x80] sm:$0xff]   ;;  %888 = vmatpush3.bf16.msra.mxu0 %v1017_v2  ;;  %v1022_v7 = vld [vmem:[%s1429_s1 + $0x88] sm:$0xff]   ;;  %v1026_v11 = vld [vmem:[%s1429_s1 + $0x90] sm:$0xff]  }
   0x5   :  { %952 = vmatpush3.bf16.msra.mxu1 %v1018_v3  ;;  %889 = vmatprep.subr.bf16.mxu0 %v1019_v4  ;;  %v1027_v12 = vld [vmem:[%s1429_s1 + $0x58] sm:$0xff]   ;;  %v1031_v16 = vld [vmem:[%s1429_s1 + $0x60] sm:$0xff]   ;;  %v1035_v20 = vld [vmem:[%s1429_s1 + $0x68] sm:$0xff]  }
   0x6   :  { %953 = vmatprep.subr.bf16.mxu1 %v1020_v5  ;;  %v1028_v13 = vld [vmem:[%s1429_s1 + $0xd8] sm:$0xff]   ;;  %v1032_v17 = vld [vmem:[%s1429_s1 + $0xe0] sm:$0xff]   ;;  %v1036_v21 = vld [vmem:[%s1429_s1 + $0xe8] sm:$0xff]  }
   0x7   :  { %v1029_v14 = vld [vmem:[%s1429_s1 + $0x18] sm:$0xff]   ;;  %v1033_v18 = vld [vmem:[%s1429_s1 + $0x20] sm:$0xff]   ;;  %v1037_v22 = vld [vmem:[%s1429_s1 + $0x28] sm:$0xff]  }
   0x8   :  { %890 = vmatpush3.bf16.msra.mxu0 %v1021_v6  ;;  %v1030_v15 = vld [vmem:[%s1429_s1 + $0x98] sm:$0xff]   ;;  %v1034_v19 = vld [vmem:[%s1429_s1 + $0xa0] sm:$0xff]   ;;  %v1038_v23 = vld [vmem:[%s1429_s1 + $0xa8] sm:$0xff]  }
   0x9   :  { %954 = vmatpush3.bf16.msra.mxu1 %v1022_v7  ;;  %891 = vmatprep.subr.bf16.mxu0 %v1023_v8  ;;  %v1039_v24 = vld [vmem:[%s1429_s1 + $0x70] sm:$0xff]   ;;  %v1043_v28 = vld [vmem:[%s1429_s1 + $0x78] sm:$0xff]  }
   0xa   :  { %955 = vmatprep.subr.bf16.mxu1 %v1024_v9  ;;  %v1040_v25 = vld [vmem:[%s1429_s1 + $0xf0] sm:$0xff]   ;;  %v1044_v29 = vld [vmem:[%s1429_s1 + $0xf8] sm:$0xff]   ;;  %v1315_v9 = vld [vmem:[%s1431_s2] ss:$0 sm:$0xff] }
   0xb   :  { %v1041_v26 = vld [vmem:[%s1429_s1 + $0x30] sm:$0xff]   ;;  %v1045_v30 = vld [vmem:[%s1429_s1 + $0x38] sm:$0xff]  }
   0xc   :  { %892 = vmatpush3.bf16.msra.mxu0 %v1025_v10  ;;  %v1042_v27 = vld [vmem:[%s1429_s1 + $0xb0] sm:$0xff]   ;;  %v1046_v31 = vld [vmem:[%s1429_s1 + $0xb8] sm:$0xff]  }
   0xd   :  { %956 = vmatpush3.bf16.msra.mxu1 %v1026_v11  ;;  %893 = vmatprep.subr.bf16.mxu0 %v1027_v12  ;;  %v1047_v32 = vld [vmem:[%s1430_s0] ss:$16 sps:$4 sm:$0xff]   ;;  %v1049_v33 = vld [vmem:[%s1430_s0 + $0x4] ss:$16 sps:$4 sm:$0xff]   ;;  %v1050_v34 = vld [vmem:[%s1430_s0 + $0x8] ss:$16 sps:$4 sm:$0xff]  }
   0xe   :  { %957 = vmatprep.subr.bf16.mxu1 %v1028_v13  ;;  %v1052_v35 = vld [vmem:[%s1430_s0 + $0xc] ss:$16 sps:$4 sm:$0xff]   ;;  %534 = vmatprep.mubr.bf16.mxu0 %v1049_v33  ;;  %v1053_v36 = vld [vmem:[%s1430_s0 + $0x24] ss:$16 sps:$4 sm:$0xff]   ;;  %v1057_v38 = vld [vmem:[%s1430_s0 + $0x20] ss:$16 sps:$4 sm:$0xff]  }
   0xf   :  { %631 = vmatprep.mubr.bf16.mxu1 %v1052_v35  ;;  %v1055_v37 = vld [vmem:[%s1430_s0 + $0x2c] ss:$16 sps:$4 sm:$0xff]   ;;  %v1058_v39 = vld [vmem:[%s1430_s0 + $0x28] ss:$16 sps:$4 sm:$0xff]   ;;  %v1059_v40 = vld [vmem:[%s1430_s0 + $0x44] ss:$16 sps:$4 sm:$0xff]  }
  0x10   :  { %894 = vmatpush3.bf16.msra.mxu0 %v1029_v14  ;;  %v1061_v41 = vld [vmem:[%s1430_s0 + $0x4c] ss:$16 sps:$4 sm:$0xff]   ;;  %v1063_v42 = vld [vmem:[%s1430_s0 + $0x40] ss:$16 sps:$4 sm:$0xff]   ;;  %v1064_v43 = vld [vmem:[%s1430_s0 + $0x48] ss:$16 sps:$4 sm:$0xff]  }
  0x11   :  { %958 = vmatpush3.bf16.msra.mxu1 %v1030_v15  ;;  %895 = vmatprep.subr.bf16.mxu0 %v1031_v16  ;;  %v1065_v44 = vld [vmem:[%s1430_s0 + $0x64] ss:$16 sps:$4 sm:$0xff]   ;;  %v1067_v45 = vld [vmem:[%s1430_s0 + $0x6c] ss:$16 sps:$4 sm:$0xff]   ;;  %v1069_v46 = vld [vmem:[%s1430_s0 + $0x60] ss:$16 sps:$4 sm:$0xff]  }
  0x12   :  { %959 = vmatprep.subr.bf16.mxu1 %v1032_v17  ;;  %v1070_v47 = vld [vmem:[%s1430_s0 + $0x68] ss:$16 sps:$4 sm:$0xff]   ;;  %v1071_v48 = vld [vmem:[%s1430_s0 + $0x84] ss:$16 sps:$4 sm:$0xff]   ;;  %v1073_v49 = vld [vmem:[%s1430_s0 + $0x8c] ss:$16 sps:$4 sm:$0xff]  }
  0x13   :  { %v1075_v50 = vld [vmem:[%s1430_s0 + $0x80] ss:$16 sps:$4 sm:$0xff]   ;;  %v1076_v51 = vld [vmem:[%s1430_s0 + $0x88] ss:$16 sps:$4 sm:$0xff]   ;;  %v1077_v52 = vld [vmem:[%s1430_s0 + $0xa4] ss:$16 sps:$4 sm:$0xff]  }
  0x14   :  { %896 = vmatpush3.bf16.msra.mxu0 %v1033_v18  ;;  %v1079_v53 = vld [vmem:[%s1430_s0 + $0xac] ss:$16 sps:$4 sm:$0xff]   ;;  %v1081_v54 = vld [vmem:[%s1430_s0 + $0xa0] ss:$16 sps:$4 sm:$0xff]   ;;  %v1082_v55 = vld [vmem:[%s1430_s0 + $0xa8] ss:$16 sps:$4 sm:$0xff]  }
  0x15   :  { %960 = vmatpush3.bf16.msra.mxu1 %v1034_v19  ;;  %897 = vmatprep.subr.bf16.mxu0 %v1035_v20  ;;  %v1083_v56 = vld [vmem:[%s1430_s0 + $0xc4] ss:$16 sps:$4 sm:$0xff]   ;;  %v1085_v57 = vld [vmem:[%s1430_s0 + $0xcc] ss:$16 sps:$4 sm:$0xff]   ;;  %v1087_v58 = vld [vmem:[%s1430_s0 + $0xc0] ss:$16 sps:$4 sm:$0xff]  }
  0x16   :  { %961 = vmatprep.subr.bf16.mxu1 %v1036_v21  ;;  %v1088_v59 = vld [vmem:[%s1430_s0 + $0xc8] ss:$16 sps:$4 sm:$0xff]   ;;  %v1089_v60 = vld [vmem:[%s1430_s0 + $0xe4] ss:$16 sps:$4 sm:$0xff]   ;;  %v1091_v61 = vld [vmem:[%s1430_s0 + $0xec] ss:$16 sps:$4 sm:$0xff]  }
  0x17   :  { %v1093_v62 = vld [vmem:[%s1430_s0 + $0xe0] ss:$16 sps:$4 sm:$0xff]   ;;  %v1094_v63 = vld [vmem:[%s1430_s0 + $0xe8] ss:$16 sps:$4 sm:$0xff]  }
  0x18   :  { %898 = vmatpush3.bf16.msra.mxu0 %v1037_v22  ;;  %v770_v14 = vld [vmem:[%s1432_s3] sm:$0xff]  ;;  %v771_v17 = vld [vmem:[%s1432_s3 + $0x8] sm:$0xff] }
  0x19   :  { %962 = vmatpush3.bf16.msra.mxu1 %v1038_v23  ;;  %899 = vmatprep.subr.bf16.mxu0 %v1039_v24 }
  0x1a   :  { %963 = vmatprep.subr.bf16.mxu1 %v1040_v25 }
  0x1c   :  { %900 = vmatpush3.bf16.msra.mxu0 %v1041_v26 }
  0x1d   :  { %964 = vmatpush3.bf16.msra.mxu1 %v1042_v27  ;;  %901 = vmatprep.subr.bf16.mxu0 %v1043_v28 }
  0x1e   :  { %965 = vmatprep.subr.bf16.mxu1 %v1044_v29 }
  0x20   :  { %902 = vmatpush3.bf16.msra.mxu0 %v1045_v30 }
  0x21   :  { %966 = vmatpush3.bf16.msra.mxu1 %v1046_v31 }
  0x23   :  { %535 = vmatmul.mubr.bf16.vlgmr.msra.gmra.mrb[0].mxu0 %v1047_v32 }
  0x24   :  { %632 = vmatmul.mubr.bf16.vlgmr.msra.gmra.mrb[0].mxu1 %v1050_v34  ;;  %542 = vmatprep.mubr.bf16.mxu0 %v1053_v36  ;;  %v772_v34 = vld [vmem:[%s1432_s3 + $0x10] sm:$0xff] }
  0x25   :  { %639 = vmatprep.mubr.bf16.mxu1 %v1055_v37  ;;  %v773_v37 = vld [vmem:[%s1432_s3 + $0x18] sm:$0xff] }
  0x2b   :  { %543 = vmatmul.mubr.bf16.gmra.mrb[4].mxu0 %v1057_v38 }
  0x2c   :  { %640 = vmatmul.mubr.bf16.gmra.mrb[4].mxu1 %v1058_v39  ;;  %550 = vmatprep.mubr.bf16.mxu0 %v1059_v40 }
  0x2d   :  { %647 = vmatprep.mubr.bf16.mxu1 %v1061_v41 }
  0x33   :  { %551 = vmatmul.mubr.bf16.gmra.mrb[8].mxu0 %v1063_v42 }
  0x34   :  { %648 = vmatmul.mubr.bf16.gmra.mrb[8].mxu1 %v1064_v43  ;;  %558 = vmatprep.mubr.bf16.mxu0 %v1065_v44 }
  0x35   :  { %655 = vmatprep.mubr.bf16.mxu1 %v1067_v45 }
  0x3b   :  { %559 = vmatmul.mubr.bf16.gmra.mrb[12].mxu0 %v1069_v46 }
  0x3c   :  { %656 = vmatmul.mubr.bf16.gmra.mrb[12].mxu1 %v1070_v47  ;;  %566 = vmatprep.mubr.bf16.mxu0 %v1071_v48 }
  0x3d   :  { %663 = vmatprep.mubr.bf16.mxu1 %v1073_v49 }
  0x43   :  { %567 = vmatmul.mubr.bf16.gmra.mrb[16].mxu0 %v1075_v50 }
  0x44   :  { %664 = vmatmul.mubr.bf16.gmra.mrb[16].mxu1 %v1076_v51  ;;  %574 = vmatprep.mubr.bf16.mxu0 %v1077_v52 }
  0x45   :  { %671 = vmatprep.mubr.bf16.mxu1 %v1079_v53 }
  0x4b   :  { %575 = vmatmul.mubr.bf16.gmra.mrb[20].mxu0 %v1081_v54  ;;  %v774_v54 = vld [vmem:[%s1432_s3 + $0x20] sm:$0xff] }
  0x4c   :  { %672 = vmatmul.mubr.bf16.gmra.mrb[20].mxu1 %v1082_v55  ;;  %582 = vmatprep.mubr.bf16.mxu0 %v1083_v56 }
  0x4d   :  { %679 = vmatprep.mubr.bf16.mxu1 %v1085_v57  ;;  %v775_v57 = vld [vmem:[%s1432_s3 + $0x28] sm:$0xff] }
  0x53   :  { %583 = vmatmul.mubr.bf16.gmra.mrb[24].mxu0 %v1087_v58 }
  0x54   :  { %680 = vmatmul.mubr.bf16.gmra.mrb[24].mxu1 %v1088_v59  ;;  %590 = vmatprep.mubr.bf16.mxu0 %v1089_v60 }
  0x55   :  { %687 = vmatprep.mubr.bf16.mxu1 %v1091_v61 }
  0x5b   :  { %591 = vmatmul.mubr.bf16.gmra.mrb[28].mxu0 %v1093_v62 }
  0x5c   :  { %688 = vmatmul.mubr.bf16.gmra.mrb[28].mxu1 %v1094_v63 }
  0xf6   :  { %v903_v0 = vpop.f32.mrb[0].mxu0 }
  0xf7   :  { %v967_v1 = vpop.f32.mrb[0].mxu1  ;;  %v904_v2 = vpop.f32.mrb[1].mxu0 }
  0xf8   :  { %v905_v3 = vadd.f32 %v904_v2, %v903_v0  ;;  %v968_v4 = vpop.f32.mrb[1].mxu1  ;;  %v906_v5 = vpop.f32.mrb[2].mxu0 }
  0xf9   :  { %v969_v6 = vadd.f32 %v968_v4, %v967_v1  ;;  %v970_v7 = vpop.f32.mrb[2].mxu1  ;;  %v907_v8 = vpop.f32.mrb[3].mxu0 }
  0xfa   :  { %v908_v10 = vadd.f32 %v907_v8, %v906_v5  ;;  %v971_v11 = vpop.f32.mrb[3].mxu1 }
  0xfb   :  { %v634_v12 = vadd.f32 %v969_v6, %v905_v3  ;;  %v972_v13 = vadd.f32 %v971_v11, %v970_v7  ;;  %v776_v11 = vld [vmem:[%s1432_s3 + $0x30] sm:$0xff] }
  0xfd   :  { %v754_v15 = vadd.f32 %v1315_v9, %v634_v12  ;;  %v637_v16 = vadd.f32 %v972_v13, %v908_v10 }
  0xfe   :  { %v909_v18 = vpop.f32.mrb[4].mxu0 }
  0xff   :  { %v786_v19 = vadd.f32 %v770_v14, %v754_v15  ;;  %v755_v20 = vadd.f32 %v1315_v9, %v637_v16  ;;  %v973_v21 = vpop.f32.mrb[4].mxu1  ;;  %v910_v22 = vpop.f32.mrb[5].mxu0  ;;  %v777_v14 = vld [vmem:[%s1432_s3 + $0x38] sm:$0xff] }
 0x100   :  { %v911_v23 = vadd.f32 %v910_v22, %v909_v18  ;;  %v974_v24 = vpop.f32.mrb[5].mxu1  ;;  %v912_v25 = vpop.f32.mrb[6].mxu0 }
 0x101   :  { %802 = vst [vmem:[%s1433_s4] sm:$0xff] %v786_v19  ;;  %v787_v26 = vadd.f32 %v771_v17, %v755_v20  ;;  %v975_v27 = vadd.f32 %v974_v24, %v973_v21  ;;  %v976_v28 = vpop.f32.mrb[6].mxu1  ;;  %v913_v29 = vpop.f32.mrb[7].mxu0 }
 0x102   :  { %v914_v30 = vadd.f32 %v913_v29, %v912_v25  ;;  %v977_v31 = vpop.f32.mrb[7].mxu1 }
 0x103   :  { %803 = vst [vmem:[%s1433_s4 + $0x8] sm:$0xff] %v787_v26  ;;  %v642_v32 = vadd.f32 %v975_v27, %v911_v23  ;;  %v978_v33 = vadd.f32 %v977_v31, %v976_v28  ;;  %v778_v31 = vld [vmem:[%s1432_s3 + $0x40] sm:$0xff] }
 0x105   :  { %v756_v35 = vadd.f32 %v1315_v9, %v642_v32  ;;  %v645_v36 = vadd.f32 %v978_v33, %v914_v30 }
 0x106   :  { %v915_v38 = vpop.f32.mrb[8].mxu0 }
 0x107   :  { %v788_v39 = vadd.f32 %v772_v34, %v756_v35  ;;  %v757_v40 = vadd.f32 %v1315_v9, %v645_v36  ;;  %v979_v41 = vpop.f32.mrb[8].mxu1  ;;  %v916_v42 = vpop.f32.mrb[9].mxu0  ;;  %v779_v34 = vld [vmem:[%s1432_s3 + $0x48] sm:$0xff] }
 0x108   :  { %v917_v43 = vadd.f32 %v916_v42, %v915_v38  ;;  %v980_v44 = vpop.f32.mrb[9].mxu1  ;;  %v918_v45 = vpop.f32.mrb[10].mxu0 }
 0x109   :  { %804 = vst [vmem:[%s1433_s4 + $0x10] sm:$0xff] %v788_v39  ;;  %v789_v46 = vadd.f32 %v773_v37, %v757_v40  ;;  %v981_v47 = vadd.f32 %v980_v44, %v979_v41  ;;  %v982_v48 = vpop.f32.mrb[10].mxu1  ;;  %v919_v49 = vpop.f32.mrb[11].mxu0 }
 0x10a   :  { %v920_v50 = vadd.f32 %v919_v49, %v918_v45  ;;  %v983_v51 = vpop.f32.mrb[11].mxu1 }
 0x10b   :  { %805 = vst [vmem:[%s1433_s4 + $0x18] sm:$0xff] %v789_v46  ;;  %v650_v52 = vadd.f32 %v981_v47, %v917_v43  ;;  %v984_v53 = vadd.f32 %v983_v51, %v982_v48  ;;  %v780_v51 = vld [vmem:[%s1432_s3 + $0x50] sm:$0xff] }
 0x10d   :  { %v758_v55 = vadd.f32 %v1315_v9, %v650_v52  ;;  %v653_v56 = vadd.f32 %v984_v53, %v920_v50 }
 0x10e   :  { %v921_v58 = vpop.f32.mrb[12].mxu0 }
 0x10f   :  { %v790_v59 = vadd.f32 %v774_v54, %v758_v55  ;;  %v759_v60 = vadd.f32 %v1315_v9, %v653_v56  ;;  %v985_v61 = vpop.f32.mrb[12].mxu1  ;;  %v922_v62 = vpop.f32.mrb[13].mxu0  ;;  %v781_v54 = vld [vmem:[%s1432_s3 + $0x58] sm:$0xff] }
 0x110   :  { %v923_v63 = vadd.f32 %v922_v62, %v921_v58  ;;  %v986_v0 = vpop.f32.mrb[13].mxu1  ;;  %v924_v1 = vpop.f32.mrb[14].mxu0 }
 0x111   :  { %806 = vst [vmem:[%s1433_s4 + $0x20] sm:$0xff] %v790_v59  ;;  %v791_v2 = vadd.f32 %v775_v57, %v759_v60  ;;  %v987_v3 = vadd.f32 %v986_v0, %v985_v61  ;;  %v988_v4 = vpop.f32.mrb[14].mxu1  ;;  %v925_v5 = vpop.f32.mrb[15].mxu0 }
 0x112   :  { %v926_v6 = vadd.f32 %v925_v5, %v924_v1  ;;  %v989_v7 = vpop.f32.mrb[15].mxu1 }
 0x113   :  { %807 = vst [vmem:[%s1433_s4 + $0x28] sm:$0xff] %v791_v2  ;;  %v658_v8 = vadd.f32 %v987_v3, %v923_v63  ;;  %v990_v10 = vadd.f32 %v989_v7, %v988_v4  ;;  %v782_v7 = vld [vmem:[%s1432_s3 + $0x60] sm:$0xff] }
 0x115   :  { %v760_v12 = vadd.f32 %v1315_v9, %v658_v8  ;;  %v661_v13 = vadd.f32 %v990_v10, %v926_v6 }
 0x116   :  { %v927_v15 = vpop.f32.mrb[16].mxu0 }
 0x117   :  { %v792_v16 = vadd.f32 %v776_v11, %v760_v12  ;;  %v761_v17 = vadd.f32 %v1315_v9, %v661_v13  ;;  %v991_v18 = vpop.f32.mrb[16].mxu1  ;;  %v928_v19 = vpop.f32.mrb[17].mxu0  ;;  %v783_v11 = vld [vmem:[%s1432_s3 + $0x68] sm:$0xff] }
 0x118   :  { %v929_v20 = vadd.f32 %v928_v19, %v927_v15  ;;  %v992_v21 = vpop.f32.mrb[17].mxu1  ;;  %v930_v22 = vpop.f32.mrb[18].mxu0 }
 0x119   :  { %808 = vst [vmem:[%s1433_s4 + $0x30] sm:$0xff] %v792_v16  ;;  %v793_v23 = vadd.f32 %v777_v14, %v761_v17  ;;  %v993_v24 = vadd.f32 %v992_v21, %v991_v18  ;;  %v994_v25 = vpop.f32.mrb[18].mxu1  ;;  %v931_v26 = vpop.f32.mrb[19].mxu0 }
 0x11a   :  { %v932_v27 = vadd.f32 %v931_v26, %v930_v22  ;;  %v995_v28 = vpop.f32.mrb[19].mxu1 }
 0x11b   :  { %809 = vst [vmem:[%s1433_s4 + $0x38] sm:$0xff] %v793_v23  ;;  %v666_v29 = vadd.f32 %v993_v24, %v929_v20  ;;  %v996_v30 = vadd.f32 %v995_v28, %v994_v25  ;;  %v784_v28 = vld [vmem:[%s1432_s3 + $0x70] sm:$0xff] }
 0x11d   :  { %v762_v32 = vadd.f32 %v1315_v9, %v666_v29  ;;  %v669_v33 = vadd.f32 %v996_v30, %v932_v27 }
 0x11e   :  { %v933_v35 = vpop.f32.mrb[20].mxu0 }
 0x11f   :  { %v794_v36 = vadd.f32 %v778_v31, %v762_v32  ;;  %v763_v37 = vadd.f32 %v1315_v9, %v669_v33  ;;  %v997_v38 = vpop.f32.mrb[20].mxu1  ;;  %v934_v39 = vpop.f32.mrb[21].mxu0  ;;  %v785_v31 = vld [vmem:[%s1432_s3 + $0x78] sm:$0xff] }
 0x120   :  { %v935_v40 = vadd.f32 %v934_v39, %v933_v35  ;;  %v998_v41 = vpop.f32.mrb[21].mxu1  ;;  %v936_v42 = vpop.f32.mrb[22].mxu0 }
 0x121   :  { %810 = vst [vmem:[%s1433_s4 + $0x40] sm:$0xff] %v794_v36  ;;  %v795_v43 = vadd.f32 %v779_v34, %v763_v37  ;;  %v999_v44 = vadd.f32 %v998_v41, %v997_v38  ;;  %v1000_v45 = vpop.f32.mrb[22].mxu1  ;;  %v937_v46 = vpop.f32.mrb[23].mxu0 }
 0x122   :  { %v938_v47 = vadd.f32 %v937_v46, %v936_v42  ;;  %v1001_v48 = vpop.f32.mrb[23].mxu1 }
 0x123   :  { %811 = vst [vmem:[%s1433_s4 + $0x48] sm:$0xff] %v795_v43  ;;  %v674_v49 = vadd.f32 %v999_v44, %v935_v40  ;;  %v1002_v50 = vadd.f32 %v1001_v48, %v1000_v45 }
 0x125   :  { %v764_v52 = vadd.f32 %v1315_v9, %v674_v49  ;;  %v677_v53 = vadd.f32 %v1002_v50, %v938_v47 }
 0x126   :  { %v939_v55 = vpop.f32.mrb[24].mxu0 }
 0x127   :  { %v796_v56 = vadd.f32 %v780_v51, %v764_v52  ;;  %v765_v57 = vadd.f32 %v1315_v9, %v677_v53  ;;  %v1003_v58 = vpop.f32.mrb[24].mxu1  ;;  %v940_v59 = vpop.f32.mrb[25].mxu0 }
 0x128   :  { %v941_v60 = vadd.f32 %v940_v59, %v939_v55  ;;  %v1004_v61 = vpop.f32.mrb[25].mxu1  ;;  %v942_v62 = vpop.f32.mrb[26].mxu0 }
 0x129   :  { %812 = vst [vmem:[%s1433_s4 + $0x50] sm:$0xff] %v796_v56  ;;  %v797_v63 = vadd.f32 %v781_v54, %v765_v57  ;;  %v1005_v0 = vadd.f32 %v1004_v61, %v1003_v58  ;;  %v1006_v1 = vpop.f32.mrb[26].mxu1  ;;  %v943_v2 = vpop.f32.mrb[27].mxu0 }
 0x12a   :  { %v944_v3 = vadd.f32 %v943_v2, %v942_v62  ;;  %v1007_v4 = vpop.f32.mrb[27].mxu1 }
 0x12b   :  { %813 = vst [vmem:[%s1433_s4 + $0x58] sm:$0xff] %v797_v63  ;;  %v682_v5 = vadd.f32 %v1005_v0, %v941_v60  ;;  %v1008_v6 = vadd.f32 %v1007_v4, %v1006_v1 }
 0x12d   :  { %v766_v8 = vadd.f32 %v1315_v9, %v682_v5  ;;  %v685_v10 = vadd.f32 %v1008_v6, %v944_v3 }
 0x12e   :  { %v945_v12 = vpop.f32.mrb[28].mxu0 }
 0x12f   :  { %v798_v13 = vadd.f32 %v782_v7, %v766_v8  ;;  %v767_v14 = vadd.f32 %v1315_v9, %v685_v10  ;;  %v1009_v15 = vpop.f32.mrb[28].mxu1  ;;  %v946_v16 = vpop.f32.mrb[29].mxu0 }
 0x130   :  { %v947_v17 = vadd.f32 %v946_v16, %v945_v12  ;;  %v1010_v18 = vpop.f32.mrb[29].mxu1  ;;  %v948_v19 = vpop.f32.mrb[30].mxu0 }
 0x131   :  { %814 = vst [vmem:[%s1433_s4 + $0x60] sm:$0xff] %v798_v13  ;;  %v799_v20 = vadd.f32 %v783_v11, %v767_v14  ;;  %v1011_v21 = vadd.f32 %v1010_v18, %v1009_v15  ;;  %v1012_v22 = vpop.f32.mrb[30].mxu1  ;;  %v949_v23 = vpop.f32.mrb[31].mxu0 }
 0x132   :  { %v950_v24 = vadd.f32 %v949_v23, %v948_v19  ;;  %v1013_v25 = vpop.f32.mrb[31].mxu1 }
 0x133   :  { %815 = vst [vmem:[%s1433_s4 + $0x68] sm:$0xff] %v799_v20  ;;  %v690_v26 = vadd.f32 %v1011_v21, %v947_v17  ;;  %v1014_v27 = vadd.f32 %v1013_v25, %v1012_v22 }
 0x135   :  { %v768_v29 = vadd.f32 %v1315_v9, %v690_v26  ;;  %v693_v30 = vadd.f32 %v1014_v27, %v950_v24 }
 0x137   :  { %v800_v32 = vadd.f32 %v784_v28, %v768_v29  ;;  %v769_v33 = vadd.f32 %v1315_v9, %v693_v30 }
 0x139   :  { %816 = vst [vmem:[%s1433_s4 + $0x70] sm:$0xff] %v800_v32  ;;  %v801_v34 = vadd.f32 %v785_v31, %v769_v33 }
 0x13b   :  { %817 = vst [vmem:[%s1433_s4 + $0x78] sm:$0xff] %v801_v34 }

// kernel: transformer_forward.16
= control target key start
LH: loop header
LB: loop body
LE: loop exit
PB: predicated region body
PF: predicated region fallthrough
CT: control target
= control target key end

     0   :  { %s2098_s1 = inlined_call_operand.vmem [shape: bf16[512,128], index: 1, kind: input, shape index: {}]   ;;  %s2099_s0 = inlined_call_operand.vmem [shape: bf16[128,512], index: 0, kind: input, shape index: {}]   ;;  %s2100_s2 = inlined_call_operand.vmem [shape: f32[1,128], index: 2, kind: input, shape index: {}]   ;;  %s2101_s3 = inlined_call_operand.vmem [shape: f32[128,128], index: 3, kind: input, shape index: {}]   ;;  %s2102_s6 = inlined_call_operand.vmem [shape: f32[128,128], index: 6, kind: output, shape index: {0}]   ;;  %s2103_s4 = inlined_call_operand.vmem [shape: f32[1,128], index: 4, kind: input, shape index: {}]   ;;  %s2104_s5 = inlined_call_operand.vmem [shape: f32[1,128], index: 5, kind: input, shape index: {}]   ;;  %s2105_s7 = inlined_call_operand.vmem [shape: bf16[128,128], index: 7, kind: output, shape index: {1}]  }
   0x1   :  { %v1411_v0 = vld [vmem:[%s2098_s1 + $0x40] sm:$0xff]   ;;  %v1415_v4 = vld [vmem:[%s2098_s1 + $0x48] sm:$0xff]   ;;  %v1419_v8 = vld [vmem:[%s2098_s1 + $0x50] sm:$0xff]  }
   0x2   :  { %v1412_v1 = vld [vmem:[%s2098_s1 + $0xc0] sm:$0xff]   ;;  %1283 = vmatprep.subr.bf16.mxu0 %v1411_v0  ;;  %v1416_v5 = vld [vmem:[%s2098_s1 + $0xc8] sm:$0xff]   ;;  %v1420_v9 = vld [vmem:[%s2098_s1 + $0xd0] sm:$0xff]  }
   0x3   :  { %v1413_v2 = vld [vmem:[%s2098_s1] sm:$0xff]   ;;  %1347 = vmatprep.subr.bf16.mxu1 %v1412_v1  ;;  %v1417_v6 = vld [vmem:[%s2098_s1 + $0x8] sm:$0xff]   ;;  %v1421_v10 = vld [vmem:[%s2098_s1 + $0x10] sm:$0xff]  }
   0x4   :  { %v1414_v3 = vld [vmem:[%s2098_s1 + $0x80] sm:$0xff]   ;;  %1284 = vmatpush3.bf16.msra.mxu0 %v1413_v2  ;;  %v1418_v7 = vld [vmem:[%s2098_s1 + $0x88] sm:$0xff]   ;;  %v1422_v11 = vld [vmem:[%s2098_s1 + $0x90] sm:$0xff]  }
   0x5   :  { %1348 = vmatpush3.bf16.msra.mxu1 %v1414_v3  ;;  %1285 = vmatprep.subr.bf16.mxu0 %v1415_v4  ;;  %v1423_v12 = vld [vmem:[%s2098_s1 + $0x58] sm:$0xff]   ;;  %v1427_v16 = vld [vmem:[%s2098_s1 + $0x60] sm:$0xff]   ;;  %v1431_v20 = vld [vmem:[%s2098_s1 + $0x68] sm:$0xff]  }
   0x6   :  { %1349 = vmatprep.subr.bf16.mxu1 %v1416_v5  ;;  %v1424_v13 = vld [vmem:[%s2098_s1 + $0xd8] sm:$0xff]   ;;  %v1428_v17 = vld [vmem:[%s2098_s1 + $0xe0] sm:$0xff]   ;;  %v1432_v21 = vld [vmem:[%s2098_s1 + $0xe8] sm:$0xff]  }
   0x7   :  { %v1425_v14 = vld [vmem:[%s2098_s1 + $0x18] sm:$0xff]   ;;  %v1429_v18 = vld [vmem:[%s2098_s1 + $0x20] sm:$0xff]   ;;  %v1433_v22 = vld [vmem:[%s2098_s1 + $0x28] sm:$0xff]  }
   0x8   :  { %1286 = vmatpush3.bf16.msra.mxu0 %v1417_v6  ;;  %v1426_v15 = vld [vmem:[%s2098_s1 + $0x98] sm:$0xff]   ;;  %v1430_v19 = vld [vmem:[%s2098_s1 + $0xa0] sm:$0xff]   ;;  %v1434_v23 = vld [vmem:[%s2098_s1 + $0xa8] sm:$0xff]  }
   0x9   :  { %1350 = vmatpush3.bf16.msra.mxu1 %v1418_v7  ;;  %1287 = vmatprep.subr.bf16.mxu0 %v1419_v8  ;;  %v1435_v24 = vld [vmem:[%s2098_s1 + $0x70] sm:$0xff]   ;;  %v1439_v28 = vld [vmem:[%s2098_s1 + $0x78] sm:$0xff]  }
   0xa   :  { %1351 = vmatprep.subr.bf16.mxu1 %v1420_v9  ;;  %v1436_v25 = vld [vmem:[%s2098_s1 + $0xf0] sm:$0xff]   ;;  %v1440_v29 = vld [vmem:[%s2098_s1 + $0xf8] sm:$0xff]   ;;  %v1758_v9 = vld [vmem:[%s2100_s2] ss:$0 sm:$0xff] }
   0xb   :  { %v1437_v26 = vld [vmem:[%s2098_s1 + $0x30] sm:$0xff]   ;;  %v1441_v30 = vld [vmem:[%s2098_s1 + $0x38] sm:$0xff]  }
   0xc   :  { %1288 = vmatpush3.bf16.msra.mxu0 %v1421_v10  ;;  %v1438_v27 = vld [vmem:[%s2098_s1 + $0xb0] sm:$0xff]   ;;  %v1442_v31 = vld [vmem:[%s2098_s1 + $0xb8] sm:$0xff]  }
   0xd   :  { %1352 = vmatpush3.bf16.msra.mxu1 %v1422_v11  ;;  %1289 = vmatprep.subr.bf16.mxu0 %v1423_v12  ;;  %v1443_v32 = vld [vmem:[%s2099_s0] ss:$16 sps:$4 sm:$0xff]   ;;  %v1445_v33 = vld [vmem:[%s2099_s0 + $0x4] ss:$16 sps:$4 sm:$0xff]   ;;  %v1446_v34 = vld [vmem:[%s2099_s0 + $0x8] ss:$16 sps:$4 sm:$0xff]  }
   0xe   :  { %1353 = vmatprep.subr.bf16.mxu1 %v1424_v13  ;;  %v1448_v35 = vld [vmem:[%s2099_s0 + $0xc] ss:$16 sps:$4 sm:$0xff]   ;;  %542 = vmatprep.mubr.bf16.mxu0 %v1445_v33  ;;  %v1449_v36 = vld [vmem:[%s2099_s0 + $0x24] ss:$16 sps:$4 sm:$0xff]   ;;  %v1453_v38 = vld [vmem:[%s2099_s0 + $0x20] ss:$16 sps:$4 sm:$0xff]  }
   0xf   :  { %639 = vmatprep.mubr.bf16.mxu1 %v1448_v35  ;;  %v1451_v37 = vld [vmem:[%s2099_s0 + $0x2c] ss:$16 sps:$4 sm:$0xff]   ;;  %v1454_v39 = vld [vmem:[%s2099_s0 + $0x28] ss:$16 sps:$4 sm:$0xff]   ;;  %v1455_v40 = vld [vmem:[%s2099_s0 + $0x44] ss:$16 sps:$4 sm:$0xff]  }
  0x10   :  { %1290 = vmatpush3.bf16.msra.mxu0 %v1425_v14  ;;  %v1457_v41 = vld [vmem:[%s2099_s0 + $0x4c] ss:$16 sps:$4 sm:$0xff]   ;;  %v1459_v42 = vld [vmem:[%s2099_s0 + $0x40] ss:$16 sps:$4 sm:$0xff]   ;;  %v1460_v43 = vld [vmem:[%s2099_s0 + $0x48] ss:$16 sps:$4 sm:$0xff]  }
  0x11   :  { %1354 = vmatpush3.bf16.msra.mxu1 %v1426_v15  ;;  %1291 = vmatprep.subr.bf16.mxu0 %v1427_v16  ;;  %v1461_v44 = vld [vmem:[%s2099_s0 + $0x64] ss:$16 sps:$4 sm:$0xff]   ;;  %v1463_v45 = vld [vmem:[%s2099_s0 + $0x6c] ss:$16 sps:$4 sm:$0xff]   ;;  %v1465_v46 = vld [vmem:[%s2099_s0 + $0x60] ss:$16 sps:$4 sm:$0xff]  }
  0x12   :  { %1355 = vmatprep.subr.bf16.mxu1 %v1428_v17  ;;  %v1466_v47 = vld [vmem:[%s2099_s0 + $0x68] ss:$16 sps:$4 sm:$0xff]   ;;  %v1467_v48 = vld [vmem:[%s2099_s0 + $0x84] ss:$16 sps:$4 sm:$0xff]   ;;  %v1469_v49 = vld [vmem:[%s2099_s0 + $0x8c] ss:$16 sps:$4 sm:$0xff]  }
  0x13   :  { %v1471_v50 = vld [vmem:[%s2099_s0 + $0x80] ss:$16 sps:$4 sm:$0xff]   ;;  %v1472_v51 = vld [vmem:[%s2099_s0 + $0x88] ss:$16 sps:$4 sm:$0xff]   ;;  %v1473_v52 = vld [vmem:[%s2099_s0 + $0xa4] ss:$16 sps:$4 sm:$0xff]  }
  0x14   :  { %1292 = vmatpush3.bf16.msra.mxu0 %v1429_v18  ;;  %v1475_v53 = vld [vmem:[%s2099_s0 + $0xac] ss:$16 sps:$4 sm:$0xff]   ;;  %v1477_v54 = vld [vmem:[%s2099_s0 + $0xa0] ss:$16 sps:$4 sm:$0xff]   ;;  %v1478_v55 = vld [vmem:[%s2099_s0 + $0xa8] ss:$16 sps:$4 sm:$0xff]  }
  0x15   :  { %1356 = vmatpush3.bf16.msra.mxu1 %v1430_v19  ;;  %1293 = vmatprep.subr.bf16.mxu0 %v1431_v20  ;;  %v1479_v56 = vld [vmem:[%s2099_s0 + $0xc4] ss:$16 sps:$4 sm:$0xff]   ;;  %v1481_v57 = vld [vmem:[%s2099_s0 + $0xcc] ss:$16 sps:$4 sm:$0xff]   ;;  %v1483_v58 = vld [vmem:[%s2099_s0 + $0xc0] ss:$16 sps:$4 sm:$0xff]  }
  0x16   :  { %1357 = vmatprep.subr.bf16.mxu1 %v1432_v21  ;;  %v1484_v59 = vld [vmem:[%s2099_s0 + $0xc8] ss:$16 sps:$4 sm:$0xff]   ;;  %v1485_v60 = vld [vmem:[%s2099_s0 + $0xe4] ss:$16 sps:$4 sm:$0xff]   ;;  %v1487_v61 = vld [vmem:[%s2099_s0 + $0xec] ss:$16 sps:$4 sm:$0xff]  }
  0x17   :  { %v1489_v62 = vld [vmem:[%s2099_s0 + $0xe0] ss:$16 sps:$4 sm:$0xff]   ;;  %v1490_v63 = vld [vmem:[%s2099_s0 + $0xe8] ss:$16 sps:$4 sm:$0xff]  }
  0x18   :  { %1294 = vmatpush3.bf16.msra.mxu0 %v1433_v22  ;;  %v778_v14 = vld [vmem:[%s2101_s3] sm:$0xff]  ;;  %v779_v18 = vld [vmem:[%s2101_s3 + $0x8] sm:$0xff] }
  0x19   :  { %1358 = vmatpush3.bf16.msra.mxu1 %v1434_v23  ;;  %1295 = vmatprep.subr.bf16.mxu0 %v1435_v24 }
  0x1a   :  { %1359 = vmatprep.subr.bf16.mxu1 %v1436_v25 }
  0x1c   :  { %1296 = vmatpush3.bf16.msra.mxu0 %v1437_v26 }
  0x1d   :  { %1360 = vmatpush3.bf16.msra.mxu1 %v1438_v27  ;;  %1297 = vmatprep.subr.bf16.mxu0 %v1439_v28 }
  0x1e   :  { %1361 = vmatprep.subr.bf16.mxu1 %v1440_v29 }
  0x20   :  { %1298 = vmatpush3.bf16.msra.mxu0 %v1441_v30 }
  0x21   :  { %1362 = vmatpush3.bf16.msra.mxu1 %v1442_v31 }
  0x23   :  { %543 = vmatmul.mubr.bf16.vlgmr.msra.gmra.mrb[0].mxu0 %v1443_v32 }
  0x24   :  { %640 = vmatmul.mubr.bf16.vlgmr.msra.gmra.mrb[0].mxu1 %v1446_v34  ;;  %550 = vmatprep.mubr.bf16.mxu0 %v1449_v36  ;;  %v780_v34 = vld [vmem:[%s2101_s3 + $0x10] sm:$0xff] }
  0x25   :  { %647 = vmatprep.mubr.bf16.mxu1 %v1451_v37 }
  0x2b   :  { %551 = vmatmul.mubr.bf16.gmra.mrb[4].mxu0 %v1453_v38  ;;  %v781_v38 = vld [vmem:[%s2101_s3 + $0x18] sm:$0xff] }
  0x2c   :  { %648 = vmatmul.mubr.bf16.gmra.mrb[4].mxu1 %v1454_v39  ;;  %558 = vmatprep.mubr.bf16.mxu0 %v1455_v40 }
  0x2d   :  { %655 = vmatprep.mubr.bf16.mxu1 %v1457_v41 }
  0x33   :  { %559 = vmatmul.mubr.bf16.gmra.mrb[8].mxu0 %v1459_v42 }
  0x34   :  { %656 = vmatmul.mubr.bf16.gmra.mrb[8].mxu1 %v1460_v43  ;;  %566 = vmatprep.mubr.bf16.mxu0 %v1461_v44 }
  0x35   :  { %663 = vmatprep.mubr.bf16.mxu1 %v1463_v45 }
  0x3b   :  { %567 = vmatmul.mubr.bf16.gmra.mrb[12].mxu0 %v1465_v46 }
  0x3c   :  { %664 = vmatmul.mubr.bf16.gmra.mrb[12].mxu1 %v1466_v47  ;;  %574 = vmatprep.mubr.bf16.mxu0 %v1467_v48 }
  0x3d   :  { %671 = vmatprep.mubr.bf16.mxu1 %v1469_v49 }
  0x43   :  { %575 = vmatmul.mubr.bf16.gmra.mrb[16].mxu0 %v1471_v50 }
  0x44   :  { %672 = vmatmul.mubr.bf16.gmra.mrb[16].mxu1 %v1472_v51  ;;  %582 = vmatprep.mubr.bf16.mxu0 %v1473_v52 }
  0x45   :  { %679 = vmatprep.mubr.bf16.mxu1 %v1475_v53 }
  0x4b   :  { %583 = vmatmul.mubr.bf16.gmra.mrb[20].mxu0 %v1477_v54  ;;  %v782_v54 = vld [vmem:[%s2101_s3 + $0x20] sm:$0xff] }
  0x4c   :  { %680 = vmatmul.mubr.bf16.gmra.mrb[20].mxu1 %v1478_v55  ;;  %590 = vmatprep.mubr.bf16.mxu0 %v1479_v56 }
  0x4d   :  { %687 = vmatprep.mubr.bf16.mxu1 %v1481_v57 }
  0x53   :  { %591 = vmatmul.mubr.bf16.gmra.mrb[24].mxu0 %v1483_v58  ;;  %v783_v58 = vld [vmem:[%s2101_s3 + $0x28] sm:$0xff] }
  0x54   :  { %688 = vmatmul.mubr.bf16.gmra.mrb[24].mxu1 %v1484_v59  ;;  %598 = vmatprep.mubr.bf16.mxu0 %v1485_v60 }
  0x55   :  { %695 = vmatprep.mubr.bf16.mxu1 %v1487_v61 }
  0x5b   :  { %599 = vmatmul.mubr.bf16.gmra.mrb[28].mxu0 %v1489_v62 }
  0x5c   :  { %696 = vmatmul.mubr.bf16.gmra.mrb[28].mxu1 %v1490_v63 }
  0xf6   :  { %v1299_v0 = vpop.f32.mrb[0].mxu0 }
  0xf7   :  { %v1363_v1 = vpop.f32.mrb[0].mxu1  ;;  %v1300_v2 = vpop.f32.mrb[1].mxu0 }
  0xf8   :  { %v1301_v3 = vadd.f32 %v1300_v2, %v1299_v0  ;;  %v1364_v4 = vpop.f32.mrb[1].mxu1  ;;  %v1302_v5 = vpop.f32.mrb[2].mxu0 }
  0xf9   :  { %v1365_v6 = vadd.f32 %v1364_v4, %v1363_v1  ;;  %v1366_v7 = vpop.f32.mrb[2].mxu1  ;;  %v1303_v8 = vpop.f32.mrb[3].mxu0 }
  0xfa   :  { %v1304_v10 = vadd.f32 %v1303_v8, %v1302_v5  ;;  %v1367_v11 = vpop.f32.mrb[3].mxu1 }
  0xfb   :  { %v642_v12 = vadd.f32 %v1365_v6, %v1301_v3  ;;  %v1368_v13 = vadd.f32 %v1367_v11, %v1366_v7  ;;  %v784_v11 = vld [vmem:[%s2101_s3 + $0x30] sm:$0xff] }
  0xfd   :  { %v762_v15 = vadd.f32 %v1758_v9, %v642_v12  ;;  %v645_v16 = vadd.f32 %v1368_v13, %v1304_v10 }
  0xfe   :  { %v1305_v17 = vpop.f32.mrb[4].mxu0 }
  0xff   :  { %v763_v19 = vadd.f32 %v1758_v9, %v645_v16  ;;  %v1369_v20 = vpop.f32.mrb[4].mxu1  ;;  %v1306_v21 = vpop.f32.mrb[5].mxu0  ;;  %v1768_v22 = vadd.f32 %v778_v14, %v762_v15  ;;  %v785_v15 = vld [vmem:[%s2101_s3 + $0x38] sm:$0xff] }
 0x100   :  { %v1307_v23 = vadd.f32 %v1306_v21, %v1305_v17  ;;  %v1370_v24 = vpop.f32.mrb[5].mxu1  ;;  %v1308_v25 = vpop.f32.mrb[6].mxu0 }
 0x101   :  { %v1371_v26 = vadd.f32 %v1370_v24, %v1369_v20  ;;  %v1372_v27 = vpop.f32.mrb[6].mxu1  ;;  %826 = vadd.xlane.f32.xlu0 %v1768_v22  ;;  %810 = vst [vmem:[%s2102_s6] sm:$0xff] %v1768_v22  ;;  %v1309_v28 = vpop.f32.mrb[7].mxu0  ;;  %v1775_v29 = vadd.f32 %v779_v18, %v763_v19 }
 0x102   :  { %v1310_v30 = vadd.f32 %v1309_v28, %v1308_v25  ;;  %v1373_v31 = vpop.f32.mrb[7].mxu1 }
 0x103   :  { %v650_v32 = vadd.f32 %v1371_v26, %v1307_v23  ;;  %v1374_v33 = vadd.f32 %v1373_v31, %v1372_v27  ;;  %811 = vst [vmem:[%s2102_s6 + $0x8] sm:$0xff] %v1775_v29 }
 0x105   :  { %v764_v35 = vadd.f32 %v1758_v9, %v650_v32  ;;  %v653_v36 = vadd.f32 %v1374_v33, %v1310_v30  ;;  %828 = vadd.xlane.f32.xlu0 %v1775_v29  ;;  %v786_v33 = vld [vmem:[%s2101_s3 + $0x40] sm:$0xff] }
 0x106   :  { %v1311_v37 = vpop.f32.mrb[8].mxu0 }
 0x107   :  { %v765_v39 = vadd.f32 %v1758_v9, %v653_v36  ;;  %v1375_v40 = vpop.f32.mrb[8].mxu1  ;;  %v1312_v41 = vpop.f32.mrb[9].mxu0  ;;  %v1790_v42 = vadd.f32 %v780_v34, %v764_v35 }
 0x108   :  { %v1313_v43 = vadd.f32 %v1312_v41, %v1311_v37  ;;  %v1376_v44 = vpop.f32.mrb[9].mxu1  ;;  %v1314_v45 = vpop.f32.mrb[10].mxu0  ;;  %v787_v37 = vld [vmem:[%s2101_s3 + $0x48] sm:$0xff] }
 0x109   :  { %v1377_v46 = vadd.f32 %v1376_v44, %v1375_v40  ;;  %v1378_v47 = vpop.f32.mrb[10].mxu1  ;;  %830 = vadd.xlane.f32.xlu1 %v1790_v42  ;;  %812 = vst [vmem:[%s2102_s6 + $0x10] sm:$0xff] %v1790_v42  ;;  %v1315_v48 = vpop.f32.mrb[11].mxu0  ;;  %v1797_v49 = vadd.f32 %v781_v38, %v765_v39 }
 0x10a   :  { %v1316_v50 = vadd.f32 %v1315_v48, %v1314_v45  ;;  %v1379_v51 = vpop.f32.mrb[11].mxu1 }
 0x10b   :  { %v658_v52 = vadd.f32 %v1377_v46, %v1313_v43  ;;  %v1380_v53 = vadd.f32 %v1379_v51, %v1378_v47  ;;  %813 = vst [vmem:[%s2102_s6 + $0x18] sm:$0xff] %v1797_v49 }
 0x10d   :  { %v766_v55 = vadd.f32 %v1758_v9, %v658_v52  ;;  %v661_v56 = vadd.f32 %v1380_v53, %v1316_v50  ;;  %832 = vadd.xlane.f32.xlu1 %v1797_v49 }
 0x10e   :  { %v1317_v57 = vpop.f32.mrb[12].mxu0 }
 0x10f   :  { %v767_v59 = vadd.f32 %v1758_v9, %v661_v56  ;;  %v1381_v60 = vpop.f32.mrb[12].mxu1  ;;  %v1318_v61 = vpop.f32.mrb[13].mxu0  ;;  %v1812_v62 = vadd.f32 %v782_v54, %v766_v55  ;;  %v788_v55 = vld [vmem:[%s2101_s3 + $0x50] sm:$0xff] }
 0x110   :  { %v1319_v63 = vadd.f32 %v1318_v61, %v1317_v57  ;;  %v1382_v0 = vpop.f32.mrb[13].mxu1  ;;  %v1320_v1 = vpop.f32.mrb[14].mxu0 }
 0x111   :  { %v1383_v2 = vadd.f32 %v1382_v0, %v1381_v60  ;;  %v1384_v3 = vpop.f32.mrb[14].mxu1  ;;  %814 = vst [vmem:[%s2102_s6 + $0x20] sm:$0xff] %v1812_v62  ;;  %834 = vadd.xlane.f32.xlu0 %v1812_v62  ;;  %v1321_v4 = vpop.f32.mrb[15].mxu0  ;;  %v1819_v5 = vadd.f32 %v783_v58, %v767_v59  ;;  %v789_v59 = vld [vmem:[%s2101_s3 + $0x58] sm:$0xff] }
 0x112   :  { %v1322_v6 = vadd.f32 %v1321_v4, %v1320_v1  ;;  %v1385_v7 = vpop.f32.mrb[15].mxu1 }
 0x113   :  { %v666_v8 = vadd.f32 %v1383_v2, %v1319_v63  ;;  %v1386_v10 = vadd.f32 %v1385_v7, %v1384_v3  ;;  %815 = vst [vmem:[%s2102_s6 + $0x28] sm:$0xff] %v1819_v5  ;;  %836 = vadd.xlane.f32.xlu1 %v1819_v5 }
 0x115   :  { %v768_v12 = vadd.f32 %v1758_v9, %v666_v8  ;;  %v669_v13 = vadd.f32 %v1386_v10, %v1322_v6 }
 0x116   :  { %v1323_v14 = vpop.f32.mrb[16].mxu0 }
 0x117   :  { %v769_v16 = vadd.f32 %v1758_v9, %v669_v13  ;;  %v1387_v17 = vpop.f32.mrb[16].mxu1  ;;  %v1324_v18 = vpop.f32.mrb[17].mxu0  ;;  %v1834_v19 = vadd.f32 %v784_v11, %v768_v12 }
 0x118   :  { %v1325_v20 = vadd.f32 %v1324_v18, %v1323_v14  ;;  %v1388_v21 = vpop.f32.mrb[17].mxu1  ;;  %v1326_v23 = vpop.f32.mrb[18].mxu0  ;;  %v790_v14 = vld [vmem:[%s2101_s3 + $0x60] sm:$0xff]  ;;  %v791_v18 = vld [vmem:[%s2101_s3 + $0x68] sm:$0xff] }
 0x119   :  { %v1389_v24 = vadd.f32 %v1388_v21, %v1387_v17  ;;  %v1390_v25 = vpop.f32.mrb[18].mxu1  ;;  %816 = vst [vmem:[%s2102_s6 + $0x30] sm:$0xff] %v1834_v19  ;;  %838 = vadd.xlane.f32.xlu0 %v1834_v19  ;;  %v1327_v26 = vpop.f32.mrb[19].mxu0  ;;  %v1841_v27 = vadd.f32 %v785_v15, %v769_v16 }
 0x11a   :  { %v1328_v28 = vadd.f32 %v1327_v26, %v1326_v23  ;;  %v1391_v30 = vpop.f32.mrb[19].mxu1 }
 0x11b   :  { %v674_v31 = vadd.f32 %v1389_v24, %v1325_v20  ;;  %v1392_v32 = vadd.f32 %v1391_v30, %v1390_v25  ;;  %817 = vst [vmem:[%s2102_s6 + $0x38] sm:$0xff] %v1841_v27  ;;  %840 = vadd.xlane.f32.xlu1 %v1841_v27 }
 0x11d   :  { %v770_v34 = vadd.f32 %v1758_v9, %v674_v31  ;;  %v677_v35 = vadd.f32 %v1392_v32, %v1328_v28 }
 0x11e   :  { %v1329_v36 = vpop.f32.mrb[20].mxu0 }
 0x11f   :  { %v771_v38 = vadd.f32 %v1758_v9, %v677_v35  ;;  %v1393_v39 = vpop.f32.mrb[20].mxu1  ;;  %v1330_v40 = vpop.f32.mrb[21].mxu0  ;;  %v1856_v41 = vadd.f32 %v786_v33, %v770_v34 }
 0x120   :  { %v1331_v43 = vadd.f32 %v1330_v40, %v1329_v36  ;;  %v1394_v44 = vpop.f32.mrb[21].mxu1  ;;  %v1332_v45 = vpop.f32.mrb[22].mxu0 }
 0x121   :  { %v1395_v46 = vadd.f32 %v1394_v44, %v1393_v39  ;;  %v1396_v47 = vpop.f32.mrb[22].mxu1  ;;  %818 = vst [vmem:[%s2102_s6 + $0x40] sm:$0xff] %v1856_v41  ;;  %842 = vadd.xlane.f32.xlu0 %v1856_v41  ;;  %v1333_v48 = vpop.f32.mrb[23].mxu0  ;;  %v1863_v50 = vadd.f32 %v787_v37, %v771_v38  ;;  %v792_v38 = vld [vmem:[%s2101_s3 + $0x70] sm:$0xff] }
 0x122   :  { %v1334_v51 = vadd.f32 %v1333_v48, %v1332_v45  ;;  %v1397_v52 = vpop.f32.mrb[23].mxu1 }
 0x123   :  { %v682_v53 = vadd.f32 %v1395_v46, %v1331_v43  ;;  %v1398_v54 = vadd.f32 %v1397_v52, %v1396_v47  ;;  %819 = vst [vmem:[%s2102_s6 + $0x48] sm:$0xff] %v1863_v50  ;;  %844 = vadd.xlane.f32.xlu1 %v1863_v50  ;;  %v793_v43 = vld [vmem:[%s2101_s3 + $0x78] sm:$0xff] }
 0x125   :  { %v772_v56 = vadd.f32 %v1758_v9, %v682_v53  ;;  %v685_v57 = vadd.f32 %v1398_v54, %v1334_v51 }
 0x126   :  { %v1335_v58 = vpop.f32.mrb[24].mxu0 }
 0x127   :  { %v773_v60 = vadd.f32 %v1758_v9, %v685_v57  ;;  %v1399_v61 = vpop.f32.mrb[24].mxu1  ;;  %v1336_v63 = vpop.f32.mrb[25].mxu0  ;;  %v1878_v0 = vadd.f32 %v788_v55, %v772_v56 }
 0x128   :  { %v1337_v1 = vadd.f32 %v1336_v63, %v1335_v58  ;;  %v1400_v2 = vpop.f32.mrb[25].mxu1  ;;  %v1338_v3 = vpop.f32.mrb[26].mxu0 }
 0x129   :  { %v1401_v4 = vadd.f32 %v1400_v2, %v1399_v61  ;;  %v1402_v6 = vpop.f32.mrb[26].mxu1  ;;  %820 = vst [vmem:[%s2102_s6 + $0x50] sm:$0xff] %v1878_v0  ;;  %846 = vadd.xlane.f32.xlu0 %v1878_v0  ;;  %v1339_v7 = vpop.f32.mrb[27].mxu0  ;;  %v1885_v8 = vadd.f32 %v789_v59, %v773_v60 }
 0x12a   :  { %v1340_v10 = vadd.f32 %v1339_v7, %v1338_v3  ;;  %v1403_v11 = vpop.f32.mrb[27].mxu1 }
 0x12b   :  { %v690_v12 = vadd.f32 %v1401_v4, %v1337_v1  ;;  %v1404_v13 = vadd.f32 %v1403_v11, %v1402_v6  ;;  %821 = vst [vmem:[%s2102_s6 + $0x58] sm:$0xff] %v1885_v8  ;;  %848 = vadd.xlane.f32.xlu1 %v1885_v8 }
 0x12d   :  { %v774_v15 = vadd.f32 %v1758_v9, %v690_v12  ;;  %v693_v16 = vadd.f32 %v1404_v13, %v1340_v10 }
 0x12e   :  { %v1341_v17 = vpop.f32.mrb[28].mxu0 }
 0x12f   :  { %v775_v20 = vadd.f32 %v1758_v9, %v693_v16  ;;  %v1405_v21 = vpop.f32.mrb[28].mxu1  ;;  %v1342_v23 = vpop.f32.mrb[29].mxu0  ;;  %v1900_v24 = vadd.f32 %v790_v14, %v774_v15 }
 0x130   :  { %v1343_v25 = vadd.f32 %v1342_v23, %v1341_v17  ;;  %v1406_v26 = vpop.f32.mrb[29].mxu1  ;;  %v1344_v28 = vpop.f32.mrb[30].mxu0 }
 0x131   :  { %v1407_v30 = vadd.f32 %v1406_v26, %v1405_v21  ;;  %v1408_v31 = vpop.f32.mrb[30].mxu1  ;;  %822 = vst [vmem:[%s2102_s6 + $0x60] sm:$0xff] %v1900_v24  ;;  %850 = vadd.xlane.f32.xlu0 %v1900_v24  ;;  %v1345_v32 = vpop.f32.mrb[31].mxu0  ;;  %v1907_v33 = vadd.f32 %v791_v18, %v775_v20 }
 0x132   :  { %v1346_v34 = vadd.f32 %v1345_v32, %v1344_v28  ;;  %v1409_v35 = vpop.f32.mrb[31].mxu1 }
 0x133   :  { %v698_v36 = vadd.f32 %v1407_v30, %v1343_v25  ;;  %v1410_v37 = vadd.f32 %v1409_v35, %v1408_v31  ;;  %823 = vst [vmem:[%s2102_s6 + $0x68] sm:$0xff] %v1907_v33  ;;  %852 = vadd.xlane.f32.xlu1 %v1907_v33 }
 0x135   :  { %v776_v39 = vadd.f32 %v1758_v9, %v698_v36  ;;  %v701_v40 = vadd.f32 %v1410_v37, %v1346_v34 }
 0x137   :  { %v777_v44 = vadd.f32 %v1758_v9, %v701_v40  ;;  %v1922_v45 = vadd.f32 %v792_v38, %v776_v39 }
 0x139   :  { %824 = vst [vmem:[%s2102_s6 + $0x70] sm:$0xff] %v1922_v45  ;;  %854 = vadd.xlane.f32.xlu0 %v1922_v45  ;;  %v1929_v46 = vadd.f32 %v793_v43, %v777_v44 }
 0x13b   :  { %825 = vst [vmem:[%s2102_s6 + $0x78] sm:$0xff] %v1929_v46  ;;  %856 = vadd.xlane.f32.xlu1 %v1929_v46 }
 0x18e   :  { %v827_v47 = vpop.xlane.xlu0 %826 }
 0x18f   :  { %v859_v9 = vmul.f32 0.0078125, %v827_v47 }
 0x191   :  { %v1937_v48 = vsub.f32 %v1768_v22, %v859_v9 }
 0x192   :  { %v829_v51 = vpop.xlane.xlu0 %828 }
 0x193   :  { %v860_v52 = vmul.f32 0.0078125, %v829_v51  ;;  %v891_v53 = vmul.f32 %v1937_v48, %v1937_v48 }
 0x195   :  { %v1942_v54 = vsub.f32 %v1775_v29, %v860_v52  ;;  %907 = vadd.xlane.f32.xlu0 %v891_v53 }
 0x196   :  { %v831_v55 = vpop.xlane.xlu1 %830 }
 0x197   :  { %v861_v56 = vmul.f32 0.0078125, %v831_v55  ;;  %v892_v57 = vmul.f32 %v1942_v54, %v1942_v54 }
 0x199   :  { %v1947_v58 = vsub.f32 %v1790_v42, %v861_v56  ;;  %909 = vadd.xlane.f32.xlu1 %v892_v57 }
 0x19a   :  { %v833_v22 = vpop.xlane.xlu1 %832 }
 0x19b   :  { %v862_v59 = vmul.f32 0.0078125, %v833_v22  ;;  %v893_v60 = vmul.f32 %v1947_v58, %v1947_v58 }
 0x19d   :  { %v1952_v61 = vsub.f32 %v1797_v49, %v862_v59  ;;  %911 = vadd.xlane.f32.xlu0 %v893_v60 }
 0x19e   :  { %v835_v29 = vpop.xlane.xlu0 %834 }
 0x19f   :  { %v863_v63 = vmul.f32 0.0078125, %v835_v29  ;;  %v894_v1 = vmul.f32 %v1952_v61, %v1952_v61 }
 0x1a0   :  { %v837_v2 = vpop.xlane.xlu1 %836 }
 0x1a1   :  { %v1957_v3 = vsub.f32 %v1812_v62, %v863_v63  ;;  %v864_v42 = vmul.f32 0.0078125, %v837_v2  ;;  %913 = vadd.xlane.f32.xlu1 %v894_v1 }
 0x1a3   :  { %v1960_v4 = vsub.f32 %v1819_v5, %v864_v42  ;;  %v895_v6 = vmul.f32 %v1957_v3, %v1957_v3  ;;  %v2020_v42 = vld [vmem:[%s2103_s4] ss:$0 sm:$0xff] }
 0x1a5   :  { %915 = vadd.xlane.f32.xlu0 %v895_v6  ;;  %v896_v49 = vmul.f32 %v1960_v4, %v1960_v4 }
 0x1a6   :  { %v839_v7 = vpop.xlane.xlu0 %838 }
 0x1a7   :  { %v865_v10 = vmul.f32 0.0078125, %v839_v7  ;;  %917 = vadd.xlane.f32.xlu1 %v896_v49 }
 0x1a8   :  { %v841_v11 = vpop.xlane.xlu1 %840 }
 0x1a9   :  { %v1967_v12 = vsub.f32 %v1834_v19, %v865_v10  ;;  %v866_v62 = vmul.f32 0.0078125, %v841_v11 }
 0x1ab   :  { %v1970_v13 = vsub.f32 %v1841_v27, %v866_v62  ;;  %v897_v5 = vmul.f32 %v1967_v12, %v1967_v12 }
 0x1ad   :  { %919 = vadd.xlane.f32.xlu0 %v897_v5  ;;  %v898_v14 = vmul.f32 %v1970_v13, %v1970_v13 }
 0x1ae   :  { %v843_v15 = vpop.xlane.xlu0 %842 }
 0x1af   :  { %v867_v16 = vmul.f32 0.0078125, %v843_v15  ;;  %921 = vadd.xlane.f32.xlu1 %v898_v14 }
 0x1b0   :  { %v845_v17 = vpop.xlane.xlu1 %844 }
 0x1b1   :  { %v1977_v18 = vsub.f32 %v1856_v41, %v867_v16  ;;  %v868_v19 = vmul.f32 0.0078125, %v845_v17 }
 0x1b3   :  { %v1980_v20 = vsub.f32 %v1863_v50, %v868_v19  ;;  %v899_v27 = vmul.f32 %v1977_v18, %v1977_v18 }
 0x1b5   :  { %923 = vadd.xlane.f32.xlu0 %v899_v27  ;;  %v900_v21 = vmul.f32 %v1980_v20, %v1980_v20 }
 0x1b6   :  { %v847_v23 = vpop.xlane.xlu0 %846 }
 0x1b7   :  { %v869_v25 = vmul.f32 0.0078125, %v847_v23  ;;  %925 = vadd.xlane.f32.xlu1 %v900_v21 }
 0x1b8   :  { %v849_v26 = vpop.xlane.xlu1 %848 }
 0x1b9   :  { %v1987_v28 = vsub.f32 %v1878_v0, %v869_v25  ;;  %v870_v41 = vmul.f32 0.0078125, %v849_v26 }
 0x1bb   :  { %v1990_v30 = vsub.f32 %v1885_v8, %v870_v41  ;;  %v901_v50 = vmul.f32 %v1987_v28, %v1987_v28 }
 0x1bd   :  { %927 = vadd.xlane.f32.xlu0 %v901_v50  ;;  %v902_v31 = vmul.f32 %v1990_v30, %v1990_v30 }
 0x1be   :  { %v851_v32 = vpop.xlane.xlu0 %850 }
 0x1bf   :  { %v871_v34 = vmul.f32 0.0078125, %v851_v32  ;;  %929 = vadd.xlane.f32.xlu1 %v902_v31 }
 0x1c0   :  { %v853_v35 = vpop.xlane.xlu1 %852 }
 0x1c1   :  { %v1997_v36 = vsub.f32 %v1900_v24, %v871_v34  ;;  %v872_v0 = vmul.f32 0.0078125, %v853_v35 }
 0x1c3   :  { %v2000_v37 = vsub.f32 %v1907_v33, %v872_v0  ;;  %v903_v8 = vmul.f32 %v1997_v36, %v1997_v36 }
 0x1c5   :  { %931 = vadd.xlane.f32.xlu0 %v903_v8  ;;  %v904_v38 = vmul.f32 %v2000_v37, %v2000_v37 }
 0x1c6   :  { %v855_v39 = vpop.xlane.xlu0 %854 }
 0x1c7   :  { %v873_v40 = vmul.f32 0.0078125, %v855_v39  ;;  %933 = vadd.xlane.f32.xlu1 %v904_v38 }
 0x1c8   :  { %v857_v43 = vpop.xlane.xlu1 %856 }
 0x1c9   :  { %v2007_v44 = vsub.f32 %v1922_v45, %v873_v40  ;;  %v874_v24 = vmul.f32 0.0078125, %v857_v43 }
 0x1cb   :  { %v2010_v47 = vsub.f32 %v1929_v46, %v874_v24  ;;  %v905_v33 = vmul.f32 %v2007_v44, %v2007_v44 }
 0x1cd   :  { %935 = vadd.xlane.f32.xlu0 %v905_v33  ;;  %v906_v9 = vmul.f32 %v2010_v47, %v2010_v47 }
 0x1cf   :  { %937 = vadd.xlane.f32.xlu1 %v906_v9 }
 0x222   :  { %v908_v51 = vpop.xlane.xlu0 %907 }
 0x223   :  { %v939_v52 = vmul.f32 0.0078125, %v908_v51 }
 0x225   :  { %v955_v53 = vadd.f32 1e-05, %v939_v52 }
 0x226   :  { %v910_v55 = vpop.xlane.xlu1 %909 }
 0x227   :  { %1491 = vrsqrt.f32 %v955_v53  ;;  %v940_v56 = vmul.f32 0.0078125, %v910_v55 }
 0x229   :  { %v956_v45 = vadd.f32 1e-05, %v940_v56 }
 0x22a   :  { %v912_v57 = vpop.xlane.xlu0 %911 }
 0x22b   :  { %1493 = vrsqrt.f32 %v956_v45  ;;  %v941_v22 = vmul.f32 0.0078125, %v912_v57 }
 0x22d   :  { %v957_v46 = vadd.f32 1e-05, %v941_v22 }
 0x22e   :  { %v914_v59 = vpop.xlane.xlu1 %913 }
 0x22f   :  { %1495 = vrsqrt.f32 %v957_v46  ;;  %v942_v60 = vmul.f32 0.0078125, %v914_v59 }
 0x231   :  { %v1492_v29 = vpop.eup %1491  ;;  %v958_v63 = vadd.f32 1e-05, %v942_v60 }
 0x232   :  { %v987_v1 = vmul.f32 %v1492_v29, %v1937_v48  ;;  %v916_v2 = vpop.xlane.xlu0 %915  ;;  %v2027_v48 = vld [vmem:[%s2104_s5] ss:$0 sm:$0xff] }
 0x233   :  { %1497 = vrsqrt.f32 %v958_v63  ;;  %v943_v6 = vmul.f32 0.0078125, %v916_v2 }
 0x234   :  { %v918_v49 = vpop.xlane.xlu1 %917  ;;  %v1010_v62 = vmul.f32 %v2020_v42, %v987_v1 }
 0x235   :  { %v1494_v7 = vpop.eup %1493  ;;  %v959_v10 = vadd.f32 1e-05, %v943_v6  ;;  %v944_v11 = vmul.f32 0.0078125, %v918_v49 }
 0x236   :  { %v988_v5 = vmul.f32 %v1494_v7, %v1942_v54  ;;  %v1033_v17 = vadd.f32 %v2027_v48, %v1010_v62 }
 0x237   :  { %1499 = vrsqrt.f32 %v959_v10  ;;  %v960_v14 = vadd.f32 1e-05, %v944_v11 }
 0x238   :  { %v1011_v15 = vmul.f32 %v2020_v42, %v988_v5 }
 0x239   :  { %v1496_v16 = vpop.eup %1495  ;;  %1501 = vrsqrt.f32 %v960_v14 }
 0x23a   :  { %v1034_v19 = vadd.f32 %v2027_v48, %v1011_v15  ;;  %v989_v27 = vmul.f32 %v1496_v16, %v1947_v58  ;;  %v920_v21 = vpop.xlane.xlu0 %919 }
 0x23b   :  { %v945_v23 = vmul.f32 0.0078125, %v920_v21 }
 0x23c   :  { %v1239_v54 = vpack.c.bf16 %v1034_v19, %v1033_v17  ;;  %v922_v25 = vpop.xlane.xlu1 %921  ;;  %v1012_v31 = vmul.f32 %v2020_v42, %v989_v27 }
 0x23d   :  { %v1498_v26 = vpop.eup %1497  ;;  %v961_v41 = vadd.f32 1e-05, %v945_v23  ;;  %v946_v50 = vmul.f32 0.0078125, %v922_v25 }
 0x23e   :  { %1240 = vst [vmem:[%s2105_s7] sm:$0xff] %v1239_v54   ;;  %v990_v32 = vmul.f32 %v1498_v26, %v1952_v61  ;;  %v1035_v0 = vadd.f32 %v2027_v48, %v1012_v31 }
 0x23f   :  { %1503 = vrsqrt.f32 %v961_v41  ;;  %v962_v34 = vadd.f32 1e-05, %v946_v50 }
 0x240   :  { %v1013_v35 = vmul.f32 %v2020_v42, %v990_v32 }
 0x241   :  { %v1500_v58 = vpop.eup %1499  ;;  %1505 = vrsqrt.f32 %v962_v34 }
 0x242   :  { %v1036_v8 = vadd.f32 %v2027_v48, %v1013_v35  ;;  %v991_v38 = vmul.f32 %v1500_v58, %v1957_v3  ;;  %v924_v39 = vpop.xlane.xlu0 %923 }
 0x243   :  { %v1502_v40 = vpop.eup %1501  ;;  %v947_v43 = vmul.f32 0.0078125, %v924_v39 }
 0x244   :  { %v1244_v24 = vpack.c.bf16 %v1036_v8, %v1035_v0  ;;  %v1014_v33 = vmul.f32 %v2020_v42, %v991_v38  ;;  %v992_v61 = vmul.f32 %v1502_v40, %v1960_v4  ;;  %v926_v9 = vpop.xlane.xlu1 %925 }
 0x245   :  { %v963_v51 = vadd.f32 1e-05, %v947_v43  ;;  %v948_v52 = vmul.f32 0.0078125, %v926_v9 }
 0x246   :  { %1276 = vst [vmem:[%s2105_s7 + $0x8] sm:$0xff] %v1244_v24   ;;  %v1015_v53 = vmul.f32 %v2020_v42, %v992_v61  ;;  %v1037_v3 = vadd.f32 %v2027_v48, %v1014_v33 }
 0x247   :  { %1507 = vrsqrt.f32 %v963_v51  ;;  %v964_v55 = vadd.f32 1e-05, %v948_v52 }
 0x248   :  { %v1038_v56 = vadd.f32 %v2027_v48, %v1015_v53 }
 0x249   :  { %v1504_v45 = vpop.eup %1503  ;;  %1509 = vrsqrt.f32 %v964_v55 }
 0x24a   :  { %v1249_v57 = vpack.c.bf16 %v1038_v56, %v1037_v3  ;;  %v993_v4 = vmul.f32 %v1504_v45, %v1967_v12  ;;  %v928_v22 = vpop.xlane.xlu0 %927 }
 0x24b   :  { %v1506_v46 = vpop.eup %1505  ;;  %v949_v59 = vmul.f32 0.0078125, %v928_v22 }
 0x24c   :  { %1277 = vst [vmem:[%s2105_s7 + $0x10] sm:$0xff] %v1249_v57   ;;  %v1016_v60 = vmul.f32 %v2020_v42, %v993_v4  ;;  %v994_v29 = vmul.f32 %v1506_v46, %v1970_v13  ;;  %v930_v63 = vpop.xlane.xlu1 %929 }
 0x24d   :  { %v965_v1 = vadd.f32 1e-05, %v949_v59  ;;  %v950_v2 = vmul.f32 0.0078125, %v930_v63 }
 0x24e   :  { %v1017_v6 = vmul.f32 %v2020_v42, %v994_v29  ;;  %v1039_v12 = vadd.f32 %v2027_v48, %v1016_v60 }
 0x24f   :  { %1511 = vrsqrt.f32 %v965_v1  ;;  %v966_v49 = vadd.f32 1e-05, %v950_v2 }
 0x250   :  { %v1040_v7 = vadd.f32 %v2027_v48, %v1017_v6 }
 0x251   :  { %v1508_v10 = vpop.eup %1507  ;;  %1513 = vrsqrt.f32 %v966_v49 }
 0x252   :  { %v1254_v11 = vpack.c.bf16 %v1040_v7, %v1039_v12  ;;  %v995_v62 = vmul.f32 %v1508_v10, %v1977_v18  ;;  %v932_v5 = vpop.xlane.xlu0 %931 }
 0x253   :  { %v1510_v14 = vpop.eup %1509  ;;  %v951_v15 = vmul.f32 0.0078125, %v932_v5 }
 0x254   :  { %1278 = vst [vmem:[%s2105_s7 + $0x18] sm:$0xff] %v1254_v11   ;;  %v1018_v13 = vmul.f32 %v2020_v42, %v995_v62  ;;  %v996_v16 = vmul.f32 %v1510_v14, %v1980_v20  ;;  %v934_v17 = vpop.xlane.xlu1 %933 }
 0x255   :  { %v967_v19 = vadd.f32 1e-05, %v951_v15  ;;  %v952_v27 = vmul.f32 0.0078125, %v934_v17 }
 0x256   :  { %v1019_v21 = vmul.f32 %v2020_v42, %v996_v16  ;;  %v1041_v18 = vadd.f32 %v2027_v48, %v1018_v13 }
 0x257   :  { %1515 = vrsqrt.f32 %v967_v19  ;;  %v968_v23 = vadd.f32 1e-05, %v952_v27 }
 0x258   :  { %v1042_v54 = vadd.f32 %v2027_v48, %v1019_v21 }
 0x259   :  { %v1512_v25 = vpop.eup %1511  ;;  %1517 = vrsqrt.f32 %v968_v23 }
 0x25a   :  { %v1259_v26 = vpack.c.bf16 %v1042_v54, %v1041_v18  ;;  %v997_v41 = vmul.f32 %v1512_v25, %v1987_v28  ;;  %v936_v50 = vpop.xlane.xlu0 %935 }
 0x25b   :  { %v1514_v31 = vpop.eup %1513  ;;  %v953_v32 = vmul.f32 0.0078125, %v936_v50 }
 0x25c   :  { %1279 = vst [vmem:[%s2105_s7 + $0x20] sm:$0xff] %v1259_v26   ;;  %v1020_v20 = vmul.f32 %v2020_v42, %v997_v41  ;;  %v998_v34 = vmul.f32 %v1514_v31, %v1990_v30  ;;  %v938_v35 = vpop.xlane.xlu1 %937 }
 0x25d   :  { %v969_v58 = vadd.f32 1e-05, %v953_v32  ;;  %v954_v0 = vmul.f32 0.0078125, %v938_v35 }
 0x25e   :  { %v1021_v8 = vmul.f32 %v2020_v42, %v998_v34  ;;  %v1043_v28 = vadd.f32 %v2027_v48, %v1020_v20 }
 0x25f   :  { %1519 = vrsqrt.f32 %v969_v58  ;;  %v970_v38 = vadd.f32 1e-05, %v954_v0 }
 0x260   :  { %v1044_v39 = vadd.f32 %v2027_v48, %v1021_v8 }
 0x261   :  { %v1516_v40 = vpop.eup %1515  ;;  %1521 = vrsqrt.f32 %v970_v38 }
 0x262   :  { %v1264_v43 = vpack.c.bf16 %v1044_v39, %v1043_v28  ;;  %v999_v24 = vmul.f32 %v1516_v40, %v1997_v36 }
 0x263   :  { %v1518_v33 = vpop.eup %1517 }
 0x264   :  { %1280 = vst [vmem:[%s2105_s7 + $0x28] sm:$0xff] %v1264_v43   ;;  %v1022_v30 = vmul.f32 %v2020_v42, %v999_v24  ;;  %v1000_v61 = vmul.f32 %v1518_v33, %v2000_v37 }
 0x266   :  { %v1023_v9 = vmul.f32 %v2020_v42, %v1000_v61  ;;  %v1045_v51 = vadd.f32 %v2027_v48, %v1022_v30 }
 0x268   :  { %v1046_v52 = vadd.f32 %v2027_v48, %v1023_v9 }
 0x269   :  { %v1520_v53 = vpop.eup %1519 }
 0x26a   :  { %v1269_v55 = vpack.c.bf16 %v1046_v52, %v1045_v51  ;;  %v1001_v3 = vmul.f32 %v1520_v53, %v2007_v44 }
 0x26b   :  { %v1522_v36 = vpop.eup %1521 }
 0x26c   :  { %1281 = vst [vmem:[%s2105_s7 + $0x30] sm:$0xff] %v1269_v55   ;;  %v1024_v56 = vmul.f32 %v2020_v42, %v1001_v3  ;;  %v1002_v45 = vmul.f32 %v1522_v36, %v2010_v47 }
 0x26e   :  { %v1025_v37 = vmul.f32 %v2020_v42, %v1002_v45  ;;  %v1047_v57 = vadd.f32 %v2027_v48, %v1024_v56 }
 0x270   :  { %v1048_v4 = vadd.f32 %v2027_v48, %v1025_v37 }
 0x272   :  { %v1274_v22 = vpack.c.bf16 %v1048_v4, %v1047_v57 }
 0x274   :  { %1282 = vst [vmem:[%s2105_s7 + $0x38] sm:$0xff] %v1274_v22  }

</bundles_post_ra>
